<compile_context>
chip_gen: v7x
topology: tpu7x:2x2x1
jax: 0.10.0
libtpu: 0.0.40
codegen_flags: <defaults>
</compile_context>

<pallas_src>
import functools

import jax
import jax.numpy as jnp
from jax.experimental import pallas as pl
from jax.experimental.pallas import tpu as pltpu

# --------------------------------------------------------------------------
# Constants / small helpers
# --------------------------------------------------------------------------
LANE = 128                          # lane width / feature-dim alignment
MXU_DTYPE = jnp.bfloat16            # MXU-native operand dtype (f32 accumulation)
VMEM_LIMIT_DEFAULT = 32 * 1024 * 1024


def _round_up(x, m):
    return ((x + m - 1) // m) * m


def _pad2(a, rows, cols):
    return jnp.pad(a, ((0, rows - a.shape[0]), (0, cols - a.shape[1])))


def _pad1(a, n):
    return jnp.pad(a, (0, n - a.shape[0]))


def _vmem_limit_bytes(default=VMEM_LIMIT_DEFAULT):
    """~75% of physical VMEM (=> ~96 MiB on v5e/v6e, ~48 MiB on v7x)."""
    try:
        cap = int(pltpu.get_tpu_info().vmem_capacity_bytes)
        if cap >= 64 * 1024 * 1024:
            return int(min(cap * 3 // 4, 100 * 1024 * 1024))
    except Exception:
        pass
    return default


def _pick_tile(M, max_tile=512, min_steps=4):
    """Largest tile in {512,256,128} dividing M that still yields >= min_steps
    grid steps (megacore sharding + pipelining both need work per core);
    otherwise the smallest divisor; otherwise the full extent."""
    cands = [t for t in (512, 256, 128) if t <= max_tile and t <= M and M % t == 0]
    if not cands:
        return M
    for t in cands:
        if M // t >= min_steps:
            return t
    return cands[-1]


def _to_mxu(a):
    return a if a.dtype == MXU_DTYPE else a.astype(MXU_DTYPE)


# --------------------------------------------------------------------------
# Fused whole-forward kernel (small graphs: everything VMEM-resident)
# --------------------------------------------------------------------------
def _fused_forward_kernel(*refs, num_layers, add_head):
    """Single-invocation fused forward.

    inputs : x, adj, ah_w, ah_b, (conv_w_i, conv_b_i) * L, w1, b1, w2, b2
    outputs: node_emb [L*Np, Op] (per-layer output_layer results), last_h [Np, Dp]
    """
    n_in = 4 + 2 * num_layers + 4
    x_ref, adj_ref, ahw_ref, ahb_ref = refs[0], refs[1], refs[2], refs[3]
    conv_refs = refs[4:4 + 2 * num_layers]
    w1_ref, b1_ref, w2_ref, b2_ref = refs[4 + 2 * num_layers:n_in]
    node_emb_ref = refs[n_in]
    last_ref = refs[n_in + 1]

    Np = x_ref.shape[0]
    adj = adj_ref[...]                                    # bf16, VMEM-resident

    if add_head:                                          # Linear(x_dim,x_dim)+ReLU
        h = jnp.maximum(
            jnp.dot(x_ref[...], ahw_ref[...], preferred_element_type=jnp.float32)
            + ahb_ref[...], 0.0)
    else:
        h = x_ref[...].astype(jnp.float32)

    for i in range(num_layers):                           # static unroll
        w_ref = conv_refs[2 * i]
        b_ref = conv_refs[2 * i + 1]
        # GCNConv: relu(Ahat @ (h @ W) + b)
        xw = jnp.dot(_to_mxu(h), w_ref[...], preferred_element_type=jnp.float32)
        h = jnp.maximum(
            jnp.dot(adj, _to_mxu(xw), preferred_element_type=jnp.float32)
            + b_ref[...], 0.0)
        # output_layer applied to this layer's node embedding (fused MLP)
        m = jnp.maximum(
            jnp.dot(_to_mxu(h), w1_ref[...], preferred_element_type=jnp.float32)
            + b1_ref[...], 0.0)
        e = jnp.dot(_to_mxu(m), w2_ref[...], preferred_element_type=jnp.float32) \
            + b2_ref[...]
        node_emb_ref[i * Np:(i + 1) * Np, :] = e.astype(node_emb_ref.dtype)

    last_ref[...] = h.astype(last_ref.dtype)


def _fused_forward(xp, adj, ah_w, ah_b, conv_w, conv_b, w1, b1, w2, b2, *,
                   num_layers, add_head, vmem_limit):
    Np, _ = xp.shape
    Dp = w1.shape[0]
    Op = w2.shape[1]
    args = [xp, adj, ah_w, ah_b]
    for wi, bi in zip(conv_w, conv_b):
        args += [wi, bi]
    args += [w1, b1, w2, b2]
    return pl.pallas_call(
        functools.partial(_fused_forward_kernel,
                          num_layers=num_layers, add_head=add_head),
        out_shape=(jax.ShapeDtypeStruct((num_layers * Np, Op), jnp.float32),
                   jax.ShapeDtypeStruct((Np, Dp), jnp.float32)),
        compiler_params=pltpu.CompilerParams(vmem_limit_bytes=vmem_limit),
    )(*args)


def _fused_fits(Np, Kx, Dp, Op, L, vmem_limit):
    bf, f32 = 2, 4
    weights = Kx * Kx * bf + Kx * f32                       # additional_head
    weights += (Kx * Dp + max(L - 1, 0) * Dp * Dp) * bf + L * Dp * f32
    weights += Dp * Dp * bf + Dp * f32 + Dp * Op * bf + Op * f32
    io = Np * Kx * bf + Np * Np * bf + L * Np * Op * f32 + Np * Dp * f32
    temps = Np * (Kx + 4 * Dp + 2 * Op) * f32               # h/xw/m/e working set
    return (weights + io + temps) < vmem_limit // 2


# --------------------------------------------------------------------------
# Tiled fallback kernels (large graphs)
# --------------------------------------------------------------------------
def _linear_kernel(x_ref, w_ref, b_ref, o_ref, *, relu):
    y = jnp.dot(_to_mxu(x_ref[...]), w_ref[...],
                preferred_element_type=jnp.float32) + b_ref[...]
    if relu:
        y = jnp.maximum(y, 0.0)
    o_ref[...] = y.astype(o_ref.dtype)


def linear(x, w, b, relu=False, out_dtype=jnp.float32,
           vmem_limit=VMEM_LIMIT_DEFAULT):
    """x:[M,K], w:[K,N] (bf16), b:[1,N] (f32) -> act(x@w+b):[M,N]."""
    M, K = x.shape
    _, N = w.shape
    tm = _pick_tile(M)
    return pl.pallas_call(
        functools.partial(_linear_kernel, relu=relu),
        out_shape=jax.ShapeDtypeStruct((M, N), out_dtype),
        grid=(M // tm,),
        in_specs=[
            pl.BlockSpec((tm, K), lambda i: (i, 0)),
            pl.BlockSpec((K, N), lambda i: (0, 0)),
            pl.BlockSpec((1, N), lambda i: (0, 0)),
        ],
        out_specs=pl.BlockSpec((tm, N), lambda i: (i, 0)),
        compiler_params=pltpu.CompilerParams(
            dimension_semantics=("parallel",),
            vmem_limit_bytes=vmem_limit),
    )(x, w, b)


def _mlp2_kernel(x_ref, w1_ref, b1_ref, w2_ref, b2_ref, o_ref):
    h = jnp.dot(_to_mxu(x_ref[...]), w1_ref[...],
                preferred_element_type=jnp.float32) + b1_ref[...]
    h = jnp.maximum(h, 0.0)
    y = jnp.dot(_to_mxu(h), w2_ref[...],
                preferred_element_type=jnp.float32) + b2_ref[...]
    o_ref[...] = y.astype(o_ref.dtype)


def mlp2(x, w1, b1, w2, b2, vmem_limit=VMEM_LIMIT_DEFAULT):
    """Fused output_layer: (relu(x@w1+b1))@w2+b2; hidden never touches HBM."""
    M, _ = x.shape
    H = w1.shape[1]
    N = w2.shape[1]
    tm = _pick_tile(M)
    return pl.pallas_call(
        _mlp2_kernel,
        out_shape=jax.ShapeDtypeStruct((M, N), jnp.float32),
        grid=(M // tm,),
        in_specs=[
            pl.BlockSpec((tm, x.shape[1]), lambda i: (i, 0)),
            pl.BlockSpec((x.shape[1], H), lambda i: (0, 0)),
            pl.BlockSpec((1, H), lambda i: (0, 0)),
            pl.BlockSpec((H, N), lambda i: (0, 0)),
            pl.BlockSpec((1, N), lambda i: (0, 0)),
        ],
        out_specs=pl.BlockSpec((tm, N), lambda i: (i, 0)),
        compiler_params=pltpu.CompilerParams(
            dimension_semantics=("parallel",),
            vmem_limit_bytes=vmem_limit),
    )(x, w1, b1, w2, b2)


def _aggregate_kernel(adj_ref, xw_ref, b_ref, o_ref, acc_ref, *, relu):
    @pl.when(pl.program_id(1) == 0)
    def _():
        acc_ref[...] = jnp.zeros_like(acc_ref)

    acc_ref[...] += jnp.dot(adj_ref[...], xw_ref[...],
                            preferred_element_type=jnp.float32)

    @pl.when(pl.program_id(1) == pl.num_programs(1) - 1)
    def _():
        y = acc_ref[...] + b_ref[...]
        if relu:
            y = jnp.maximum(y, 0.0)
        o_ref[...] = y.astype(o_ref.dtype)


def gcn_aggregate(adj, xw, b, relu=True, out_dtype=jnp.float32,
                  vmem_limit=VMEM_LIMIT_DEFAULT):
    """adj:[Nr,Nc] bf16, xw:[Nc,D] bf16, b:[1,D] f32 -> relu(adj@xw+b):[Nr,D]."""
    # TODO(synk): for graphs too big for the fused path but whose bf16 adjacency
    # still fits VMEM, add a layer grid axis with a constant adj index_map so the
    # adjacency is read from HBM once per forward instead of once per layer.
    Nr, Nc = adj.shape
    _, D = xw.shape
    tm = _pick_tile(Nr)
    tk = _pick_tile(Nc, min_steps=1)
    return pl.pallas_call(
        functools.partial(_aggregate_kernel, relu=relu),
        out_shape=jax.ShapeDtypeStruct((Nr, D), out_dtype),
        grid=(Nr // tm, Nc // tk),
        in_specs=[
            pl.BlockSpec((tm, tk), lambda i, k: (i, k),
                         pipeline_mode=pl.Buffered(3)),
            pl.BlockSpec((tk, D), lambda i, k: (k, 0)),
            pl.BlockSpec((1, D), lambda i, k: (0, 0)),
        ],
        out_specs=pl.BlockSpec((tm, D), lambda i, k: (i, 0)),
        scratch_shapes=[pltpu.VMEM((tm, D), jnp.float32)],
        compiler_params=pltpu.CompilerParams(
            dimension_semantics=("parallel", "arbitrary"),
            vmem_limit_bytes=vmem_limit),
    )(adj, xw, b)


# --------------------------------------------------------------------------
# Plain-JAX glue (graph preprocessing, pooling, parameter init)
# --------------------------------------------------------------------------
def gcn_norm_dense(edge_index, num_nodes, padded_nodes):
    """Dense Ahat = D^{-1/2}(A+I)D^{-1/2}, zero-padded to [padded, padded]."""
    src, dst = edge_index[0], edge_index[1]
    loop = jnp.arange(num_nodes)
    src = jnp.concatenate([src, loop])
    dst = jnp.concatenate([dst, loop])
    a = jnp.zeros((padded_nodes, padded_nodes), jnp.float32).at[dst, src].add(1.0)
    deg = a.sum(axis=1)                                   # in-degree incl. self loop
    dinv = jnp.where(deg > 0, jax.lax.rsqrt(deg), 0.0)
    return dinv[:, None] * a * dinv[None, :]


def global_mean_pool(x, batch, num_graphs):
    """Per-graph mean of node features; tiny -> plain JAX (no kernel overhead)."""
    x = x.astype(jnp.float32)
    onehot = (batch[None, :] == jnp.arange(num_graphs)[:, None]).astype(jnp.float32)
    counts = onehot.sum(axis=1, keepdims=True)
    return (onehot @ x) / jnp.maximum(counts, 1.0)


def xavier_uniform(key, fan_in, fan_out):
    limit = (6.0 / (fan_in + fan_out)) ** 0.5
    return jax.random.uniform(key, (fan_in, fan_out), jnp.float32, -limit, limit)


def init_params(key, x_dim, emb_dim, out_dim, num_layers):
    keys = jax.random.split(key, 3 + num_layers)
    params = {
        "ah_w": xavier_uniform(keys[0], x_dim, x_dim),
        "ah_b": jnp.zeros((x_dim,), jnp.float32),
        "out_w1": xavier_uniform(keys[1], emb_dim, emb_dim),
        "out_b1": jnp.zeros((emb_dim,), jnp.float32),
        "out_w2": xavier_uniform(keys[2], emb_dim, out_dim),
        "out_b2": jnp.zeros((out_dim,), jnp.float32),
        "conv_w": [],
        "conv_b": [],
    }
    for i in range(num_layers):
        fin = x_dim if i == 0 else emb_dim
        params["conv_w"].append(xavier_uniform(keys[3 + i], fin, emb_dim))
        params["conv_b"].append(jnp.zeros((emb_dim,), jnp.float32))
    return params


# --------------------------------------------------------------------------
# GCN.forward
# --------------------------------------------------------------------------
def gcn_forward(params, x, edge_index, batch, edge_attr, num_graphs, num_layers,
                additional_head=True):
    del edge_attr  # unused by the reference forward
    N, x_dim = x.shape
    emb = params["conv_w"][0].shape[1]
    out_dim = params["out_w2"].shape[1]

    # Lane-aligned padded sizes (128, NOT the reduction tile).  Zero padding is
    # inert: zero adj rows/cols and zero weight rows kill padded contributions,
    # and padded rows/cols are sliced off at the end.
    Np = _round_up(max(N, 1), LANE)
    Kx = _round_up(x_dim, LANE)
    Dp = _round_up(emb, LANE)
    Op = _round_up(out_dim, LANE)

    # bf16 MXU operands stored in HBM (half the DMA bytes, no per-step casts).
    xp = _pad2(x, Np, Kx).astype(MXU_DTYPE)
    adj = gcn_norm_dense(edge_index, N, Np).astype(MXU_DTYPE)        # [Np, Np]

    ah_w = _pad2(params["ah_w"], Kx, Kx).astype(MXU_DTYPE)
    ah_b = _pad1(params["ah_b"], Kx).reshape(1, Kx)
    conv_w = [_pad2(params["conv_w"][0], Kx, Dp).astype(MXU_DTYPE)] + \
             [_pad2(w, Dp, Dp).astype(MXU_DTYPE) for w in params["conv_w"][1:]]
    conv_b = [_pad1(b, Dp).reshape(1, Dp) for b in params["conv_b"]]
    out_w1 = _pad2(params["out_w1"], Dp, Dp).astype(MXU_DTYPE)
    out_b1 = _pad1(params["out_b1"], Dp).reshape(1, Dp)
    out_w2 = _pad2(params["out_w2"], Dp, Op).astype(MXU_DTYPE)
    out_b2 = _pad1(params["out_b2"], Op).reshape(1, Op)

    vmem_limit = _vmem_limit_bytes()

    if _fused_fits(Np, Kx, Dp, Op, num_layers, vmem_limit):
        # ---- small-graph fast path: one fused kernel, everything VMEM-resident
        node_emb_flat, last_h = _fused_forward(
            xp, adj, ah_w, ah_b, conv_w, conv_b,
            out_w1, out_b1, out_w2, out_b2,
            num_layers=num_layers, add_head=additional_head,
            vmem_limit=vmem_limit)
        node_emb_l = node_emb_flat.reshape(num_layers, Np, Op)
        embeddings_n = jnp.transpose(node_emb_l, (1, 0, 2))[:N, :, :out_dim]
        x_last = last_h[:N, :emb]
    else:
        # ---- tiled fallback (large graphs)
        zero_b = jnp.zeros((1, Dp), jnp.float32)
        h = xp
        if additional_head:
            h = linear(xp, ah_w, ah_b, relu=True, out_dtype=MXU_DTYPE,
                       vmem_limit=vmem_limit)                         # [Np, Kx]
        xs = []
        for i in range(num_layers):
            xw = linear(h, conv_w[i], zero_b, relu=False, out_dtype=MXU_DTYPE,
                        vmem_limit=vmem_limit)                        # X @ W once/layer
            h = gcn_aggregate(adj, xw, conv_b[i], relu=True, out_dtype=MXU_DTYPE,
                              vmem_limit=vmem_limit)                  # relu(Ahat@xw+b)
            xs.append(h)
        flat = jnp.stack(xs, axis=1).reshape(Np * num_layers, Dp)
        emb_n = mlp2(flat, out_w1, out_b1, out_w2, out_b2,
                     vmem_limit=vmem_limit)                           # [Np*L, Op]
        embeddings_n = emb_n.reshape(Np, num_layers, Op)[:N, :, :out_dim]
        x_last = xs[-1][:N, :emb]

    # global mean pool of last-layer node embeddings (plain JAX, tiny)
    embeddings_g = global_mean_pool(x_last, batch, num_graphs)        # [G, emb]

    return embeddings_g[:, None, :], embeddings_n, None


# --------------------------------------------------------------------------
if __name__ == "__main__":
    # small shapes consistent with the module
    num_layers = 3        # args.num_layers
    x_dim = 16            # args.x_dim
    graph_emb_dim = 32    # args.graph_emb_dim (shrunk from 512)
    out_dim = 768         # fixed by the module's output_layer
    N = 8                 # total nodes
    G = 2                 # graphs in the batch

    key = jax.random.PRNGKey(0)
    kx, kp = jax.random.split(key)

    x = jax.random.normal(kx, (N, x_dim), jnp.float32)
    # two small graphs: nodes 0-3 and 4-7, simple directed ring edges in each
    edge_index = jnp.array(
        [[0, 1, 2, 3, 4, 5, 6, 7],
         [1, 2, 3, 0, 5, 6, 7, 4]], dtype=jnp.int32)
    batch = jnp.array([0, 0, 0, 0, 1, 1, 1, 1], dtype=jnp.int32)
    edge_attr = None

    params = init_params(kp, x_dim, graph_emb_dim, out_dim, num_layers)

    emb_g, emb_n, _ = gcn_forward(
        params, x, edge_index, batch, edge_attr,
        num_graphs=G, num_layers=num_layers)
    jax.block_until_ready((emb_g, emb_n))

    assert emb_g.shape == (G, 1, graph_emb_dim)
    assert emb_n.shape == (N, num_layers, out_dim)
    assert bool(jnp.all(jnp.isfinite(emb_g))) and bool(jnp.all(jnp.isfinite(emb_n)))
    print("KERNEL_OK")
</pallas_src>

<mosaic_0001>
module attributes {stable_mosaic.version = 11 : i64} {
  func.func @_fused_forward_kernel(%arg0: memref<128x128xbf16, #tpu.memory_space<vmem>>, %arg1: memref<128x128xbf16, #tpu.memory_space<vmem>>, %arg2: memref<128x128xbf16, #tpu.memory_space<vmem>>, %arg3: memref<1x128xf32, #tpu.memory_space<vmem>>, %arg4: memref<128x128xbf16, #tpu.memory_space<vmem>>, %arg5: memref<1x128xf32, #tpu.memory_space<vmem>>, %arg6: memref<128x128xbf16, #tpu.memory_space<vmem>>, %arg7: memref<1x128xf32, #tpu.memory_space<vmem>>, %arg8: memref<128x128xbf16, #tpu.memory_space<vmem>>, %arg9: memref<1x128xf32, #tpu.memory_space<vmem>>, %arg10: memref<128x128xbf16, #tpu.memory_space<vmem>>, %arg11: memref<1x128xf32, #tpu.memory_space<vmem>>, %arg12: memref<128x768xbf16, #tpu.memory_space<vmem>>, %arg13: memref<1x768xf32, #tpu.memory_space<vmem>>, %arg14: memref<384x768xf32, #tpu.memory_space<vmem>>, %arg15: memref<128x128xf32, #tpu.memory_space<vmem>>) attributes {dimension_semantics = [], scalar_prefetch = 0 : i64, scratch_operands = 0 : i64, tpu.core_type = #tpu.core_type<tc>} {
    %c0 = arith.constant 0 : index
    %c0_0 = arith.constant 0 : index
    %0 = vector.load %arg1[%c0, %c0_0] : memref<128x128xbf16, #tpu.memory_space<vmem>>, vector<128x128xbf16>
    %c0_1 = arith.constant 0 : index
    %c0_2 = arith.constant 0 : index
    %1 = vector.load %arg0[%c0_1, %c0_2] : memref<128x128xbf16, #tpu.memory_space<vmem>>, vector<128x128xbf16>
    %c0_3 = arith.constant 0 : index
    %c0_4 = arith.constant 0 : index
    %2 = vector.load %arg2[%c0_3, %c0_4] : memref<128x128xbf16, #tpu.memory_space<vmem>>, vector<128x128xbf16>
    %cst = arith.constant dense<0.000000e+00> : vector<128x128xf32>
    %3 = tpu.matmul %1, %2, %cst {dimension_numbers = #tpu.dot_dimension_numbers<[1], [0], [0], [1], [0, 0, 1, 1], [], []>} : vector<128x128xbf16>, vector<128x128xbf16>, vector<128x128xf32> -> vector<128x128xf32>
    %c0_5 = arith.constant 0 : index
    %c0_6 = arith.constant 0 : index
    %4 = vector.load %arg3[%c0_5, %c0_6] : memref<1x128xf32, #tpu.memory_space<vmem>>, vector<1x128xf32>
    %5 = vector.broadcast %4 : vector<1x128xf32> to vector<128x128xf32>
    %6 = arith.addf %3, %5 : vector<128x128xf32>
    %cst_7 = arith.constant 0.000000e+00 : f32
    %7 = vector.broadcast %cst_7 : f32 to vector<128x128xf32>
    %8 = arith.maximumf %6, %7 : vector<128x128xf32>
    %9 = arith.truncf %8 : vector<128x128xf32> to vector<128x128xbf16>
    %c0_8 = arith.constant 0 : index
    %c0_9 = arith.constant 0 : index
    %10 = vector.load %arg4[%c0_8, %c0_9] : memref<128x128xbf16, #tpu.memory_space<vmem>>, vector<128x128xbf16>
    %cst_10 = arith.constant dense<0.000000e+00> : vector<128x128xf32>
    %11 = tpu.matmul %9, %10, %cst_10 {dimension_numbers = #tpu.dot_dimension_numbers<[1], [0], [0], [1], [0, 0, 1, 1], [], []>} : vector<128x128xbf16>, vector<128x128xbf16>, vector<128x128xf32> -> vector<128x128xf32>
    %12 = arith.truncf %11 : vector<128x128xf32> to vector<128x128xbf16>
    %cst_11 = arith.constant dense<0.000000e+00> : vector<128x128xf32>
    %13 = tpu.matmul %0, %12, %cst_11 {dimension_numbers = #tpu.dot_dimension_numbers<[1], [0], [0], [1], [0, 0, 1, 1], [], []>} : vector<128x128xbf16>, vector<128x128xbf16>, vector<128x128xf32> -> vector<128x128xf32>
    %c0_12 = arith.constant 0 : index
    %c0_13 = arith.constant 0 : index
    %14 = vector.load %arg5[%c0_12, %c0_13] : memref<1x128xf32, #tpu.memory_space<vmem>>, vector<1x128xf32>
    %15 = vector.broadcast %14 : vector<1x128xf32> to vector<128x128xf32>
    %16 = arith.addf %13, %15 : vector<128x128xf32>
    %cst_14 = arith.constant 0.000000e+00 : f32
    %17 = vector.broadcast %cst_14 : f32 to vector<128x128xf32>
    %18 = arith.maximumf %16, %17 : vector<128x128xf32>
    %19 = arith.truncf %18 : vector<128x128xf32> to vector<128x128xbf16>
    %c0_15 = arith.constant 0 : index
    %c0_16 = arith.constant 0 : index
    %20 = vector.load %arg10[%c0_15, %c0_16] : memref<128x128xbf16, #tpu.memory_space<vmem>>, vector<128x128xbf16>
    %cst_17 = arith.constant dense<0.000000e+00> : vector<128x128xf32>
    %21 = tpu.matmul %19, %20, %cst_17 {dimension_numbers = #tpu.dot_dimension_numbers<[1], [0], [0], [1], [0, 0, 1, 1], [], []>} : vector<128x128xbf16>, vector<128x128xbf16>, vector<128x128xf32> -> vector<128x128xf32>
    %c0_18 = arith.constant 0 : index
    %c0_19 = arith.constant 0 : index
    %22 = vector.load %arg11[%c0_18, %c0_19] : memref<1x128xf32, #tpu.memory_space<vmem>>, vector<1x128xf32>
    %23 = vector.broadcast %22 : vector<1x128xf32> to vector<128x128xf32>
    %24 = arith.addf %21, %23 : vector<128x128xf32>
    %cst_20 = arith.constant 0.000000e+00 : f32
    %25 = vector.broadcast %cst_20 : f32 to vector<128x128xf32>
    %26 = arith.maximumf %24, %25 : vector<128x128xf32>
    %27 = arith.truncf %26 : vector<128x128xf32> to vector<128x128xbf16>
    %c0_21 = arith.constant 0 : index
    %c0_22 = arith.constant 0 : index
    %28 = vector.load %arg12[%c0_21, %c0_22] : memref<128x768xbf16, #tpu.memory_space<vmem>>, vector<128x768xbf16>
    %cst_23 = arith.constant dense<0.000000e+00> : vector<128x768xf32>
    %29 = tpu.matmul %27, %28, %cst_23 {dimension_numbers = #tpu.dot_dimension_numbers<[1], [0], [0], [1], [0, 0, 1, 1], [], []>} : vector<128x128xbf16>, vector<128x768xbf16>, vector<128x768xf32> -> vector<128x768xf32>
    %c0_24 = arith.constant 0 : index
    %c0_25 = arith.constant 0 : index
    %30 = vector.load %arg13[%c0_24, %c0_25] : memref<1x768xf32, #tpu.memory_space<vmem>>, vector<1x768xf32>
    %31 = vector.broadcast %30 : vector<1x768xf32> to vector<128x768xf32>
    %32 = arith.addf %29, %31 : vector<128x768xf32>
    %c0_26 = arith.constant 0 : index
    %c0_27 = arith.constant 0 : index
    %33 = vector.load %arg14[%c0_26, %c0_27] : memref<384x768xf32, #tpu.memory_space<vmem>>, vector<128x768xf32>
    tpu.vector_store %arg14[%c0_26, %c0_27], %32 {strides = array<i32>} : memref<384x768xf32, #tpu.memory_space<vmem>>, vector<128x768xf32>,
    %34 = arith.truncf %18 : vector<128x128xf32> to vector<128x128xbf16>
    %c0_28 = arith.constant 0 : index
    %c0_29 = arith.constant 0 : index
    %35 = vector.load %arg6[%c0_28, %c0_29] : memref<128x128xbf16, #tpu.memory_space<vmem>>, vector<128x128xbf16>
    %cst_30 = arith.constant dense<0.000000e+00> : vector<128x128xf32>
    %36 = tpu.matmul %34, %35, %cst_30 {dimension_numbers = #tpu.dot_dimension_numbers<[1], [0], [0], [1], [0, 0, 1, 1], [], []>} : vector<128x128xbf16>, vector<128x128xbf16>, vector<128x128xf32> -> vector<128x128xf32>
    %37 = arith.truncf %36 : vector<128x128xf32> to vector<128x128xbf16>
    %cst_31 = arith.constant dense<0.000000e+00> : vector<128x128xf32>
    %38 = tpu.matmul %0, %37, %cst_31 {dimension_numbers = #tpu.dot_dimension_numbers<[1], [0], [0], [1], [0, 0, 1, 1], [], []>} : vector<128x128xbf16>, vector<128x128xbf16>, vector<128x128xf32> -> vector<128x128xf32>
    %c0_32 = arith.constant 0 : index
    %c0_33 = arith.constant 0 : index
    %39 = vector.load %arg7[%c0_32, %c0_33] : memref<1x128xf32, #tpu.memory_space<vmem>>, vector<1x128xf32>
    %40 = vector.broadcast %39 : vector<1x128xf32> to vector<128x128xf32>
    %41 = arith.addf %38, %40 : vector<128x128xf32>
    %cst_34 = arith.constant 0.000000e+00 : f32
    %42 = vector.broadcast %cst_34 : f32 to vector<128x128xf32>
    %43 = arith.maximumf %41, %42 : vector<128x128xf32>
    %44 = arith.truncf %43 : vector<128x128xf32> to vector<128x128xbf16>
    %c0_35 = arith.constant 0 : index
    %c0_36 = arith.constant 0 : index
    %45 = vector.load %arg10[%c0_35, %c0_36] : memref<128x128xbf16, #tpu.memory_space<vmem>>, vector<128x128xbf16>
    %cst_37 = arith.constant dense<0.000000e+00> : vector<128x128xf32>
    %46 = tpu.matmul %44, %45, %cst_37 {dimension_numbers = #tpu.dot_dimension_numbers<[1], [0], [0], [1], [0, 0, 1, 1], [], []>} : vector<128x128xbf16>, vector<128x128xbf16>, vector<128x128xf32> -> vector<128x128xf32>
    %c0_38 = arith.constant 0 : index
    %c0_39 = arith.constant 0 : index
    %47 = vector.load %arg11[%c0_38, %c0_39] : memref<1x128xf32, #tpu.memory_space<vmem>>, vector<1x128xf32>
    %48 = vector.broadcast %47 : vector<1x128xf32> to vector<128x128xf32>
    %49 = arith.addf %46, %48 : vector<128x128xf32>
    %cst_40 = arith.constant 0.000000e+00 : f32
    %50 = vector.broadcast %cst_40 : f32 to vector<128x128xf32>
    %51 = arith.maximumf %49, %50 : vector<128x128xf32>
    %52 = arith.truncf %51 : vector<128x128xf32> to vector<128x128xbf16>
    %c0_41 = arith.constant 0 : index
    %c0_42 = arith.constant 0 : index
    %53 = vector.load %arg12[%c0_41, %c0_42] : memref<128x768xbf16, #tpu.memory_space<vmem>>, vector<128x768xbf16>
    %cst_43 = arith.constant dense<0.000000e+00> : vector<128x768xf32>
    %54 = tpu.matmul %52, %53, %cst_43 {dimension_numbers = #tpu.dot_dimension_numbers<[1], [0], [0], [1], [0, 0, 1, 1], [], []>} : vector<128x128xbf16>, vector<128x768xbf16>, vector<128x768xf32> -> vector<128x768xf32>
    %c0_44 = arith.constant 0 : index
    %c0_45 = arith.constant 0 : index
    %55 = vector.load %arg13[%c0_44, %c0_45] : memref<1x768xf32, #tpu.memory_space<vmem>>, vector<1x768xf32>
    %56 = vector.broadcast %55 : vector<1x768xf32> to vector<128x768xf32>
    %57 = arith.addf %54, %56 : vector<128x768xf32>
    %c128 = arith.constant 128 : index
    %c0_46 = arith.constant 0 : index
    %58 = vector.load %arg14[%c128, %c0_46] : memref<384x768xf32, #tpu.memory_space<vmem>>, vector<128x768xf32>
    tpu.vector_store %arg14[%c128, %c0_46], %57 {strides = array<i32>} : memref<384x768xf32, #tpu.memory_space<vmem>>, vector<128x768xf32>,
    %59 = arith.truncf %43 : vector<128x128xf32> to vector<128x128xbf16>
    %c0_47 = arith.constant 0 : index
    %c0_48 = arith.constant 0 : index
    %60 = vector.load %arg8[%c0_47, %c0_48] : memref<128x128xbf16, #tpu.memory_space<vmem>>, vector<128x128xbf16>
    %cst_49 = arith.constant dense<0.000000e+00> : vector<128x128xf32>
    %61 = tpu.matmul %59, %60, %cst_49 {dimension_numbers = #tpu.dot_dimension_numbers<[1], [0], [0], [1], [0, 0, 1, 1], [], []>} : vector<128x128xbf16>, vector<128x128xbf16>, vector<128x128xf32> -> vector<128x128xf32>
    %62 = arith.truncf %61 : vector<128x128xf32> to vector<128x128xbf16>
    %cst_50 = arith.constant dense<0.000000e+00> : vector<128x128xf32>
    %63 = tpu.matmul %0, %62, %cst_50 {dimension_numbers = #tpu.dot_dimension_numbers<[1], [0], [0], [1], [0, 0, 1, 1], [], []>} : vector<128x128xbf16>, vector<128x128xbf16>, vector<128x128xf32> -> vector<128x128xf32>
    %c0_51 = arith.constant 0 : index
    %c0_52 = arith.constant 0 : index
    %64 = vector.load %arg9[%c0_51, %c0_52] : memref<1x128xf32, #tpu.memory_space<vmem>>, vector<1x128xf32>
    %65 = vector.broadcast %64 : vector<1x128xf32> to vector<128x128xf32>
    %66 = arith.addf %63, %65 : vector<128x128xf32>
    %cst_53 = arith.constant 0.000000e+00 : f32
    %67 = vector.broadcast %cst_53 : f32 to vector<128x128xf32>
    %68 = arith.maximumf %66, %67 : vector<128x128xf32>
    %69 = arith.truncf %68 : vector<128x128xf32> to vector<128x128xbf16>
    %c0_54 = arith.constant 0 : index
    %c0_55 = arith.constant 0 : index
    %70 = vector.load %arg10[%c0_54, %c0_55] : memref<128x128xbf16, #tpu.memory_space<vmem>>, vector<128x128xbf16>
    %cst_56 = arith.constant dense<0.000000e+00> : vector<128x128xf32>
    %71 = tpu.matmul %69, %70, %cst_56 {dimension_numbers = #tpu.dot_dimension_numbers<[1], [0], [0], [1], [0, 0, 1, 1], [], []>} : vector<128x128xbf16>, vector<128x128xbf16>, vector<128x128xf32> -> vector<128x128xf32>
    %c0_57 = arith.constant 0 : index
    %c0_58 = arith.constant 0 : index
    %72 = vector.load %arg11[%c0_57, %c0_58] : memref<1x128xf32, #tpu.memory_space<vmem>>, vector<1x128xf32>
    %73 = vector.broadcast %72 : vector<1x128xf32> to vector<128x128xf32>
    %74 = arith.addf %71, %73 : vector<128x128xf32>
    %cst_59 = arith.constant 0.000000e+00 : f32
    %75 = vector.broadcast %cst_59 : f32 to vector<128x128xf32>
    %76 = arith.maximumf %74, %75 : vector<128x128xf32>
    %77 = arith.truncf %76 : vector<128x128xf32> to vector<128x128xbf16>
    %c0_60 = arith.constant 0 : index
    %c0_61 = arith.constant 0 : index
    %78 = vector.load %arg12[%c0_60, %c0_61] : memref<128x768xbf16, #tpu.memory_space<vmem>>, vector<128x768xbf16>
    %cst_62 = arith.constant dense<0.000000e+00> : vector<128x768xf32>
    %79 = tpu.matmul %77, %78, %cst_62 {dimension_numbers = #tpu.dot_dimension_numbers<[1], [0], [0], [1], [0, 0, 1, 1], [], []>} : vector<128x128xbf16>, vector<128x768xbf16>, vector<128x768xf32> -> vector<128x768xf32>
    %c0_63 = arith.constant 0 : index
    %c0_64 = arith.constant 0 : index
    %80 = vector.load %arg13[%c0_63, %c0_64] : memref<1x768xf32, #tpu.memory_space<vmem>>, vector<1x768xf32>
    %81 = vector.broadcast %80 : vector<1x768xf32> to vector<128x768xf32>
    %82 = arith.addf %79, %81 : vector<128x768xf32>
    %c256 = arith.constant 256 : index
    %c0_65 = arith.constant 0 : index
    %83 = vector.load %arg14[%c256, %c0_65] : memref<384x768xf32, #tpu.memory_space<vmem>>, vector<128x768xf32>
    tpu.vector_store %arg14[%c256, %c0_65], %82 {strides = array<i32>} : memref<384x768xf32, #tpu.memory_space<vmem>>, vector<128x768xf32>,
    %c0_66 = arith.constant 0 : index
    %c0_67 = arith.constant 0 : index
    %84 = vector.load %arg15[%c0_66, %c0_67] : memref<128x128xf32, #tpu.memory_space<vmem>>, vector<128x128xf32>
    tpu.vector_store %arg15[%c0_66, %c0_67], %68 {strides = array<i32>} : memref<128x128xf32, #tpu.memory_space<vmem>>, vector<128x128xf32>,
    return
  }
}

</mosaic_0001>

<bundles_post_ra>
// kernel: tpu_custom_call.1
= control target key start
LH: loop header
LB: loop body
LE: loop exit
PB: predicated region body
PF: predicated region fallthrough
CT: control target
= control target key end

     0   :  { %21 = vsyncpa [#allocation3], 0  ;;  %s6807_s0 = inlined_call_operand.hbm [shape: bf16[128,128], index: 0, kind: input, shape index: {}]   ;;  %s6808_s1 = inlined_call_operand.hbm [shape: bf16[128,128], index: 1, kind: input, shape index: {}]   ;;  %s6809_s2 = inlined_call_operand.hbm [shape: bf16[128,128], index: 2, kind: input, shape index: {}]   ;;  %s6810_s3 = inlined_call_operand.hbm [shape: f32[1,128], index: 3, kind: input, shape index: {}]   ;;  %s6811_s4 = inlined_call_operand.hbm [shape: bf16[128,128], index: 4, kind: input, shape index: {}]   ;;  %s6812_s5 = inlined_call_operand.hbm [shape: f32[1,128], index: 5, kind: input, shape index: {}]   ;;  %s6813_s6 = inlined_call_operand.hbm [shape: bf16[128,128], index: 6, kind: input, shape index: {}]   ;;  %s6814_s7 = inlined_call_operand.hbm [shape: f32[1,128], index: 7, kind: input, shape index: {}]   ;;  %s6815_s8 = inlined_call_operand.hbm [shape: bf16[128,128], index: 8, kind: input, shape index: {}]   ;;  %s6816_s9 = inlined_call_operand.hbm [shape: f32[1,128], index: 9, kind: input, shape index: {}]   ;;  %s6817_s10 = inlined_call_operand.hbm [shape: bf16[128,128], index: 10, kind: input, shape index: {}]   ;;  %s6818_s11 = inlined_call_operand.hbm [shape: f32[1,128], index: 11, kind: input, shape index: {}]   ;;  %s6819_s12 = inlined_call_operand.hbm [shape: bf16[128,768], index: 12, kind: input, shape index: {}]   ;;  %s6820_s13 = inlined_call_operand.hbm [shape: f32[1,768], index: 13, kind: input, shape index: {}]   ;;  %s6821_s14 = inlined_call_operand.hbm [shape: f32[384,768], index: 14, kind: output, shape index: {0}]   ;;  %s6822_s15 = inlined_call_operand.hbm [shape: f32[128,128], index: 15, kind: output, shape index: {1}]  }
   0x1   :  { %22 = vsyncpa [#allocation6], 0 }
   0x2   :  { %23 = vsyncpa [#allocation9], 0 }
   0x3   :  { %24 = vsyncpa [#allocation12], 0 }
   0x4   :  { %25 = vsyncpa [#allocation15], 0 }
   0x5   :  { %26 = vsyncpa [#allocation18], 0 }
   0x6   :  { %27 = vsyncpa [#allocation21], 0 }
   0x7   :  { %28 = vsyncpa [#allocation24], 0 }
   0x8   :  { %29 = vsyncpa [#allocation4], 0 }
   0x9   :  { %30 = vsyncpa [#allocation27], 0  ;;  %s5741_s18 = smov [#allocation5]   ;;  %s5742_s20 = smov [#allocation8]  }
   0xa   :  { %s48_s19 = sshll.u32 %s5741_s18, 4  ;;  %s73_s21 = sshll.u32 %s5742_s20, 4  ;;  %s49_s19 = int_to_ptr.vmem [resolvable:$true] %s48_s19  ;;  %s5846_s21 = int_to_ptr.vmem [resolvable:$true] %s73_s21 }
   0xb   :  { %s5369_s24 = scalar_lea.hbm %s6808_s1, 1024 }
   0xc   :  { %p5370_p0 = scmp.ne.s32.totalorder %s6808_s1, %s5369_s24  ;;  %p5373_p1 = scmp.lt.u32.totalorder %s5369_s24, %s6808_s1 }
   0xe   :  { %p5375_p2 = pnand %p5373_p1, %p5370_p0 }
  0x10   :  { %5378 = shalt.err (!%p5375_p2)
}
  0x11   :  { %s5379_s29 = scalar_lea.vmem %s49_s19, 1024  ;;  %p5384_p4 = scmp.lt.s32.totalorder %s49_s19, %s49_s19 }
  0x12   :  { %p5380_p3 = scmp.ne.s32.totalorder %s49_s19, %s5379_s29  ;;  %p5385_p5 = scmp.lt.s32.totalorder %s5379_s29, %s5379_s29 }
  0x14   :  { %p5386_p6 = por %p5385_p5, %p5384_p4 }
  0x16   :  { %p5387_p7 = pnand %p5386_p6, %p5380_p3 }
  0x18   :  { %5390 = shalt.err (!%p5387_p7)
}
  0x19   :  { %s5743_s30 = smov 64   ;;  %s5744_s16 = smov 4  }
  0x1a   :  { %54 = dma.hbm_to_vmem [thread:$0]  %s6808_s1, 1024, %s49_s19, [#allocation6], %s5743_s30, %s5743_s30, %s5744_s16  }
  0x1b   :  { %s5391_s23 = scalar_lea.hbm %s6810_s3, 16 }
  0x1c   :  { %p5392_p8 = scmp.ne.s32.totalorder %s6810_s3, %s5391_s23  ;;  %p5395_p9 = scmp.lt.u32.totalorder %s5391_s23, %s6810_s3 }
  0x1e   :  { %p5397_p10 = pnand %p5395_p9, %p5392_p8 }
  0x20   :  { %5400 = shalt.err (!%p5397_p10)
}
  0x21   :  { %s5401_s28 = scalar_lea.vmem %s5846_s21, 16  ;;  %s5405_s1 = scalar_lea.vmem %s5846_s21, 32 }
  0x22   :  { %p5402_p11 = scmp.ne.s32.totalorder %s5846_s21, %s5401_s28  ;;  %p5406_p12 = scmp.lt.s32.totalorder %s5846_s21, %s5846_s21 }
  0x23   :  { %p5407_p13 = scmp.lt.s32.totalorder %s5405_s1, %s5401_s28 }
  0x25   :  { %p5408_p0 = por %p5407_p13, %p5406_p12 }
  0x27   :  { %p5409_p1 = pnand %p5408_p0, %p5402_p11 }
  0x29   :  { %5412 = shalt.err (!%p5409_p1)
}
  0x2a   :  { %76 = dma.hbm_to_vmem [thread:$0]  %s6810_s3, 16, %s5846_s21, [#allocation9]  }
  0x2b   :  { %s5745_s17 = smov [#allocation11]   ;;  %s5746_s20 = smov [#allocation14]  }
  0x2c   :  { %s95_s18 = sshll.u32 %s5745_s17, 4  ;;  %s117_s22 = sshll.u32 %s5746_s20, 4  ;;  %s96_s18 = int_to_ptr.vmem [resolvable:$true] %s95_s18  ;;  %s118_s22 = int_to_ptr.vmem [resolvable:$true] %s117_s22 }
  0x2d   :  { %s5413_s25 = scalar_lea.hbm %s6812_s5, 16 }
  0x2e   :  { %p5414_p2 = scmp.ne.s32.totalorder %s6812_s5, %s5413_s25  ;;  %p5417_p3 = scmp.lt.u32.totalorder %s5413_s25, %s6812_s5 }
  0x30   :  { %p5419_p4 = pnand %p5417_p3, %p5414_p2 }
  0x32   :  { %5422 = shalt.err (!%p5419_p4)
}
  0x33   :  { %s5423_s3 = scalar_lea.vmem %s96_s18, 16  ;;  %s5427_s21 = scalar_lea.vmem %s96_s18, 32 }
  0x34   :  { %p5424_p5 = scmp.ne.s32.totalorder %s96_s18, %s5423_s3  ;;  %p5428_p6 = scmp.lt.s32.totalorder %s96_s18, %s96_s18 }
  0x35   :  { %p5429_p7 = scmp.lt.s32.totalorder %s5427_s21, %s5423_s3 }
  0x37   :  { %p5430_p8 = por %p5429_p7, %p5428_p6 }
  0x39   :  { %p5431_p9 = pnand %p5430_p8, %p5424_p5 }
  0x3b   :  { %5434 = shalt.err (!%p5431_p9)
}
  0x3c   :  { %98 = dma.hbm_to_vmem [thread:$0]  %s6812_s5, 16, %s96_s18, [#allocation12]  }
  0x3d   :  { %s5435_s23 = scalar_lea.hbm %s6814_s7, 16 }
  0x3e   :  { %p5436_p10 = scmp.ne.s32.totalorder %s6814_s7, %s5435_s23  ;;  %p5439_p11 = scmp.lt.u32.totalorder %s5435_s23, %s6814_s7 }
  0x40   :  { %p5441_p12 = pnand %p5439_p11, %p5436_p10 }
  0x42   :  { %5444 = shalt.err (!%p5441_p12)
}
  0x43   :  { %s5445_s28 = scalar_lea.vmem %s118_s22, 16  ;;  %s5449_s1 = scalar_lea.vmem %s118_s22, 32 }
  0x44   :  { %p5446_p13 = scmp.ne.s32.totalorder %s118_s22, %s5445_s28  ;;  %p5450_p0 = scmp.lt.s32.totalorder %s118_s22, %s118_s22 }
  0x45   :  { %p5451_p1 = scmp.lt.s32.totalorder %s5449_s1, %s5445_s28 }
  0x47   :  { %p5452_p2 = por %p5451_p1, %p5450_p0 }
  0x49   :  { %p5453_p3 = pnand %p5452_p2, %p5446_p13 }
  0x4b   :  { %5456 = shalt.err (!%p5453_p3)
}
  0x4c   :  { %120 = dma.hbm_to_vmem [thread:$0]  %s6814_s7, 16, %s118_s22, [#allocation15]  }
  0x4d   :  { %s5747_s3 = smov [#allocation17]   ;;  %s5748_s19 = smov [#allocation20]  }
  0x4e   :  { %s139_s21 = sshll.u32 %s5747_s3, 4  ;;  %s161_s29 = sshll.u32 %s5748_s19, 4  ;;  %s140_s21 = int_to_ptr.vmem [resolvable:$true] %s139_s21  ;;  %s162_s29 = int_to_ptr.vmem [resolvable:$true] %s161_s29 }
  0x4f   :  { %s5457_s23 = scalar_lea.hbm %s6816_s9, 16 }
  0x50   :  { %p5458_p4 = scmp.ne.s32.totalorder %s6816_s9, %s5457_s23  ;;  %p5461_p5 = scmp.lt.u32.totalorder %s5457_s23, %s6816_s9 }
  0x52   :  { %p5463_p6 = pnand %p5461_p5, %p5458_p4 }
  0x54   :  { %5466 = shalt.err (!%p5463_p6)
}
  0x55   :  { %s5467_s7 = scalar_lea.vmem %s140_s21, 16  ;;  %s5471_s22 = scalar_lea.vmem %s140_s21, 32 }
  0x56   :  { %p5468_p7 = scmp.ne.s32.totalorder %s140_s21, %s5467_s7  ;;  %p5472_p8 = scmp.lt.s32.totalorder %s140_s21, %s140_s21 }
  0x57   :  { %p5473_p9 = scmp.lt.s32.totalorder %s5471_s22, %s5467_s7 }
  0x59   :  { %p5474_p10 = por %p5473_p9, %p5472_p8 }
  0x5b   :  { %p5475_p11 = pnand %p5474_p10, %p5468_p7 }
  0x5d   :  { %5478 = shalt.err (!%p5475_p11)
}
  0x5e   :  { %142 = dma.hbm_to_vmem [thread:$0]  %s6816_s9, 16, %s140_s21, [#allocation18]  }
  0x5f   :  { %s5479_s3 = scalar_lea.hbm %s6818_s11, 16 }
  0x60   :  { %p5480_p12 = scmp.ne.s32.totalorder %s6818_s11, %s5479_s3  ;;  %p5483_p13 = scmp.lt.u32.totalorder %s5479_s3, %s6818_s11 }
  0x62   :  { %p5485_p0 = pnand %p5483_p13, %p5480_p12 }
  0x64   :  { %5488 = shalt.err (!%p5485_p0)
}
  0x65   :  { %s5489_s24 = scalar_lea.vmem %s162_s29, 16  ;;  %s5493_s25 = scalar_lea.vmem %s162_s29, 32 }
  0x66   :  { %p5490_p1 = scmp.ne.s32.totalorder %s162_s29, %s5489_s24  ;;  %p5494_p2 = scmp.lt.s32.totalorder %s162_s29, %s162_s29 }
  0x67   :  { %p5495_p3 = scmp.lt.s32.totalorder %s5493_s25, %s5489_s24 }
  0x69   :  { %p5496_p4 = por %p5495_p3, %p5494_p2 }
  0x6b   :  { %p5497_p5 = pnand %p5496_p4, %p5490_p1 }
  0x6d   :  { %5500 = shalt.err (!%p5497_p5)
}
  0x6e   :  { %164 = dma.hbm_to_vmem [thread:$0]  %s6818_s11, 16, %s162_s29, [#allocation21]  }
  0x6f   :  { %s5749_s26 = smov [#allocation2]   ;;  %s5750_s7 = smov [#allocation7]  }
  0x70   :  { %s36_s27 = sshll.u32 %s5749_s26, 4  ;;  %s60_s22 = sshll.u32 %s5750_s7, 4  ;;  %s37_s27 = int_to_ptr.vmem [resolvable:$true] %s36_s27  ;;  %s5929_s22 = int_to_ptr.vmem [resolvable:$true] %s60_s22 }
  0x71   :  { %s5501_s5 = scalar_lea.hbm %s6807_s0, 1024 }
  0x72   :  { %p5502_p6 = scmp.ne.s32.totalorder %s6807_s0, %s5501_s5  ;;  %p5505_p7 = scmp.lt.u32.totalorder %s5501_s5, %s6807_s0 }
  0x74   :  { %p5507_p8 = pnand %p5505_p7, %p5502_p6 }
  0x76   :  { %5510 = shalt.err (!%p5507_p8)
}
  0x77   :  { %s5511_s11 = scalar_lea.vmem %s37_s27, 1024  ;;  %p5516_p10 = scmp.lt.s32.totalorder %s37_s27, %s37_s27 }
  0x78   :  { %p5512_p9 = scmp.ne.s32.totalorder %s37_s27, %s5511_s11  ;;  %p5517_p11 = scmp.lt.s32.totalorder %s5511_s11, %s5511_s11 }
  0x7a   :  { %p5518_p12 = por %p5517_p11, %p5516_p10 }
  0x7c   :  { %p5519_p13 = pnand %p5518_p12, %p5512_p9 }
  0x7e   :  { %5522 = shalt.err (!%p5519_p13)
}
  0x7f   :  { %42 = dma.hbm_to_vmem [thread:$0]  %s6807_s0, 1024, %s37_s27, [#allocation3], %s5743_s30, %s5743_s30, %s5744_s16  }
  0x80   :  { %s5523_s25 = scalar_lea.hbm %s6809_s2, 1024 }
  0x81   :  { %p5524_p0 = scmp.ne.s32.totalorder %s6809_s2, %s5523_s25  ;;  %p5527_p1 = scmp.lt.u32.totalorder %s5523_s25, %s6809_s2 }
  0x83   :  { %p5529_p2 = pnand %p5527_p1, %p5524_p0 }
  0x85   :  { %5532 = shalt.err (!%p5529_p2)
}
  0x86   :  { %s5533_s28 = scalar_lea.vmem %s5929_s22, 1024  ;;  %p5538_p4 = scmp.lt.s32.totalorder %s5929_s22, %s5929_s22 }
  0x87   :  { %p5534_p3 = scmp.ne.s32.totalorder %s5929_s22, %s5533_s28  ;;  %p5539_p5 = scmp.lt.s32.totalorder %s5533_s28, %s5533_s28 }
  0x89   :  { %p5540_p6 = por %p5539_p5, %p5538_p4 }
  0x8b   :  { %p5541_p7 = pnand %p5540_p6, %p5534_p3 }
  0x8d   :  { %5544 = shalt.err (!%p5541_p7)
}
  0x8e   :  { %66 = dma.hbm_to_vmem [thread:$0]  %s6809_s2, 1024, %s5929_s22, [#allocation6], %s5743_s30, %s5743_s30, %s5744_s16  }
  0x8f   :  { %s5751_s1 = smov [#allocation10]   ;;  %s5752_s18 = smov [#allocation13]  }
  0x90   :  { %s82_s5 = sshll.u32 %s5751_s1, 4  ;;  %s104_s3 = sshll.u32 %s5752_s18, 4  ;;  %s83_s5 = int_to_ptr.vmem [resolvable:$true] %s82_s5  ;;  %s5966_s3 = int_to_ptr.vmem [resolvable:$true] %s104_s3 }
  0x91   :  { %s5545_s11 = scalar_lea.hbm %s6811_s4, 1024 }
  0x92   :  { %p5546_p8 = scmp.ne.s32.totalorder %s6811_s4, %s5545_s11  ;;  %p5549_p9 = scmp.lt.u32.totalorder %s5545_s11, %s6811_s4 }
  0x94   :  { %p5551_p10 = pnand %p5549_p9, %p5546_p8 }
  0x96   :  { %5554 = shalt.err (!%p5551_p10)
}
  0x97   :  { %s5555_s2 = scalar_lea.vmem %s83_s5, 1024  ;;  %p5560_p12 = scmp.lt.s32.totalorder %s83_s5, %s83_s5 }
  0x98   :  { %p5556_p11 = scmp.ne.s32.totalorder %s83_s5, %s5555_s2  ;;  %p5561_p13 = scmp.lt.s32.totalorder %s5555_s2, %s5555_s2 }
  0x9a   :  { %p5562_p0 = por %p5561_p13, %p5560_p12 }
  0x9c   :  { %p5563_p1 = pnand %p5562_p0, %p5556_p11 }
  0x9e   :  { %5566 = shalt.err (!%p5563_p1)
}
  0x9f   :  { %88 = dma.hbm_to_vmem [thread:$0]  %s6811_s4, 1024, %s83_s5, [#allocation9], %s5743_s30, %s5743_s30, %s5744_s16  }
  0xa0   :  { %s5567_s26 = scalar_lea.hbm %s6813_s6, 1024 }
  0xa1   :  { %p5568_p2 = scmp.ne.s32.totalorder %s6813_s6, %s5567_s26  ;;  %p5571_p3 = scmp.lt.u32.totalorder %s5567_s26, %s6813_s6 }
  0xa3   :  { %p5573_p4 = pnand %p5571_p3, %p5568_p2 }
  0xa5   :  { %5576 = shalt.err (!%p5573_p4)
}
  0xa6   :  { %s5577_s1 = scalar_lea.vmem %s5966_s3, 1024  ;;  %p5582_p6 = scmp.lt.s32.totalorder %s5966_s3, %s5966_s3 }
  0xa7   :  { %p5578_p5 = scmp.ne.s32.totalorder %s5966_s3, %s5577_s1  ;;  %p5583_p7 = scmp.lt.s32.totalorder %s5577_s1, %s5577_s1 }
  0xa9   :  { %p5584_p8 = por %p5583_p7, %p5582_p6 }
  0xab   :  { %p5585_p9 = pnand %p5584_p8, %p5578_p5 }
  0xad   :  { %5588 = shalt.err (!%p5585_p9)
}
  0xae   :  { %110 = dma.hbm_to_vmem [thread:$0]  %s6813_s6, 1024, %s5966_s3, [#allocation12], %s5743_s30, %s5743_s30, %s5744_s16  }
  0xaf   :  { %s5753_s18 = smov [#allocation16]   ;;  %s5754_s17 = smov [#allocation19]  }
  0xb0   :  { %s126_s19 = sshll.u32 %s5753_s18, 4  ;;  %s148_s11 = sshll.u32 %s5754_s17, 4  ;;  %s127_s19 = int_to_ptr.vmem [resolvable:$true] %s126_s19  ;;  %s6003_s11 = int_to_ptr.vmem [resolvable:$true] %s148_s11 }
  0xb1   :  { %s5589_s23 = scalar_lea.hbm %s6815_s8, 1024 }
  0xb2   :  { %p5590_p10 = scmp.ne.s32.totalorder %s6815_s8, %s5589_s23  ;;  %p5593_p11 = scmp.lt.u32.totalorder %s5589_s23, %s6815_s8 }
  0xb4   :  { %p5595_p12 = pnand %p5593_p11, %p5590_p10 }
  0xb6   :  { %5598 = shalt.err (!%p5595_p12)
}
  0xb7   :  { %s5599_s6 = scalar_lea.vmem %s127_s19, 1024  ;;  %p5604_p0 = scmp.lt.s32.totalorder %s127_s19, %s127_s19 }
  0xb8   :  { %p5600_p13 = scmp.ne.s32.totalorder %s127_s19, %s5599_s6  ;;  %p5605_p1 = scmp.lt.s32.totalorder %s5599_s6, %s5599_s6 }
  0xba   :  { %p5606_p2 = por %p5605_p1, %p5604_p0 }
  0xbc   :  { %p5607_p3 = pnand %p5606_p2, %p5600_p13 }
  0xbe   :  { %5610 = shalt.err (!%p5607_p3)
}
  0xbf   :  { %132 = dma.hbm_to_vmem [thread:$0]  %s6815_s8, 1024, %s127_s19, [#allocation15], %s5743_s30, %s5743_s30, %s5744_s16  }
  0xc0   :  { %s5611_s7 = scalar_lea.hbm %s6817_s10, 1024 }
  0xc1   :  { %p5612_p4 = scmp.ne.s32.totalorder %s6817_s10, %s5611_s7  ;;  %p5615_p5 = scmp.lt.u32.totalorder %s5611_s7, %s6817_s10 }
  0xc3   :  { %p5617_p6 = pnand %p5615_p5, %p5612_p4 }
  0xc5   :  { %5620 = shalt.err (!%p5617_p6)
}
  0xc6   :  { %s5621_s4 = scalar_lea.vmem %s6003_s11, 1024  ;;  %p5626_p8 = scmp.lt.s32.totalorder %s6003_s11, %s6003_s11 }
  0xc7   :  { %p5622_p7 = scmp.ne.s32.totalorder %s6003_s11, %s5621_s4  ;;  %p5627_p9 = scmp.lt.s32.totalorder %s5621_s4, %s5621_s4 }
  0xc9   :  { %p5628_p10 = por %p5627_p9, %p5626_p8 }
  0xcb   :  { %p5629_p11 = pnand %p5628_p10, %p5622_p7 }
  0xcd   :  { %5632 = shalt.err (!%p5629_p11)
}
  0xce   :  { %154 = dma.hbm_to_vmem [thread:$0]  %s6817_s10, 1024, %s6003_s11, [#allocation18], %s5743_s30, %s5743_s30, %s5744_s16  }
  0xcf   :  { %s5755_s18 = smov [#allocation22]   ;;  %s5633_s20 = scalar_lea.hbm %s6819_s12, 6144 }
  0xd0   :  { %s170_s19 = sshll.u32 %s5755_s18, 4  ;;  %p5634_p12 = scmp.ne.s32.totalorder %s6819_s12, %s5633_s20  ;;  %s171_s19 = int_to_ptr.vmem [resolvable:$true] %s170_s19 }
  0xd1   :  { %p5637_p13 = scmp.lt.u32.totalorder %s5633_s20, %s6819_s12 }
  0xd3   :  { %p5639_p0 = pnand %p5637_p13, %p5634_p12 }
  0xd5   :  { %5642 = shalt.err (!%p5639_p0)
}
  0xd6   :  { %s5643_s25 = scalar_lea.vmem %s171_s19, 6144  ;;  %p5648_p2 = scmp.lt.s32.totalorder %s171_s19, %s171_s19 }
  0xd7   :  { %p5644_p1 = scmp.ne.s32.totalorder %s171_s19, %s5643_s25  ;;  %p5649_p3 = scmp.lt.s32.totalorder %s5643_s25, %s5643_s25 }
  0xd9   :  { %p5650_p4 = por %p5649_p3, %p5648_p2 }
  0xdb   :  { %p5651_p5 = pnand %p5650_p4, %p5644_p1 }
  0xdd   :  { %5654 = shalt.err (!%p5651_p5)
}
  0xde   :  { %s5756_s10 = smov 384   ;;  %s5757_s30 = smov 24  }
  0xdf   :  { %176 = dma.hbm_to_vmem [thread:$0]  %s6819_s12, 6144, %s171_s19, [#allocation21], %s5756_s10, %s5756_s10, %s5757_s30  }
  0xe0   :  { %s5758_s6 = smov [#allocation23]   ;;  %s5655_s26 = scalar_lea.hbm %s6820_s13, 96 }
  0xe1   :  { %s183_s3 = sshll.u32 %s5758_s6, 4  ;;  %p5656_p6 = scmp.ne.s32.totalorder %s6820_s13, %s5655_s26  ;;  %s184_s3 = int_to_ptr.vmem [resolvable:$true] %s183_s3 }
  0xe2   :  { %p5659_p7 = scmp.lt.u32.totalorder %s5655_s26, %s6820_s13 }
  0xe4   :  { %p5661_p8 = pnand %p5659_p7, %p5656_p6 }
  0xe6   :  { %5664 = shalt.err (!%p5661_p8)
}
  0xe7   :  { %s5665_s1 = scalar_lea.vmem %s184_s3, 96  ;;  %p5670_p10 = scmp.lt.s32.totalorder %s184_s3, %s184_s3 }
  0xe8   :  { %p5666_p9 = scmp.ne.s32.totalorder %s184_s3, %s5665_s1  ;;  %p5671_p11 = scmp.lt.s32.totalorder %s5665_s1, %s5665_s1 }
  0xea   :  { %p5672_p12 = por %p5671_p11, %p5670_p10 }
  0xec   :  { %p5673_p13 = pnand %p5672_p12, %p5666_p9 }
  0xee   :  { %5676 = shalt.err (!%p5673_p13)
}
  0xef   :  { %186 = dma.hbm_to_vmem [thread:$0]  %s6820_s13, 96, %s184_s3, [#allocation24]  }
  0xf0   :  { %5721 = dma.done.wait [#allocation3], 1024  }
  0xf1   :  { %5722 = vsyncadd [#allocation3], 4294966272 }
  0xf2   :  { %5723 = dma.done.wait [#allocation6], 2048  }
  0xf3   :  { %5724 = vsyncadd [#allocation6], 4294965248 }
  0xf4   :  { %5725 = dma.done.wait [#allocation9], 1040  }
  0xf5   :  { %5726 = vsyncadd [#allocation9], 4294966256 }
  0xf6   :  { %5727 = dma.done.wait [#allocation12], 1040  }
  0xf7   :  { %5728 = vsyncadd [#allocation12], 4294966256 }
  0xf8   :  { %5729 = dma.done.wait [#allocation15], 1040  }
  0xf9   :  { %5730 = vsyncadd [#allocation15], 4294966256 }
  0xfa   :  { %5731 = dma.done.wait [#allocation18], 1040  }
  0xfb   :  { %5732 = vsyncadd [#allocation18], 4294966256 }
  0xfc   :  { %5733 = dma.done.wait [#allocation21], 6160  }
  0xfd   :  { %5734 = vsyncadd [#allocation21], 4294961136 }
  0xfe   :  { %5735 = dma.done.wait [#allocation24], 96  }
  0xff   :  { %5736 = vsyncadd [#allocation24], 4294967200  ;;  %v5066_v0 = vld [vmem:[#allocation7] sm:$0xff]   ;;  %v5067_v1 = vld [vmem:[#allocation7 + $0x8] sm:$0xff]   ;;  %s5760_s13 = smov [#allocation26]  }
 0x100   :  { %4721 = vmatprep.subr.bf16.mxu1 %v5066_v0  ;;  %v5068_v2 = vld [vmem:[#allocation7 + $0x10] sm:$0xff]   ;;  %v5069_v3 = vld [vmem:[#allocation7 + $0x18] sm:$0xff]   ;;  %v5074_v4 = vld [vmem:[#allocation2] sm:$0xff]   ;;  %s4315_s8 = sshll.u32 %s5760_s13, 4  ;;  %s4316_s8 = int_to_ptr.vmem [resolvable:$true] %s4315_s8 }
 0x101   :  { %4722 = vmatpush3.bf16.msra.mxu1 %v5066_v0  ;;  %4737 = vmatprep.mubr.bf16.mxu1 %v5074_v4  ;;  %v5070_v5 = vld [vmem:[#allocation7 + $0x20] sm:$0xff]   ;;  %v5071_v6 = vld [vmem:[#allocation7 + $0x28] sm:$0xff]   ;;  %v5072_v7 = vld [vmem:[#allocation7 + $0x30] sm:$0xff]   ;;  %s5677_s5 = scalar_lea.vmem %s4316_s8, 2048  ;;  %p5682_p1 = scmp.lt.s32.totalorder %s4316_s8, %s4316_s8 }
 0x102   :  { %4723 = vmatprep.subr.bf16.mxu1 %v5067_v1  ;;  %v5073_v8 = vld [vmem:[#allocation7 + $0x38] sm:$0xff]   ;;  %v5082_v9 = vld [vmem:[#allocation10] sm:$0xff]   ;;  %v5076_v11 = vld [vmem:[#allocation2 + $0x10] sm:$0xff]   ;;  %p5678_p0 = scmp.ne.s32.totalorder %s4316_s8, %s5677_s5  ;;  %p5683_p2 = scmp.lt.s32.totalorder %s5677_s5, %s5677_s5 }
 0x103   :  { %v5075_v10 = vld [vmem:[#allocation2 + $0x8] sm:$0xff]   ;;  %v5084_v13 = vld [vmem:[#allocation10 + $0x10] sm:$0xff]   ;;  %v5078_v15 = vld [vmem:[#allocation2 + $0x20] sm:$0xff]  }
 0x104   :  { %v5083_v12 = vld [vmem:[#allocation10 + $0x8] sm:$0xff]   ;;  %v5077_v14 = vld [vmem:[#allocation2 + $0x18] sm:$0xff]   ;;  %v5086_v17 = vld [vmem:[#allocation10 + $0x20] sm:$0xff]   ;;  %p5684_p3 = por %p5683_p2, %p5682_p1 }
 0x105   :  { %4724 = vmatpush3.bf16.msra.mxu1 %v5067_v1  ;;  %v5085_v16 = vld [vmem:[#allocation10 + $0x18] sm:$0xff]   ;;  %v5079_v18 = vld [vmem:[#allocation2 + $0x28] sm:$0xff]   ;;  %v5080_v19 = vld [vmem:[#allocation2 + $0x30] sm:$0xff]  }
 0x106   :  { %4725 = vmatprep.subr.bf16.mxu1 %v5068_v2  ;;  %v5087_v20 = vld [vmem:[#allocation10 + $0x28] sm:$0xff]   ;;  %v5081_v21 = vld [vmem:[#allocation2 + $0x38] sm:$0xff]   ;;  %v4338_v24 = vld [vmem:[#allocation8] ss:$0 sm:$0xff]  ;;  %p5685_p4 = pnand %p5684_p3, %p5678_p0 }
 0x107   :  { %v5088_v22 = vld [vmem:[#allocation10 + $0x30] sm:$0xff]   ;;  %v5089_v23 = vld [vmem:[#allocation10 + $0x38] sm:$0xff]  }
 0x109   :  { %4726 = vmatpush3.bf16.msra.mxu1 %v5068_v2 }
 0x10a   :  { %4727 = vmatprep.subr.bf16.mxu1 %v5069_v3 }
 0x10d   :  { %4728 = vmatpush3.bf16.msra.mxu1 %v5069_v3 }
 0x10e   :  { %4729 = vmatprep.subr.bf16.mxu1 %v5070_v5 }
 0x111   :  { %4730 = vmatpush3.bf16.msra.mxu1 %v5070_v5 }
 0x112   :  { %4731 = vmatprep.subr.bf16.mxu1 %v5071_v6 }
 0x115   :  { %4732 = vmatpush3.bf16.msra.mxu1 %v5071_v6 }
 0x116   :  { %4733 = vmatprep.subr.bf16.mxu1 %v5072_v7 }
 0x119   :  { %4734 = vmatpush3.bf16.msra.mxu1 %v5072_v7 }
 0x11a   :  { %4735 = vmatprep.subr.bf16.mxu1 %v5073_v8 }
 0x11d   :  { %4736 = vmatpush3.bf16.msra.mxu1 %v5073_v8 }
 0x11e   :  { %4753 = vmatprep.subr.bf16.mxu1 %v5082_v9 }
 0x120   :  { %4738 = vmatmul.mubr.bf16.vlgmr.msra.gmra.mrb[0].mxu1 %v5075_v10 }
 0x121   :  { %4741 = vmatprep.mubr.bf16.mxu1 %v5076_v11  ;;  %4754 = vmatpush3.bf16.msra.mxu1 %v5082_v9 }
 0x122   :  { %4755 = vmatprep.subr.bf16.mxu1 %v5083_v12 }
 0x125   :  { %4756 = vmatpush3.bf16.msra.mxu1 %v5083_v12 }
 0x126   :  { %4757 = vmatprep.subr.bf16.mxu1 %v5084_v13 }
 0x128   :  { %4742 = vmatmul.mubr.bf16.gmra.mrb[4].mxu1 %v5077_v14 }
 0x129   :  { %4745 = vmatprep.mubr.bf16.mxu1 %v5078_v15  ;;  %4758 = vmatpush3.bf16.msra.mxu1 %v5084_v13 }
 0x12a   :  { %4759 = vmatprep.subr.bf16.mxu1 %v5085_v16 }
 0x12d   :  { %4760 = vmatpush3.bf16.msra.mxu1 %v5085_v16 }
 0x12e   :  { %4761 = vmatprep.subr.bf16.mxu1 %v5086_v17 }
 0x130   :  { %4746 = vmatmul.mubr.bf16.gmra.mrb[8].mxu1 %v5079_v18  ;;  %v5098_v18 = vld [vmem:[#allocation19] sm:$0xff]  }
 0x131   :  { %4749 = vmatprep.mubr.bf16.mxu1 %v5080_v19  ;;  %4762 = vmatpush3.bf16.msra.mxu1 %v5086_v17  ;;  %v6064_v17 = vld [vmem:[#allocation5] sm:$0xff]   ;;  %v5099_v19 = vld [vmem:[#allocation19 + $0x8] sm:$0xff]  }
 0x132   :  { %4763 = vmatprep.subr.bf16.mxu1 %v5087_v20  ;;  %4801 = vmatprep.mubr.bf16.mxu0 %v6064_v17 }
 0x135   :  { %4764 = vmatpush3.bf16.msra.mxu1 %v5087_v20  ;;  %v5100_v20 = vld [vmem:[#allocation19 + $0x10] sm:$0xff]  }
 0x136   :  { %4765 = vmatprep.subr.bf16.mxu1 %v5088_v22 }
 0x138   :  { %4750 = vmatmul.mubr.bf16.gmra.mrb[12].mxu1 %v5081_v21  ;;  %v5101_v21 = vld [vmem:[#allocation19 + $0x18] sm:$0xff]  }
 0x139   :  { %4766 = vmatpush3.bf16.msra.mxu1 %v5088_v22  ;;  %v5102_v22 = vld [vmem:[#allocation19 + $0x20] sm:$0xff]  }
 0x13a   :  { %4767 = vmatprep.subr.bf16.mxu1 %v5089_v23 }
 0x13d   :  { %4768 = vmatpush3.bf16.msra.mxu1 %v5089_v23  ;;  %v5103_v23 = vld [vmem:[#allocation19 + $0x28] sm:$0xff]  }
 0x13e   :  { %4817 = vmatprep.subr.bf16.mxu1 %v5098_v18 }
 0x1f3   :  { %v4739_v25 = vpop.f32.mrb[0].mxu1 }
 0x1f4   :  { %v424_v26 = vadd.f32 %v4739_v25, %v4338_v24  ;;  %v415_v27 = vpop.f32.mrb[1].mxu1 }
 0x1f5   :  { %v416_v28 = vadd.f32 %v4338_v24, %v415_v27  ;;  %v4740_v29 = vpop.f32.mrb[2].mxu1 }
 0x1f6   :  { %v427_v30 = vadd.f32 %v4740_v29, %v4338_v24  ;;  %v418_v31 = vpop.f32.mrb[3].mxu1  ;;  %v480_v33 = vmax.f32 %v424_v26, 0.0 }
 0x1f7   :  { %v419_v32 = vadd.f32 %v4338_v24, %v418_v31  ;;  %v478_v35 = vmax.f32 %v416_v28, 0.0 }
 0x1f8   :  { %v481_v34 = vmax.f32 %v427_v30, 0.0 }
 0x1f9   :  { %v479_v36 = vmax.f32 %v419_v32, 0.0 }
 0x1fa   :  { %v495_v37 = vpack.c.bf16 %v481_v34, %v480_v33 }
 0x1fb   :  { %v494_v38 = vpack.c.bf16 %v479_v36, %v478_v35  ;;  %v4743_v39 = vpop.f32.mrb[4].mxu1 }
 0x1fc   :  { %v440_v40 = vadd.f32 %v4743_v39, %v4338_v24  ;;  %v431_v41 = vpop.f32.mrb[5].mxu1 }
 0x1fd   :  { %v432_v42 = vadd.f32 %v4338_v24, %v431_v41  ;;  %v4744_v43 = vpop.f32.mrb[6].mxu1  ;;  %4769 = vmatprep.mubr.bf16.mxu1 %v494_v38 }
 0x1fe   :  { %v443_v44 = vadd.f32 %v4744_v43, %v4338_v24  ;;  %v434_v45 = vpop.f32.mrb[7].mxu1  ;;  %4770 = vmatmul.mubr.bf16.vlgmr.msra.gmra.mrb[16].mxu1 %v495_v37  ;;  %v484_v47 = vmax.f32 %v440_v40, 0.0 }
 0x1ff   :  { %v435_v46 = vadd.f32 %v4338_v24, %v434_v45  ;;  %v482_v49 = vmax.f32 %v432_v42, 0.0  ;;  %4818 = vmatpush3.bf16.msra.mxu1 %v5098_v18 }
 0x200   :  { %v485_v48 = vmax.f32 %v443_v44, 0.0  ;;  %4819 = vmatprep.subr.bf16.mxu1 %v5099_v19 }
 0x201   :  { %v483_v50 = vmax.f32 %v435_v46, 0.0 }
 0x202   :  { %v497_v51 = vpack.c.bf16 %v485_v48, %v484_v47  ;;  %v5091_v48 = vld [vmem:[#allocation5 + $0x8] sm:$0xff]  }
 0x203   :  { %v496_v52 = vpack.c.bf16 %v483_v50, %v482_v49  ;;  %v4747_v53 = vpop.f32.mrb[8].mxu1  ;;  %4820 = vmatpush3.bf16.msra.mxu1 %v5099_v19  ;;  %v5092_v49 = vld [vmem:[#allocation5 + $0x10] sm:$0xff]   ;;  %v5093_v50 = vld [vmem:[#allocation5 + $0x18] sm:$0xff]  }
 0x204   :  { %v456_v54 = vadd.f32 %v4747_v53, %v4338_v24  ;;  %v447_v55 = vpop.f32.mrb[9].mxu1  ;;  %4821 = vmatprep.subr.bf16.mxu1 %v5100_v20  ;;  %v5096_v53 = vld [vmem:[#allocation5 + $0x30] sm:$0xff]  }
 0x205   :  { %v448_v56 = vadd.f32 %v4338_v24, %v447_v55  ;;  %v4748_v57 = vpop.f32.mrb[10].mxu1  ;;  %4773 = vmatprep.mubr.bf16.mxu1 %v496_v52  ;;  %v5095_v52 = vld [vmem:[#allocation5 + $0x28] sm:$0xff]   ;;  %v5104_v55 = vld [vmem:[#allocation19 + $0x30] sm:$0xff]  }
 0x206   :  { %v459_v58 = vadd.f32 %v4748_v57, %v4338_v24  ;;  %v450_v59 = vpop.f32.mrb[11].mxu1  ;;  %4774 = vmatmul.mubr.bf16.gmra.mrb[20].mxu1 %v497_v51  ;;  %v488_v61 = vmax.f32 %v456_v54, 0.0  ;;  %v5094_v51 = vld [vmem:[#allocation5 + $0x20] sm:$0xff]   ;;  %v5097_v54 = vld [vmem:[#allocation5 + $0x38] sm:$0xff]  }
 0x207   :  { %v451_v60 = vadd.f32 %v4338_v24, %v450_v59  ;;  %v486_v63 = vmax.f32 %v448_v56, 0.0  ;;  %4822 = vmatpush3.bf16.msra.mxu1 %v5100_v20  ;;  %v5105_v56 = vld [vmem:[#allocation19 + $0x38] sm:$0xff]   ;;  %v5111_v59 = vld [vmem:[#allocation22 + $0xc] ss:$24 sps:$4 sm:$0xff]  }
 0x208   :  { %v489_v62 = vmax.f32 %v459_v58, 0.0  ;;  %4823 = vmatprep.subr.bf16.mxu1 %v5101_v21  ;;  %v5106_v57 = vld [vmem:[#allocation22] ss:$24 sps:$4 sm:$0xff]   ;;  %v5108_v58 = vld [vmem:[#allocation22 + $0x4] ss:$24 sps:$4 sm:$0xff]  }
 0x209   :  { %v487_v0 = vmax.f32 %v451_v60, 0.0  ;;  %v5114_v60 = vld [vmem:[#allocation22 + $0x34] ss:$24 sps:$4 sm:$0xff]  }
 0x20a   :  { %v499_v1 = vpack.c.bf16 %v489_v62, %v488_v61  ;;  %v5112_v61 = vld [vmem:[#allocation22 + $0x30] ss:$24 sps:$4 sm:$0xff]   ;;  %v5120_v62 = vld [vmem:[#allocation22 + $0x64] ss:$24 sps:$4 sm:$0xff]  }
 0x20b   :  { %v498_v2 = vpack.c.bf16 %v487_v0, %v486_v63  ;;  %v4751_v3 = vpop.f32.mrb[12].mxu1  ;;  %4824 = vmatpush3.bf16.msra.mxu1 %v5101_v21  ;;  %v5118_v63 = vld [vmem:[#allocation22 + $0x60] ss:$24 sps:$4 sm:$0xff]   ;;  %v5126_v0 = vld [vmem:[#allocation22 + $0x94] ss:$24 sps:$4 sm:$0xff]  }
 0x20c   :  { %v472_v4 = vadd.f32 %v4751_v3, %v4338_v24  ;;  %v463_v5 = vpop.f32.mrb[13].mxu1  ;;  %4825 = vmatprep.subr.bf16.mxu1 %v5102_v22  ;;  %v5130_v3 = vld [vmem:[#allocation22 + $0xc0] ss:$24 sps:$4 sm:$0xff]  }
 0x20d   :  { %v464_v6 = vadd.f32 %v4338_v24, %v463_v5  ;;  %v4752_v7 = vpop.f32.mrb[14].mxu1  ;;  %4777 = vmatprep.mubr.bf16.mxu1 %v498_v2  ;;  %v5132_v2 = vld [vmem:[#allocation22 + $0xc4] ss:$24 sps:$4 sm:$0xff]   ;;  %v5136_v5 = vld [vmem:[#allocation22 + $0xf0] ss:$24 sps:$4 sm:$0xff]  }
 0x20e   :  { %v475_v8 = vadd.f32 %v4752_v7, %v4338_v24  ;;  %v466_v9 = vpop.f32.mrb[15].mxu1  ;;  %4778 = vmatmul.mubr.bf16.gmra.mrb[24].mxu1 %v499_v1  ;;  %v492_v11 = vmax.f32 %v472_v4, 0.0  ;;  %v5124_v1 = vld [vmem:[#allocation22 + $0x90] ss:$24 sps:$4 sm:$0xff]   ;;  %v5138_v4 = vld [vmem:[#allocation22 + $0xf4] ss:$24 sps:$4 sm:$0xff]  }
 0x20f   :  { %v467_v10 = vadd.f32 %v4338_v24, %v466_v9  ;;  %v490_v13 = vmax.f32 %v464_v6, 0.0  ;;  %4826 = vmatpush3.bf16.msra.mxu1 %v5102_v22  ;;  %v6067_v6 = vld [vmem:[#allocation11] ss:$0 sm:$0xff] }
 0x210   :  { %v493_v12 = vmax.f32 %v475_v8, 0.0  ;;  %4827 = vmatprep.subr.bf16.mxu1 %v5103_v23 }
 0x211   :  { %v491_v14 = vmax.f32 %v467_v10, 0.0 }
 0x212   :  { %v501_v15 = vpack.c.bf16 %v493_v12, %v492_v11 }
 0x213   :  { %v500_v16 = vpack.c.bf16 %v491_v14, %v490_v13  ;;  %4828 = vmatpush3.bf16.msra.mxu1 %v5103_v23  ;;  %v5109_v23 = vld [vmem:[#allocation22 + $0x8] ss:$24 sps:$4 sm:$0xff]  }
 0x214   :  { %4829 = vmatprep.subr.bf16.mxu1 %v5104_v55 }
 0x215   :  { %4781 = vmatprep.mubr.bf16.mxu1 %v500_v16 }
 0x216   :  { %4782 = vmatmul.mubr.bf16.gmra.mrb[28].mxu1 %v501_v15 }
 0x217   :  { %4830 = vmatpush3.bf16.msra.mxu1 %v5104_v55 }
 0x218   :  { %4831 = vmatprep.subr.bf16.mxu1 %v5105_v56 }
 0x21b   :  { %4832 = vmatpush3.bf16.msra.mxu1 %v5105_v56 }
 0x21c   :  { %1472 = vmatprep.subr.bf16.mxu1 %v5111_v59  ;;  %v5133_v59 = vld [vmem:[#allocation22 + $0xc8] ss:$24 sps:$4 sm:$0xff]  }
 0x2d1   :  { %v4771_v24 = vpop.f32.mrb[16].mxu1 }
 0x2d2   :  { %v600_v25 = vpop.f32.mrb[17].mxu1 }
 0x2d3   :  { %v4772_v26 = vpop.f32.mrb[18].mxu1 }
 0x2d4   :  { %v664_v27 = vpack.c.bf16 %v4772_v26, %v4771_v24  ;;  %v603_v28 = vpop.f32.mrb[19].mxu1  ;;  %v5117_v26 = vld [vmem:[#allocation22 + $0x3c] ss:$24 sps:$4 sm:$0xff]  }
 0x2d5   :  { %v663_v29 = vpack.c.bf16 %v603_v28, %v600_v25 }
 0x2d7   :  { %4785 = vmatprep.subr.bf16.mxu0 %v663_v29 }
 0x2d8   :  { %4786 = vmatpush3.bf16.msra.mxu0 %v663_v29 }
 0x2d9   :  { %v4775_v30 = vpop.f32.mrb[20].mxu1  ;;  %4787 = vmatprep.subr.bf16.mxu0 %v664_v27 }
 0x2da   :  { %v616_v31 = vpop.f32.mrb[21].mxu1 }
 0x2db   :  { %v4776_v32 = vpop.f32.mrb[22].mxu1 }
 0x2dc   :  { %v666_v33 = vpack.c.bf16 %v4776_v32, %v4775_v30  ;;  %v619_v34 = vpop.f32.mrb[23].mxu1  ;;  %4788 = vmatpush3.bf16.msra.mxu0 %v664_v27 }
 0x2dd   :  { %v665_v35 = vpack.c.bf16 %v619_v34, %v616_v31  ;;  %v5115_v34 = vld [vmem:[#allocation22 + $0x38] ss:$24 sps:$4 sm:$0xff]  }
 0x2df   :  { %4789 = vmatprep.subr.bf16.mxu0 %v665_v35 }
 0x2e0   :  { %4790 = vmatpush3.bf16.msra.mxu0 %v665_v35 }
 0x2e1   :  { %v4779_v36 = vpop.f32.mrb[24].mxu1  ;;  %4791 = vmatprep.subr.bf16.mxu0 %v666_v33 }
 0x2e2   :  { %v632_v37 = vpop.f32.mrb[25].mxu1 }
 0x2e3   :  { %v4780_v38 = vpop.f32.mrb[26].mxu1 }
 0x2e4   :  { %v668_v39 = vpack.c.bf16 %v4780_v38, %v4779_v36  ;;  %v635_v40 = vpop.f32.mrb[27].mxu1  ;;  %4792 = vmatpush3.bf16.msra.mxu0 %v666_v33  ;;  %v5123_v36 = vld [vmem:[#allocation22 + $0x6c] ss:$24 sps:$4 sm:$0xff]  }
 0x2e5   :  { %v667_v41 = vpack.c.bf16 %v635_v40, %v632_v37 }
 0x2e7   :  { %4793 = vmatprep.subr.bf16.mxu0 %v667_v41 }
 0x2e8   :  { %4794 = vmatpush3.bf16.msra.mxu0 %v667_v41  ;;  %v5121_v41 = vld [vmem:[#allocation22 + $0x68] ss:$24 sps:$4 sm:$0xff]  }
 0x2e9   :  { %v4783_v42 = vpop.f32.mrb[28].mxu1  ;;  %4795 = vmatprep.subr.bf16.mxu0 %v668_v39 }
 0x2ea   :  { %v648_v43 = vpop.f32.mrb[29].mxu1 }
 0x2eb   :  { %v4784_v44 = vpop.f32.mrb[30].mxu1 }
 0x2ec   :  { %v670_v45 = vpack.c.bf16 %v4784_v44, %v4783_v42  ;;  %v651_v46 = vpop.f32.mrb[31].mxu1  ;;  %4796 = vmatpush3.bf16.msra.mxu0 %v668_v39  ;;  %v5129_v44 = vld [vmem:[#allocation22 + $0x9c] ss:$24 sps:$4 sm:$0xff]  }
 0x2ed   :  { %v669_v47 = vpack.c.bf16 %v651_v46, %v648_v43 }
 0x2ef   :  { %4797 = vmatprep.subr.bf16.mxu0 %v669_v47 }
 0x2f0   :  { %4798 = vmatpush3.bf16.msra.mxu0 %v669_v47 }
 0x2f1   :  { %4799 = vmatprep.subr.bf16.mxu0 %v670_v45 }
 0x2f4   :  { %4800 = vmatpush3.bf16.msra.mxu0 %v670_v45 }
 0x2f5   :  { %1359 = vmatprep.subr.bf16.mxu0 %v5108_v58 }
 0x2f7   :  { %4802 = vmatmul.mubr.bf16.vlgmr.msra.gmra.mrb[0].mxu0 %v5091_v48 }
 0x2f8   :  { %4805 = vmatprep.mubr.bf16.mxu0 %v5092_v49  ;;  %1360 = vmatpush1.bf16.msra.mxu0 %v5106_v57 }
 0x2f9   :  { %1361 = vmatprep.subr.bf16.mxu0 %v5114_v60 }
 0x2fc   :  { %1362 = vmatpush1.bf16.msra.mxu0 %v5112_v61 }
 0x2fd   :  { %1363 = vmatprep.subr.bf16.mxu0 %v5120_v62  ;;  %v5141_v62 = vld [vmem:[#allocation22 + $0xfc] ss:$24 sps:$4 sm:$0xff]  }
 0x2ff   :  { %4806 = vmatmul.mubr.bf16.gmra.mrb[4].mxu0 %v5093_v50 }
 0x300   :  { %4809 = vmatprep.mubr.bf16.mxu0 %v5094_v51  ;;  %1364 = vmatpush1.bf16.msra.mxu0 %v5118_v63 }
 0x301   :  { %1365 = vmatprep.subr.bf16.mxu0 %v5126_v0 }
 0x304   :  { %1366 = vmatpush1.bf16.msra.mxu0 %v5124_v1 }
 0x305   :  { %1367 = vmatprep.subr.bf16.mxu0 %v5132_v2 }
 0x307   :  { %4810 = vmatmul.mubr.bf16.gmra.mrb[8].mxu0 %v5095_v52  ;;  %v5127_v52 = vld [vmem:[#allocation22 + $0x98] ss:$24 sps:$4 sm:$0xff]  }
 0x308   :  { %4813 = vmatprep.mubr.bf16.mxu0 %v5096_v53  ;;  %1368 = vmatpush1.bf16.msra.mxu0 %v5130_v3 }
 0x309   :  { %1369 = vmatprep.subr.bf16.mxu0 %v5138_v4 }
 0x30c   :  { %1370 = vmatpush1.bf16.msra.mxu0 %v5136_v5 }
 0x30f   :  { %4814 = vmatmul.mubr.bf16.gmra.mrb[12].mxu0 %v5097_v54  ;;  %v5135_v54 = vld [vmem:[#allocation22 + $0xcc] ss:$24 sps:$4 sm:$0xff]  }
 0x3ca   :  { %v4803_v7 = vpop.f32.mrb[0].mxu0 }
 0x3cb   :  { %v769_v8 = vadd.f32 %v4803_v7, %v6067_v6  ;;  %v760_v9 = vpop.f32.mrb[1].mxu0  ;;  %v5139_v7 = vld [vmem:[#allocation22 + $0xf8] ss:$24 sps:$4 sm:$0xff]  }
 0x3cc   :  { %v761_v10 = vadd.f32 %v6067_v6, %v760_v9  ;;  %v4804_v11 = vpop.f32.mrb[2].mxu0 }
 0x3cd   :  { %v772_v12 = vadd.f32 %v4804_v11, %v6067_v6  ;;  %v763_v13 = vpop.f32.mrb[3].mxu0  ;;  %v825_v15 = vmax.f32 %v769_v8, 0.0 }
 0x3ce   :  { %v764_v14 = vadd.f32 %v6067_v6, %v763_v13  ;;  %v823_v18 = vmax.f32 %v761_v10, 0.0  ;;  %v5147_v13 = vld [vmem:[#allocation22 + $0x12c] ss:$24 sps:$4 sm:$0xff]  }
 0x3cf   :  { %v826_v16 = vmax.f32 %v772_v12, 0.0  ;;  %v5144_v12 = vld [vmem:[#allocation22 + $0x124] ss:$24 sps:$4 sm:$0xff]  }
 0x3d0   :  { %v824_v19 = vmax.f32 %v764_v14, 0.0  ;;  %v5142_v14 = vld [vmem:[#allocation22 + $0x120] ss:$24 sps:$4 sm:$0xff]   ;;  %1371 = vmatprep.subr.bf16.mxu0 %v5144_v12 }
 0x3d1   :  { %v6073_v20 = vpack.c.bf16 %v826_v16, %v825_v15  ;;  %v5145_v15 = vld [vmem:[#allocation22 + $0x128] ss:$24 sps:$4 sm:$0xff]   ;;  %1372 = vmatpush1.bf16.msra.mxu0 %v5142_v14  ;;  %v5153_v16 = vld [vmem:[#allocation22 + $0x15c] ss:$24 sps:$4 sm:$0xff]  }
 0x3d2   :  { %v6075_v21 = vpack.c.bf16 %v824_v19, %v823_v18  ;;  %v4807_v22 = vpop.f32.mrb[4].mxu0  ;;  %v5148_v18 = vld [vmem:[#allocation22 + $0x150] ss:$24 sps:$4 sm:$0xff]  }
 0x3d3   :  { %v785_v24 = vadd.f32 %v4807_v22, %v6067_v6  ;;  %v776_v25 = vpop.f32.mrb[5].mxu0  ;;  %v5151_v19 = vld [vmem:[#allocation22 + $0x158] ss:$24 sps:$4 sm:$0xff]   ;;  %v5759_v22 = vmov 0  }
 0x3d4   :  { %v777_v27 = vadd.f32 %v6067_v6, %v776_v25  ;;  %4833 = vmatprep.mubr.bf16.mxu1 %v6075_v21  ;;  %v4808_v28 = vpop.f32.mrb[6].mxu0  ;;  %1391 = vmatprep.mubr.bf16.mxu0 %v5759_v22  ;;  %v6111_v25 = vld [vmem:[#allocation20] ss:$0 sm:$0xff] }
 0x3d5   :  { %v829_v29 = vmax.f32 %v785_v24, 0.0  ;;  %v788_v30 = vadd.f32 %v4808_v28, %v6067_v6  ;;  %4834 = vmatmul.mubr.bf16.vlgmr.msra.gmra.mrb[32].mxu1 %v6073_v20  ;;  %v779_v31 = vpop.f32.mrb[7].mxu0  ;;  %v5160_v24 = vld [vmem:[#allocation22 + $0x14] ss:$24 sps:$4 sm:$0xff]  }
 0x3d6   :  { %v827_v32 = vmax.f32 %v777_v27, 0.0  ;;  %v780_v33 = vadd.f32 %v6067_v6, %v779_v31  ;;  %1473 = vmatpush1.bf16.msra.mxu1 %v5109_v23  ;;  %v5154_v23 = vld [vmem:[#allocation13] sm:$0xff]  }
 0x3d7   :  { %v830_v35 = vmax.f32 %v788_v30, 0.0  ;;  %1474 = vmatprep.subr.bf16.mxu1 %v5117_v26 }
 0x3d8   :  { %v828_v37 = vmax.f32 %v780_v33, 0.0 }
 0x3d9   :  { %v6083_v38 = vpack.c.bf16 %v830_v35, %v829_v29 }
 0x3da   :  { %v6085_v39 = vpack.c.bf16 %v828_v37, %v827_v32  ;;  %v4811_v40 = vpop.f32.mrb[8].mxu0  ;;  %1475 = vmatpush1.bf16.msra.mxu1 %v5115_v34 }
 0x3db   :  { %v801_v42 = vadd.f32 %v4811_v40, %v6067_v6  ;;  %v792_v43 = vpop.f32.mrb[9].mxu0  ;;  %1476 = vmatprep.subr.bf16.mxu1 %v5123_v36 }
 0x3dc   :  { %4837 = vmatprep.mubr.bf16.mxu1 %v6085_v39  ;;  %v793_v45 = vadd.f32 %v6067_v6, %v792_v43  ;;  %v4812_v46 = vpop.f32.mrb[10].mxu0  ;;  %v5155_v43 = vld [vmem:[#allocation13 + $0x8] sm:$0xff]  }
 0x3dd   :  { %4838 = vmatmul.mubr.bf16.gmra.mrb[36].mxu1 %v6083_v38  ;;  %v833_v47 = vmax.f32 %v801_v42, 0.0  ;;  %v804_v48 = vadd.f32 %v4812_v46, %v6067_v6  ;;  %v795_v49 = vpop.f32.mrb[11].mxu0  ;;  %v5158_v46 = vld [vmem:[#allocation22 + $0x10] ss:$24 sps:$4 sm:$0xff]  }
 0x3de   :  { %v831_v50 = vmax.f32 %v793_v45, 0.0  ;;  %v796_v51 = vadd.f32 %v6067_v6, %v795_v49  ;;  %1477 = vmatpush1.bf16.msra.mxu1 %v5121_v41  ;;  %v5164_v49 = vld [vmem:[#allocation22 + $0x44] ss:$24 sps:$4 sm:$0xff]  }
 0x3df   :  { %v834_v53 = vmax.f32 %v804_v48, 0.0  ;;  %1478 = vmatprep.subr.bf16.mxu1 %v5129_v44 }
 0x3e0   :  { %v832_v55 = vmax.f32 %v796_v51, 0.0 }
 0x3e1   :  { %v6093_v56 = vpack.c.bf16 %v834_v53, %v833_v47 }
 0x3e2   :  { %v6095_v57 = vpack.c.bf16 %v832_v55, %v831_v50  ;;  %v4815_v58 = vpop.f32.mrb[12].mxu0  ;;  %1479 = vmatpush1.bf16.msra.mxu1 %v5127_v52  ;;  %v5156_v55 = vld [vmem:[#allocation13 + $0x10] sm:$0xff]  }
 0x3e3   :  { %v817_v60 = vadd.f32 %v4815_v58, %v6067_v6  ;;  %v808_v61 = vpop.f32.mrb[13].mxu0  ;;  %1480 = vmatprep.subr.bf16.mxu1 %v5135_v54 }
 0x3e4   :  { %4841 = vmatprep.mubr.bf16.mxu1 %v6095_v57  ;;  %v809_v63 = vadd.f32 %v6067_v6, %v808_v61  ;;  %v4816_v0 = vpop.f32.mrb[14].mxu0 }
 0x3e5   :  { %4842 = vmatmul.mubr.bf16.gmra.mrb[40].mxu1 %v6093_v56  ;;  %v837_v1 = vmax.f32 %v817_v60, 0.0  ;;  %v820_v2 = vadd.f32 %v4816_v0, %v6067_v6  ;;  %v811_v3 = vpop.f32.mrb[15].mxu0  ;;  %v5167_v0 = vld [vmem:[#allocation22 + $0x74] ss:$24 sps:$4 sm:$0xff]  }
 0x3e6   :  { %v835_v4 = vmax.f32 %v809_v63, 0.0  ;;  %v812_v5 = vadd.f32 %v6067_v6, %v811_v3  ;;  %1481 = vmatpush1.bf16.msra.mxu1 %v5133_v59  ;;  %v5150_v6 = vld [vmem:[#allocation22 + $0x154] ss:$24 sps:$4 sm:$0xff]   ;;  %v5162_v59 = vld [vmem:[#allocation22 + $0x40] ss:$24 sps:$4 sm:$0xff]  }
 0x3e7   :  { %v838_v8 = vmax.f32 %v820_v2, 0.0  ;;  %1482 = vmatprep.subr.bf16.mxu1 %v5141_v62  ;;  %1373 = vmatprep.subr.bf16.mxu0 %v5150_v6  ;;  %v5157_v3 = vld [vmem:[#allocation13 + $0x18] sm:$0xff]  }
 0x3e8   :  { %v836_v9 = vmax.f32 %v812_v5, 0.0  ;;  %1374 = vmatpush1.bf16.msra.mxu0 %v5148_v18  ;;  %v5169_v18 = vld [vmem:[#allocation22 + $0xa0] ss:$24 sps:$4 sm:$0xff]  }
 0x3e9   :  { %v6103_v10 = vpack.c.bf16 %v838_v8, %v837_v1  ;;  %1585 = vmatprep.subr.bf16.mxu0 %v5160_v24  ;;  %v5171_v8 = vld [vmem:[#allocation22 + $0xa4] ss:$24 sps:$4 sm:$0xff]  }
 0x3ea   :  { %v6105_v11 = vpack.c.bf16 %v836_v9, %v835_v4  ;;  %1483 = vmatpush1.bf16.msra.mxu1 %v5139_v7  ;;  %v5165_v4 = vld [vmem:[#allocation22 + $0x70] ss:$24 sps:$4 sm:$0xff]  }
 0x3eb   :  { %1484 = vmatprep.subr.bf16.mxu1 %v5147_v13 }
 0x3ec   :  { %4845 = vmatprep.mubr.bf16.mxu1 %v6105_v11 }
 0x3ed   :  { %4846 = vmatmul.mubr.bf16.gmra.mrb[44].mxu1 %v6103_v10 }
 0x3ee   :  { %1485 = vmatpush1.bf16.msra.mxu1 %v5145_v15  ;;  %1504 = vmatprep.mubr.bf16.mxu1 %v5759_v22 }
 0x3ef   :  { %1486 = vmatprep.subr.bf16.mxu1 %v5153_v16  ;;  %v5161_v16 = vld [vmem:[#allocation13 + $0x20] sm:$0xff]  }
 0x3f2   :  { %1487 = vmatpush1.bf16.msra.mxu1 %v5151_v19 }
 0x3f3   :  { %4849 = vmatprep.subr.bf16.mxu1 %v5154_v23 }
 0x4a8   :  { %v4835_v26 = vpop.f32.mrb[32].mxu1 }
 0x4a9   :  { %v961_v27 = vadd.f32 %v4835_v26, %v6111_v25  ;;  %v952_v28 = vpop.f32.mrb[33].mxu1 }
 0x4aa   :  { %v953_v29 = vadd.f32 %v6111_v25, %v952_v28  ;;  %v4836_v30 = vpop.f32.mrb[34].mxu1 }
 0x4ab   :  { %v964_v31 = vadd.f32 %v4836_v30, %v6111_v25  ;;  %v955_v32 = vpop.f32.mrb[35].mxu1  ;;  %v1017_v34 = vmax.f32 %v961_v27, 0.0  ;;  %v5174_v27 = vld [vmem:[#allocation22 + $0xd4] ss:$24 sps:$4 sm:$0xff]   ;;  %v5168_v30 = vld [vmem:[#allocation13 + $0x28] sm:$0xff]  }
 0x4ac   :  { %v956_v33 = vadd.f32 %v6111_v25, %v955_v32  ;;  %v1015_v36 = vmax.f32 %v953_v29, 0.0 }
 0x4ad   :  { %v1018_v35 = vmax.f32 %v964_v31, 0.0  ;;  %v5172_v31 = vld [vmem:[#allocation22 + $0xd0] ss:$24 sps:$4 sm:$0xff]  }
 0x4ae   :  { %v1016_v37 = vmax.f32 %v956_v33, 0.0 }
 0x4af   :  { %v6117_v40 = vpack.c.bf16 %v1018_v35, %v1017_v34  ;;  %v5178_v34 = vld [vmem:[#allocation22 + $0x104] ss:$24 sps:$4 sm:$0xff]  }
 0x4b0   :  { %v6119_v41 = vpack.c.bf16 %v1016_v37, %v1015_v36  ;;  %v4839_v42 = vpop.f32.mrb[36].mxu1 }
 0x4b1   :  { %v977_v44 = vadd.f32 %v4839_v42, %v6111_v25  ;;  %v968_v45 = vpop.f32.mrb[37].mxu1 }
 0x4b2   :  { %v969_v47 = vadd.f32 %v6111_v25, %v968_v45  ;;  %1392 = vmatmul.mubr.bf16.vlgmr.msra.gmra.mrb[16].mxu0 %v6119_v41  ;;  %1505 = vmatmul.mubr.bf16.vlgmr.msra.gmra.mrb[48].mxu1 %v6119_v41  ;;  %v4840_v48 = vpop.f32.mrb[38].mxu1  ;;  %v5175_v45 = vld [vmem:[#allocation13 + $0x30] sm:$0xff]  }
 0x4b3   :  { %v1021_v50 = vmax.f32 %v977_v44, 0.0  ;;  %v980_v51 = vadd.f32 %v4840_v48, %v6111_v25  ;;  %4850 = vmatpush3.bf16.msra.mxu1 %v5154_v23  ;;  %v971_v52 = vpop.f32.mrb[39].mxu1  ;;  %1401 = vmatprep.mubr.bf16.mxu0 %v5759_v22 }
 0x4b4   :  { %v1019_v53 = vmax.f32 %v969_v47, 0.0  ;;  %v972_v54 = vadd.f32 %v6111_v25, %v971_v52  ;;  %1514 = vmatprep.mubr.bf16.mxu1 %v5759_v22  ;;  %4851 = vmatprep.subr.bf16.mxu1 %v5155_v43  ;;  %v5182_v52 = vld [vmem:[#allocation13 + $0x38] sm:$0xff]  }
 0x4b5   :  { %v1022_v58 = vmax.f32 %v980_v51, 0.0  ;;  %1586 = vmatpush1.bf16.msra.mxu0 %v5158_v46  ;;  %v5176_v46 = vld [vmem:[#allocation22 + $0x100] ss:$24 sps:$4 sm:$0xff]   ;;  %v5179_v51 = vld [vmem:[#allocation22 + $0x130] ss:$24 sps:$4 sm:$0xff]  }
 0x4b6   :  { %v1020_v60 = vmax.f32 %v972_v54, 0.0  ;;  %1587 = vmatprep.subr.bf16.mxu0 %v5164_v49  ;;  %v5186_v54 = vld [vmem:[#allocation19] sm:$0xff]  }
 0x4b7   :  { %v6129_v61 = vpack.c.bf16 %v1022_v58, %v1021_v50  ;;  %4852 = vmatpush3.bf16.msra.mxu1 %v5155_v43  ;;  %v5181_v50 = vld [vmem:[#allocation22 + $0x134] ss:$24 sps:$4 sm:$0xff]  }
 0x4b8   :  { %v6131_v62 = vpack.c.bf16 %v1020_v60, %v1019_v53  ;;  %v4843_v63 = vpop.f32.mrb[40].mxu1  ;;  %4853 = vmatprep.subr.bf16.mxu1 %v5156_v55  ;;  %v5183_v53 = vld [vmem:[#allocation22 + $0x160] ss:$24 sps:$4 sm:$0xff]  }
 0x4b9   :  { %v993_v1 = vadd.f32 %v4843_v63, %v6111_v25  ;;  %v984_v2 = vpop.f32.mrb[41].mxu1  ;;  %1588 = vmatpush1.bf16.msra.mxu0 %v5162_v59 }
 0x4ba   :  { %1402 = vmatmul.mubr.bf16.gmra.mrb[20].mxu0 %v6117_v40  ;;  %1515 = vmatmul.mubr.bf16.gmra.mrb[52].mxu1 %v6117_v40  ;;  %v985_v5 = vadd.f32 %v6111_v25, %v984_v2  ;;  %v4844_v7 = vpop.f32.mrb[42].mxu1 }
 0x4bb   :  { %v1025_v9 = vmax.f32 %v993_v1, 0.0  ;;  %1411 = vmatprep.mubr.bf16.mxu0 %v5759_v22  ;;  %1524 = vmatprep.mubr.bf16.mxu1 %v5759_v22  ;;  %v996_v12 = vadd.f32 %v4844_v7, %v6111_v25  ;;  %v987_v13 = vpop.f32.mrb[43].mxu1 }
 0x4bc   :  { %v1023_v14 = vmax.f32 %v985_v5, 0.0  ;;  %4854 = vmatpush3.bf16.msra.mxu1 %v5156_v55  ;;  %v988_v15 = vadd.f32 %v6111_v25, %v987_v13  ;;  %1589 = vmatprep.subr.bf16.mxu0 %v5167_v0  ;;  %v5187_v55 = vld [vmem:[#allocation19 + $0x8] sm:$0xff]  }
 0x4bd   :  { %v1026_v6 = vmax.f32 %v996_v12, 0.0  ;;  %4855 = vmatprep.subr.bf16.mxu1 %v5157_v3  ;;  %1590 = vmatpush1.bf16.msra.mxu0 %v5165_v4  ;;  %v5188_v4 = vld [vmem:[#allocation19 + $0x10] sm:$0xff]  }
 0x4be   :  { %v1024_v19 = vmax.f32 %v988_v15, 0.0  ;;  %1591 = vmatprep.subr.bf16.mxu0 %v5171_v8 }
 0x4bf   :  { %v6141_v23 = vpack.c.bf16 %v1026_v6, %v1025_v9 }
 0x4c0   :  { %v6143_v24 = vpack.c.bf16 %v1024_v19, %v1023_v14  ;;  %4856 = vmatpush3.bf16.msra.mxu1 %v5157_v3  ;;  %v4847_v26 = vpop.f32.mrb[44].mxu1  ;;  %v5189_v14 = vld [vmem:[#allocation19 + $0x18] sm:$0xff]  }
 0x4c1   :  { %v1009_v28 = vadd.f32 %v4847_v26, %v6111_v25  ;;  %v1000_v29 = vpop.f32.mrb[45].mxu1  ;;  %4857 = vmatprep.subr.bf16.mxu1 %v5161_v16  ;;  %1592 = vmatpush1.bf16.msra.mxu0 %v5169_v18 }
 0x4c2   :  { %1412 = vmatmul.mubr.bf16.gmra.mrb[24].mxu0 %v6131_v62  ;;  %1525 = vmatmul.mubr.bf16.gmra.mrb[56].mxu1 %v6131_v62  ;;  %v1001_v32 = vadd.f32 %v6111_v25, %v1000_v29  ;;  %v4848_v33 = vpop.f32.mrb[46].mxu1  ;;  %v5190_v29 = vld [vmem:[#allocation19 + $0x20] sm:$0xff]  }
 0x4c3   :  { %1421 = vmatprep.mubr.bf16.mxu0 %v5759_v22  ;;  %1534 = vmatprep.mubr.bf16.mxu1 %v5759_v22  ;;  %v1029_v35 = vmax.f32 %v1009_v28, 0.0  ;;  %v1012_v36 = vadd.f32 %v4848_v33, %v6111_v25  ;;  %v1003_v37 = vpop.f32.mrb[47].mxu1 }
 0x4c4   :  { %v1027_v42 = vmax.f32 %v1001_v32, 0.0  ;;  %4858 = vmatpush3.bf16.msra.mxu1 %v5161_v16  ;;  %v1004_v43 = vadd.f32 %v6111_v25, %v1003_v37  ;;  %1593 = vmatprep.subr.bf16.mxu0 %v5174_v27  ;;  %v5185_v25 = vld [vmem:[#allocation22 + $0x164] ss:$24 sps:$4 sm:$0xff]  }
 0x4c5   :  { %v1030_v44 = vmax.f32 %v1012_v36, 0.0  ;;  %4859 = vmatprep.subr.bf16.mxu1 %v5168_v30  ;;  %1594 = vmatpush1.bf16.msra.mxu0 %v5172_v31  ;;  %v5191_v36 = vld [vmem:[#allocation19 + $0x28] sm:$0xff]  }
 0x4c6   :  { %v1028_v47 = vmax.f32 %v1004_v43, 0.0  ;;  %1595 = vmatprep.subr.bf16.mxu0 %v5178_v34 }
 0x4c7   :  { %v1038_v48 = vpack.c.bf16 %v1030_v44, %v1029_v35 }
 0x4c8   :  { %v1037_v49 = vpack.c.bf16 %v1028_v47, %v1027_v42  ;;  %4860 = vmatpush3.bf16.msra.mxu1 %v5168_v30 }
 0x4c9   :  { %4861 = vmatprep.subr.bf16.mxu1 %v5175_v45  ;;  %1596 = vmatpush1.bf16.msra.mxu0 %v5176_v46 }
 0x4ca   :  { %1422 = vmatmul.mubr.bf16.gmra.mrb[28].mxu0 %v6129_v61  ;;  %1535 = vmatmul.mubr.bf16.gmra.mrb[60].mxu1 %v6129_v61 }
 0x4cb   :  { %1431 = vmatprep.mubr.bf16.mxu0 %v5759_v22  ;;  %1544 = vmatprep.mubr.bf16.mxu1 %v5759_v22 }
 0x4cc   :  { %4862 = vmatpush3.bf16.msra.mxu1 %v5175_v45  ;;  %1597 = vmatprep.subr.bf16.mxu0 %v5181_v50 }
 0x4cd   :  { %4863 = vmatprep.subr.bf16.mxu1 %v5182_v52  ;;  %1598 = vmatpush1.bf16.msra.mxu0 %v5179_v51  ;;  %v5192_v51 = vld [vmem:[#allocation19 + $0x30] sm:$0xff]  }
 0x4ce   :  { %1599 = vmatprep.subr.bf16.mxu0 %v5185_v25 }
 0x4d0   :  { %4864 = vmatpush3.bf16.msra.mxu1 %v5182_v52 }
 0x4d1   :  { %1600 = vmatpush1.bf16.msra.mxu0 %v5183_v53 }
 0x4d2   :  { %1432 = vmatmul.mubr.bf16.gmra.mrb[32].mxu0 %v6143_v24  ;;  %1545 = vmatmul.mubr.bf16.gmra.mrb[64].mxu1 %v6143_v24 }
 0x4d3   :  { %1441 = vmatprep.mubr.bf16.mxu0 %v5759_v22  ;;  %1554 = vmatprep.mubr.bf16.mxu1 %v5759_v22 }
 0x4d4   :  { %4913 = vmatprep.subr.bf16.mxu0 %v5186_v54 }
 0x4da   :  { %1442 = vmatmul.mubr.bf16.gmra.mrb[36].mxu0 %v6141_v23  ;;  %1555 = vmatmul.mubr.bf16.gmra.mrb[68].mxu1 %v6141_v23 }
 0x4db   :  { %1451 = vmatprep.mubr.bf16.mxu0 %v5759_v22  ;;  %1564 = vmatprep.mubr.bf16.mxu1 %v5759_v22 }
 0x4e2   :  { %1452 = vmatmul.mubr.bf16.gmra.mrb[40].mxu0 %v1037_v49  ;;  %1565 = vmatmul.mubr.bf16.gmra.mrb[72].mxu1 %v1037_v49 }
 0x4e3   :  { %1461 = vmatprep.mubr.bf16.mxu0 %v5759_v22  ;;  %1574 = vmatprep.mubr.bf16.mxu1 %v5759_v22 }
 0x4ea   :  { %1462 = vmatmul.mubr.bf16.gmra.mrb[44].mxu0 %v1038_v48  ;;  %1575 = vmatmul.mubr.bf16.gmra.mrb[76].mxu1 %v1038_v48 }
 0x4eb   :  { %4865 = vmatprep.mubr.bf16.mxu1 %v6075_v21  ;;  %1617 = vmatprep.mubr.bf16.mxu0 %v5759_v22 }
 0x4f2   :  { %1618 = vmatmul.mubr.bf16.vlgmr.msra.gmra.mrb[48].mxu0 %v6119_v41  ;;  %4866 = vmatmul.mubr.bf16.vlgmr.msra.gmra.mrb[80].mxu1 %v6073_v20  ;;  %v1089_v20 = vlaneseq }
 0x4f3   :  { %4869 = vmatprep.mubr.bf16.mxu1 %v6085_v39  ;;  %1627 = vmatprep.mubr.bf16.mxu0 %v5759_v22  ;;  %v6198_v39 = vld [vmem:[#allocation23] sm:$0x3f] }
 0x4f4   :  { %v6190_v21 = vshrl.u32 %v1089_v20, 7  ;;  %4914 = vmatpush3.bf16.msra.mxu0 %v5186_v54 }
 0x4f5   :  { %4915 = vmatprep.subr.bf16.mxu0 %v5187_v55 }
 0x4f8   :  { %4916 = vmatpush3.bf16.msra.mxu0 %v5187_v55 }
 0x4f9   :  { %4917 = vmatprep.subr.bf16.mxu0 %v5188_v4 }
 0x4fa   :  { %1628 = vmatmul.mubr.bf16.gmra.mrb[52].mxu0 %v6117_v40  ;;  %4870 = vmatmul.mubr.bf16.gmra.mrb[84].mxu1 %v6083_v38  ;;  %v6193_v38 = vsub.s32 0, %v6190_v21 }
 0x4fb   :  { %4873 = vmatprep.mubr.bf16.mxu1 %v6095_v57  ;;  %1637 = vmatprep.mubr.bf16.mxu0 %v5759_v22  ;;  %v6204_v57 = vsub.s32 3, %v6190_v21 }
 0x4fc   :  { %4918 = vmatpush3.bf16.msra.mxu0 %v5188_v4 }
 0x4fd   :  { %v6220_v41 = vrot.slane %v6198_v39, %v6204_v57  ;;  %4919 = vmatprep.subr.bf16.mxu0 %v5189_v14 }
 0x500   :  { %4920 = vmatpush3.bf16.msra.mxu0 %v5189_v14 }
 0x501   :  { %4921 = vmatprep.subr.bf16.mxu0 %v5190_v29 }
 0x502   :  { %1638 = vmatmul.mubr.bf16.gmra.mrb[56].mxu0 %v6131_v62  ;;  %4874 = vmatmul.mubr.bf16.gmra.mrb[88].mxu1 %v6093_v56  ;;  %v6201_v56 = vsub.s32 1, %v6190_v21 }
 0x503   :  { %4877 = vmatprep.mubr.bf16.mxu1 %v6105_v11  ;;  %1647 = vmatprep.mubr.bf16.mxu0 %v5759_v22 }
 0x504   :  { %v6216_v40 = vrot.slane %v6198_v39, %v6201_v56  ;;  %4922 = vmatpush3.bf16.msra.mxu0 %v5190_v29 }
 0x505   :  { %4923 = vmatprep.subr.bf16.mxu0 %v5191_v36 }
 0x508   :  { %4924 = vmatpush3.bf16.msra.mxu0 %v5191_v36 }
 0x509   :  { %4925 = vmatprep.subr.bf16.mxu0 %v5192_v51 }
 0x50a   :  { %1648 = vmatmul.mubr.bf16.gmra.mrb[60].mxu0 %v6129_v61  ;;  %4878 = vmatmul.mubr.bf16.gmra.mrb[92].mxu1 %v6103_v10  ;;  %v6208_v10 = vrot.slane %v6198_v39, %v6193_v38 }
 0x50b   :  { %1657 = vmatprep.mubr.bf16.mxu0 %v5759_v22  ;;  %4897 = vmatprep.mubr.bf16.mxu1 %v6064_v17  ;;  %v6196_v17 = vsub.s32 2, %v6190_v21 }
 0x50c   :  { %4926 = vmatpush3.bf16.msra.mxu0 %v5192_v51 }
 0x50d   :  { %v6212_v11 = vrot.slane %v6198_v39, %v6196_v17 }
 0x512   :  { %1658 = vmatmul.mubr.bf16.gmra.mrb[64].mxu0 %v6143_v24 }
 0x513   :  { %1667 = vmatprep.mubr.bf16.mxu0 %v5759_v22 }
 0x51a   :  { %1668 = vmatmul.mubr.bf16.gmra.mrb[68].mxu0 %v6141_v23 }
 0x51b   :  { %1677 = vmatprep.mubr.bf16.mxu0 %v5759_v22 }
 0x522   :  { %1678 = vmatmul.mubr.bf16.gmra.mrb[72].mxu0 %v1037_v49 }
 0x523   :  { %1687 = vmatprep.mubr.bf16.mxu0 %v5759_v22 }
 0x52a   :  { %1688 = vmatmul.mubr.bf16.gmra.mrb[76].mxu0 %v1038_v48 }
 0x585   :  { %v1393_v58 = vpop.f32.mrb[16].mxu0  ;;  %v1506_v59 = vpop.f32.mrb[48].mxu1 }
 0x586   :  { %v1394_v60 = vadd.f32 %v1393_v58, %v6208_v10  ;;  %v1507_v61 = vadd.f32 %v1506_v59, %v6212_v11  ;;  %v1395_v62 = vpop.f32.mrb[17].mxu0  ;;  %v1508_v63 = vpop.f32.mrb[49].mxu1 }
 0x587   :  { %v1396_v0 = vadd.f32 %v1395_v62, %v6216_v40  ;;  %v1509_v1 = vadd.f32 %v1508_v63, %v6220_v41  ;;  %v1397_v2 = vpop.f32.mrb[18].mxu0  ;;  %v1510_v3 = vpop.f32.mrb[50].mxu1 }
 0x588   :  { %1698 = vst [vmem:[#allocation25] sm:$0xff] %v1394_v60  ;;  %1700 = vst [vmem:[#allocation25 + $0x10] sm:$0xff] %v1507_v61  ;;  %v1398_v5 = vadd.f32 %v1397_v2, %v6208_v10  ;;  %v1511_v7 = vadd.f32 %v1510_v3, %v6212_v11  ;;  %v1399_v8 = vpop.f32.mrb[19].mxu0  ;;  %v1512_v9 = vpop.f32.mrb[51].mxu1 }
 0x589   :  { %1699 = vst [vmem:[#allocation25 + $0x8] sm:$0xff] %v1396_v0  ;;  %1701 = vst [vmem:[#allocation25 + $0x18] sm:$0xff] %v1509_v1  ;;  %v1400_v12 = vadd.f32 %v1399_v8, %v6216_v40  ;;  %v1513_v13 = vadd.f32 %v1512_v9, %v6220_v41 }
 0x58a   :  { %1704 = vst [vmem:[#allocation25 + $0x30] sm:$0xff] %v1398_v5  ;;  %1706 = vst [vmem:[#allocation25 + $0x40] sm:$0xff] %v1511_v7 }
 0x58b   :  { %1705 = vst [vmem:[#allocation25 + $0x38] sm:$0xff] %v1400_v12  ;;  %1707 = vst [vmem:[#allocation25 + $0x48] sm:$0xff] %v1513_v13 }
 0x58d   :  { %v1403_v15 = vpop.f32.mrb[20].mxu0  ;;  %v1516_v6 = vpop.f32.mrb[52].mxu1 }
 0x58e   :  { %v1404_v16 = vadd.f32 %v1403_v15, %v6208_v10  ;;  %v1517_v18 = vadd.f32 %v1516_v6, %v6212_v11  ;;  %v1405_v19 = vpop.f32.mrb[21].mxu0  ;;  %v1518_v23 = vpop.f32.mrb[53].mxu1 }
 0x58f   :  { %v1406_v24 = vadd.f32 %v1405_v19, %v6216_v40  ;;  %v1519_v26 = vadd.f32 %v1518_v23, %v6220_v41  ;;  %v1407_v27 = vpop.f32.mrb[22].mxu0  ;;  %v1520_v28 = vpop.f32.mrb[54].mxu1 }
 0x590   :  { %1710 = vst [vmem:[#allocation25 + $0x60] sm:$0xff] %v1404_v16  ;;  %1712 = vst [vmem:[#allocation25 + $0x70] sm:$0xff] %v1517_v18  ;;  %v1408_v30 = vadd.f32 %v1407_v27, %v6208_v10  ;;  %v1521_v31 = vadd.f32 %v1520_v28, %v6212_v11  ;;  %v1409_v32 = vpop.f32.mrb[23].mxu0  ;;  %v1522_v33 = vpop.f32.mrb[55].mxu1 }
 0x591   :  { %1711 = vst [vmem:[#allocation25 + $0x68] sm:$0xff] %v1406_v24  ;;  %1713 = vst [vmem:[#allocation25 + $0x78] sm:$0xff] %v1519_v26  ;;  %v1410_v34 = vadd.f32 %v1409_v32, %v6216_v40  ;;  %v1523_v35 = vadd.f32 %v1522_v33, %v6220_v41 }
 0x592   :  { %1716 = vst [vmem:[#allocation25 + $0x90] sm:$0xff] %v1408_v30  ;;  %1718 = vst [vmem:[#allocation25 + $0xa0] sm:$0xff] %v1521_v31 }
 0x593   :  { %1717 = vst [vmem:[#allocation25 + $0x98] sm:$0xff] %v1410_v34  ;;  %1719 = vst [vmem:[#allocation25 + $0xa8] sm:$0xff] %v1523_v35 }
 0x595   :  { %v1413_v37 = vpop.f32.mrb[24].mxu0  ;;  %v1526_v42 = vpop.f32.mrb[56].mxu1 }
 0x596   :  { %v1414_v43 = vadd.f32 %v1413_v37, %v6208_v10  ;;  %v1527_v44 = vadd.f32 %v1526_v42, %v6212_v11  ;;  %v1415_v45 = vpop.f32.mrb[25].mxu0  ;;  %v1528_v46 = vpop.f32.mrb[57].mxu1 }
 0x597   :  { %v1416_v47 = vadd.f32 %v1415_v45, %v6216_v40  ;;  %v1529_v48 = vadd.f32 %v1528_v46, %v6220_v41  ;;  %v1417_v49 = vpop.f32.mrb[26].mxu0  ;;  %v1530_v50 = vpop.f32.mrb[58].mxu1 }
 0x598   :  { %1722 = vst [vmem:[#allocation25 + $0xc0] sm:$0xff] %v1414_v43  ;;  %1724 = vst [vmem:[#allocation25 + $0xd0] sm:$0xff] %v1527_v44  ;;  %v1418_v52 = vadd.f32 %v1417_v49, %v6208_v10  ;;  %v1531_v25 = vadd.f32 %v1530_v50, %v6212_v11  ;;  %v1419_v53 = vpop.f32.mrb[27].mxu0  ;;  %v1532_v20 = vpop.f32.mrb[59].mxu1 }
 0x599   :  { %1723 = vst [vmem:[#allocation25 + $0xc8] sm:$0xff] %v1416_v47  ;;  %1725 = vst [vmem:[#allocation25 + $0xd8] sm:$0xff] %v1529_v48  ;;  %v1420_v54 = vadd.f32 %v1419_v53, %v6216_v40  ;;  %v1533_v55 = vadd.f32 %v1532_v20, %v6220_v41 }
 0x59a   :  { %1728 = vst [vmem:[#allocation25 + $0xf0] sm:$0xff] %v1418_v52  ;;  %1730 = vst [vmem:[#allocation25 + $0x100] sm:$0xff] %v1531_v25 }
 0x59b   :  { %1729 = vst [vmem:[#allocation25 + $0xf8] sm:$0xff] %v1420_v54  ;;  %1731 = vst [vmem:[#allocation25 + $0x108] sm:$0xff] %v1533_v55 }
 0x59d   :  { %v1423_v58 = vpop.f32.mrb[28].mxu0  ;;  %v1536_v59 = vpop.f32.mrb[60].mxu1 }
 0x59e   :  { %v1424_v60 = vadd.f32 %v1423_v58, %v6208_v10  ;;  %v1537_v61 = vadd.f32 %v1536_v59, %v6212_v11  ;;  %v1425_v62 = vpop.f32.mrb[29].mxu0  ;;  %v1538_v63 = vpop.f32.mrb[61].mxu1 }
 0x59f   :  { %v1426_v0 = vadd.f32 %v1425_v62, %v6216_v40  ;;  %v1539_v1 = vadd.f32 %v1538_v63, %v6220_v41  ;;  %v1427_v2 = vpop.f32.mrb[30].mxu0  ;;  %v1540_v3 = vpop.f32.mrb[62].mxu1 }
 0x5a0   :  { %1734 = vst [vmem:[#allocation25 + $0x120] sm:$0xff] %v1424_v60  ;;  %1736 = vst [vmem:[#allocation25 + $0x130] sm:$0xff] %v1537_v61  ;;  %v1428_v4 = vadd.f32 %v1427_v2, %v6208_v10  ;;  %v1541_v5 = vadd.f32 %v1540_v3, %v6212_v11  ;;  %v1429_v7 = vpop.f32.mrb[31].mxu0  ;;  %v1542_v8 = vpop.f32.mrb[63].mxu1 }
 0x5a1   :  { %1735 = vst [vmem:[#allocation25 + $0x128] sm:$0xff] %v1426_v0  ;;  %1737 = vst [vmem:[#allocation25 + $0x138] sm:$0xff] %v1539_v1  ;;  %v1430_v9 = vadd.f32 %v1429_v7, %v6216_v40  ;;  %v1543_v12 = vadd.f32 %v1542_v8, %v6220_v41 }
 0x5a2   :  { %1740 = vst [vmem:[#allocation25 + $0x150] sm:$0xff] %v1428_v4  ;;  %1742 = vst [vmem:[#allocation25 + $0x160] sm:$0xff] %v1541_v5 }
 0x5a3   :  { %1741 = vst [vmem:[#allocation25 + $0x158] sm:$0xff] %v1430_v9  ;;  %1743 = vst [vmem:[#allocation25 + $0x168] sm:$0xff] %v1543_v12 }
 0x5a5   :  { %v1433_v13 = vpop.f32.mrb[32].mxu0  ;;  %v1546_v14 = vpop.f32.mrb[64].mxu1 }
 0x5a6   :  { %v1434_v15 = vadd.f32 %v1433_v13, %v6208_v10  ;;  %v1547_v6 = vadd.f32 %v1546_v14, %v6212_v11  ;;  %v1435_v16 = vpop.f32.mrb[33].mxu0  ;;  %v1548_v18 = vpop.f32.mrb[65].mxu1  ;;  %v6281_v14 = vsub.s32 4, %v6190_v21 }
 0x5a7   :  { %v1436_v19 = vadd.f32 %v1435_v16, %v6216_v40  ;;  %v1549_v23 = vadd.f32 %v1548_v18, %v6220_v41  ;;  %v1437_v24 = vpop.f32.mrb[34].mxu0  ;;  %v1550_v26 = vpop.f32.mrb[66].mxu1 }
 0x5a8   :  { %1746 = vst [vmem:[#allocation25 + $0x180] sm:$0xff] %v1434_v15  ;;  %1748 = vst [vmem:[#allocation25 + $0x190] sm:$0xff] %v1547_v6  ;;  %v1438_v27 = vadd.f32 %v1437_v24, %v6208_v10  ;;  %v1551_v28 = vadd.f32 %v1550_v26, %v6212_v11  ;;  %v1439_v29 = vpop.f32.mrb[35].mxu0  ;;  %v1552_v30 = vpop.f32.mrb[67].mxu1 }
 0x5a9   :  { %1747 = vst [vmem:[#allocation25 + $0x188] sm:$0xff] %v1436_v19  ;;  %1749 = vst [vmem:[#allocation25 + $0x198] sm:$0xff] %v1549_v23  ;;  %v1440_v31 = vadd.f32 %v1439_v29, %v6216_v40  ;;  %v1553_v32 = vadd.f32 %v1552_v30, %v6220_v41  ;;  %v6286_v19 = vsub.s32 5, %v6190_v21  ;;  %v6294_v21 = vrot.slane %v6198_v39, %v6281_v14 }
 0x5aa   :  { %1752 = vst [vmem:[#allocation25 + $0x1b0] sm:$0xff] %v1438_v27  ;;  %1754 = vst [vmem:[#allocation25 + $0x1c0] sm:$0xff] %v1551_v28 }
 0x5ab   :  { %1753 = vst [vmem:[#allocation25 + $0x1b8] sm:$0xff] %v1440_v31  ;;  %1755 = vst [vmem:[#allocation25 + $0x1c8] sm:$0xff] %v1553_v32 }
 0x5ad   :  { %v1443_v33 = vpop.f32.mrb[36].mxu0  ;;  %v1556_v34 = vpop.f32.mrb[68].mxu1 }
 0x5ae   :  { %v1444_v35 = vadd.f32 %v1443_v33, %v6208_v10  ;;  %v1557_v36 = vadd.f32 %v1556_v34, %v6212_v11  ;;  %v1445_v37 = vpop.f32.mrb[37].mxu0  ;;  %v1558_v42 = vpop.f32.mrb[69].mxu1 }
 0x5af   :  { %v1446_v43 = vadd.f32 %v1445_v37, %v6216_v40  ;;  %v1559_v44 = vadd.f32 %v1558_v42, %v6220_v41  ;;  %v1447_v45 = vpop.f32.mrb[38].mxu0  ;;  %v1560_v46 = vpop.f32.mrb[70].mxu1 }
 0x5b0   :  { %1758 = vst [vmem:[#allocation25 + $0x1e0] sm:$0xff] %v1444_v35  ;;  %1760 = vst [vmem:[#allocation25 + $0x1f0] sm:$0xff] %v1557_v36  ;;  %v1448_v47 = vadd.f32 %v1447_v45, %v6208_v10  ;;  %v1561_v48 = vadd.f32 %v1560_v46, %v6212_v11  ;;  %v1449_v49 = vpop.f32.mrb[39].mxu0  ;;  %v1562_v50 = vpop.f32.mrb[71].mxu1 }
 0x5b1   :  { %1759 = vst [vmem:[#allocation25 + $0x1e8] sm:$0xff] %v1446_v43  ;;  %1761 = vst [vmem:[#allocation25 + $0x1f8] sm:$0xff] %v1559_v44  ;;  %v1450_v51 = vadd.f32 %v1449_v49, %v6216_v40  ;;  %v1563_v52 = vadd.f32 %v1562_v50, %v6220_v41 }
 0x5b2   :  { %1764 = vst [vmem:[#allocation25 + $0x210] sm:$0xff] %v1448_v47  ;;  %1766 = vst [vmem:[#allocation25 + $0x220] sm:$0xff] %v1561_v48 }
 0x5b3   :  { %1765 = vst [vmem:[#allocation25 + $0x218] sm:$0xff] %v1450_v51  ;;  %1767 = vst [vmem:[#allocation25 + $0x228] sm:$0xff] %v1563_v52 }
 0x5b5   :  { %v1453_v25 = vpop.f32.mrb[40].mxu0  ;;  %v1566_v53 = vpop.f32.mrb[72].mxu1 }
 0x5b6   :  { %v1454_v20 = vadd.f32 %v1453_v25, %v6208_v10  ;;  %v1567_v54 = vadd.f32 %v1566_v53, %v6212_v11  ;;  %v1455_v55 = vpop.f32.mrb[41].mxu0  ;;  %v1568_v58 = vpop.f32.mrb[73].mxu1 }
 0x5b7   :  { %v1456_v59 = vadd.f32 %v1455_v55, %v6216_v40  ;;  %v1569_v60 = vadd.f32 %v1568_v58, %v6220_v41  ;;  %v1457_v61 = vpop.f32.mrb[42].mxu0  ;;  %v1570_v62 = vpop.f32.mrb[74].mxu1 }
 0x5b8   :  { %1770 = vst [vmem:[#allocation25 + $0x240] sm:$0xff] %v1454_v20  ;;  %1772 = vst [vmem:[#allocation25 + $0x250] sm:$0xff] %v1567_v54  ;;  %v1458_v63 = vadd.f32 %v1457_v61, %v6208_v10  ;;  %v1571_v0 = vadd.f32 %v1570_v62, %v6212_v11  ;;  %v1459_v1 = vpop.f32.mrb[43].mxu0  ;;  %v1572_v2 = vpop.f32.mrb[75].mxu1 }
 0x5b9   :  { %1771 = vst [vmem:[#allocation25 + $0x248] sm:$0xff] %v1456_v59  ;;  %1773 = vst [vmem:[#allocation25 + $0x258] sm:$0xff] %v1569_v60  ;;  %v1460_v3 = vadd.f32 %v1459_v1, %v6216_v40  ;;  %v1573_v4 = vadd.f32 %v1572_v2, %v6220_v41 }
 0x5ba   :  { %1776 = vst [vmem:[#allocation25 + $0x270] sm:$0xff] %v1458_v63  ;;  %1778 = vst [vmem:[#allocation25 + $0x280] sm:$0xff] %v1571_v0 }
 0x5bb   :  { %1777 = vst [vmem:[#allocation25 + $0x278] sm:$0xff] %v1460_v3  ;;  %1779 = vst [vmem:[#allocation25 + $0x288] sm:$0xff] %v1573_v4 }
 0x5bd   :  { %v1463_v5 = vpop.f32.mrb[44].mxu0  ;;  %v1576_v7 = vpop.f32.mrb[76].mxu1 }
 0x5be   :  { %v1464_v8 = vadd.f32 %v1463_v5, %v6208_v10  ;;  %v1577_v9 = vadd.f32 %v1576_v7, %v6212_v11  ;;  %v1465_v12 = vpop.f32.mrb[45].mxu0  ;;  %v1578_v13 = vpop.f32.mrb[77].mxu1 }
 0x5bf   :  { %v1466_v15 = vadd.f32 %v1465_v12, %v6216_v40  ;;  %v1579_v6 = vadd.f32 %v1578_v13, %v6220_v41  ;;  %v1467_v16 = vpop.f32.mrb[46].mxu0  ;;  %v1580_v18 = vpop.f32.mrb[78].mxu1 }
 0x5c0   :  { %1782 = vst [vmem:[#allocation25 + $0x2a0] sm:$0xff] %v1464_v8  ;;  %1784 = vst [vmem:[#allocation25 + $0x2b0] sm:$0xff] %v1577_v9  ;;  %v1468_v23 = vadd.f32 %v1467_v16, %v6208_v10  ;;  %v1581_v24 = vadd.f32 %v1580_v18, %v6212_v11  ;;  %v1469_v26 = vpop.f32.mrb[47].mxu0  ;;  %v1582_v27 = vpop.f32.mrb[79].mxu1  ;;  %v6298_v10 = vrot.slane %v6198_v39, %v6286_v19 }
 0x5c1   :  { %1783 = vst [vmem:[#allocation25 + $0x2a8] sm:$0xff] %v1466_v15  ;;  %1785 = vst [vmem:[#allocation25 + $0x2b8] sm:$0xff] %v1579_v6  ;;  %v1470_v28 = vadd.f32 %v1469_v26, %v6216_v40  ;;  %v1583_v29 = vadd.f32 %v1582_v27, %v6220_v41 }
 0x5c2   :  { %1788 = vst [vmem:[#allocation25 + $0x2d0] sm:$0xff] %v1468_v23  ;;  %1790 = vst [vmem:[#allocation25 + $0x2e0] sm:$0xff] %v1581_v24 }
 0x5c3   :  { %1789 = vst [vmem:[#allocation25 + $0x2d8] sm:$0xff] %v1470_v28  ;;  %1791 = vst [vmem:[#allocation25 + $0x2e8] sm:$0xff] %v1583_v29 }
 0x5c5   :  { %v1619_v11 = vpop.f32.mrb[48].mxu0  ;;  %v4867_v30 = vpop.f32.mrb[80].mxu1 }
 0x5c6   :  { %v1620_v31 = vadd.f32 %v1619_v11, %v6294_v21  ;;  %v1621_v32 = vpop.f32.mrb[49].mxu0  ;;  %v1892_v40 = vpop.f32.mrb[81].mxu1 }
 0x5c7   :  { %v1622_v41 = vadd.f32 %v1621_v32, %v6298_v10  ;;  %v1623_v33 = vpop.f32.mrb[50].mxu0  ;;  %v4868_v34 = vpop.f32.mrb[82].mxu1 }
 0x5c8   :  { %1702 = vst [vmem:[#allocation25 + $0x20] sm:$0xff] %v1620_v31  ;;  %v1624_v35 = vadd.f32 %v1623_v33, %v6294_v21  ;;  %v1956_v36 = vpack.c.bf16 %v4868_v34, %v4867_v30  ;;  %v1625_v37 = vpop.f32.mrb[51].mxu0  ;;  %v1895_v42 = vpop.f32.mrb[83].mxu1 }
 0x5c9   :  { %1703 = vst [vmem:[#allocation25 + $0x28] sm:$0xff] %v1622_v41  ;;  %v1626_v39 = vadd.f32 %v1625_v37, %v6298_v10  ;;  %v1955_v43 = vpack.c.bf16 %v1895_v42, %v1892_v40  ;;  %v5355_v37 = vld [vmem:[#allocation5 + $0x10] sm:$0xff]  }
 0x5ca   :  { %1708 = vst [vmem:[#allocation25 + $0x50] sm:$0xff] %v1624_v35 }
 0x5cb   :  { %1709 = vst [vmem:[#allocation25 + $0x58] sm:$0xff] %v1626_v39  ;;  %4881 = vmatprep.subr.bf16.mxu1 %v1955_v43 }
 0x5cc   :  { %4882 = vmatpush3.bf16.msra.mxu1 %v1955_v43 }
 0x5cd   :  { %v1629_v44 = vpop.f32.mrb[52].mxu0  ;;  %v4871_v45 = vpop.f32.mrb[84].mxu1  ;;  %4883 = vmatprep.subr.bf16.mxu1 %v1956_v36 }
 0x5ce   :  { %v1630_v46 = vadd.f32 %v1629_v44, %v6294_v21  ;;  %v1631_v47 = vpop.f32.mrb[53].mxu0  ;;  %v1908_v48 = vpop.f32.mrb[85].mxu1 }
 0x5cf   :  { %v1632_v49 = vadd.f32 %v1631_v47, %v6298_v10  ;;  %v1633_v50 = vpop.f32.mrb[54].mxu0  ;;  %v4872_v51 = vpop.f32.mrb[86].mxu1 }
 0x5d0   :  { %1714 = vst [vmem:[#allocation25 + $0x80] sm:$0xff] %v1630_v46  ;;  %v1634_v52 = vadd.f32 %v1633_v50, %v6294_v21  ;;  %v1958_v25 = vpack.c.bf16 %v4872_v51, %v4871_v45  ;;  %v1635_v53 = vpop.f32.mrb[55].mxu0  ;;  %v1911_v20 = vpop.f32.mrb[87].mxu1  ;;  %4884 = vmatpush3.bf16.msra.mxu1 %v1956_v36  ;;  %v5354_v36 = vld [vmem:[#allocation5 + $0x8] sm:$0xff]   ;;  %v5357_v50 = vld [vmem:[#allocation5 + $0x20] sm:$0xff]  }
 0x5d1   :  { %1715 = vst [vmem:[#allocation25 + $0x88] sm:$0xff] %v1632_v49  ;;  %v1636_v54 = vadd.f32 %v1635_v53, %v6298_v10  ;;  %v1957_v55 = vpack.c.bf16 %v1911_v20, %v1908_v48  ;;  %v5356_v49 = vld [vmem:[#allocation5 + $0x18] sm:$0xff]  }
 0x5d2   :  { %1720 = vst [vmem:[#allocation25 + $0xb0] sm:$0xff] %v1634_v52 }
 0x5d3   :  { %1721 = vst [vmem:[#allocation25 + $0xb8] sm:$0xff] %v1636_v54  ;;  %4885 = vmatprep.subr.bf16.mxu1 %v1957_v55 }
 0x5d4   :  { %4886 = vmatpush3.bf16.msra.mxu1 %v1957_v55 }
 0x5d5   :  { %v1639_v58 = vpop.f32.mrb[56].mxu0  ;;  %v4875_v59 = vpop.f32.mrb[88].mxu1  ;;  %4887 = vmatprep.subr.bf16.mxu1 %v1958_v25 }
 0x5d6   :  { %v1640_v60 = vadd.f32 %v1639_v58, %v6294_v21  ;;  %v1641_v61 = vpop.f32.mrb[57].mxu0  ;;  %v1924_v62 = vpop.f32.mrb[89].mxu1 }
 0x5d7   :  { %v1642_v63 = vadd.f32 %v1641_v61, %v6298_v10  ;;  %v1643_v0 = vpop.f32.mrb[58].mxu0  ;;  %v4876_v1 = vpop.f32.mrb[90].mxu1 }
 0x5d8   :  { %1726 = vst [vmem:[#allocation25 + $0xe0] sm:$0xff] %v1640_v60  ;;  %v1644_v2 = vadd.f32 %v1643_v0, %v6294_v21  ;;  %v1960_v3 = vpack.c.bf16 %v4876_v1, %v4875_v59  ;;  %v1645_v4 = vpop.f32.mrb[59].mxu0  ;;  %v1927_v5 = vpop.f32.mrb[91].mxu1  ;;  %4888 = vmatpush3.bf16.msra.mxu1 %v1958_v25  ;;  %v5358_v59 = vld [vmem:[#allocation5 + $0x28] sm:$0xff]   ;;  %v5359_v60 = vld [vmem:[#allocation5 + $0x30] sm:$0xff]  }
 0x5d9   :  { %1727 = vst [vmem:[#allocation25 + $0xe8] sm:$0xff] %v1642_v63  ;;  %v1646_v7 = vadd.f32 %v1645_v4, %v6298_v10  ;;  %v1959_v8 = vpack.c.bf16 %v1927_v5, %v1924_v62  ;;  %v5360_v5 = vld [vmem:[#allocation5 + $0x38] sm:$0xff]  }
 0x5da   :  { %1732 = vst [vmem:[#allocation25 + $0x110] sm:$0xff] %v1644_v2 }
 0x5db   :  { %1733 = vst [vmem:[#allocation25 + $0x118] sm:$0xff] %v1646_v7  ;;  %4889 = vmatprep.subr.bf16.mxu1 %v1959_v8  ;;  %v5193_v7 = vld [vmem:[#allocation19 + $0x38] sm:$0xff]  }
 0x5dc   :  { %4890 = vmatpush3.bf16.msra.mxu1 %v1959_v8  ;;  %4927 = vmatprep.subr.bf16.mxu0 %v5193_v7  ;;  %v5194_v8 = vld [vmem:[#allocation22] ss:$24 sps:$4 sm:$0xff]  }
 0x5dd   :  { %v1649_v9 = vpop.f32.mrb[60].mxu0  ;;  %v4879_v12 = vpop.f32.mrb[92].mxu1  ;;  %4891 = vmatprep.subr.bf16.mxu1 %v1960_v3  ;;  %4928 = vmatpush3.bf16.msra.mxu0 %v5193_v7 }
 0x5de   :  { %v1650_v13 = vadd.f32 %v1649_v9, %v6294_v21  ;;  %v1651_v15 = vpop.f32.mrb[61].mxu0  ;;  %v1940_v6 = vpop.f32.mrb[93].mxu1  ;;  %v5196_v9 = vld [vmem:[#allocation22 + $0x4] ss:$24 sps:$4 sm:$0xff]  }
 0x5df   :  { %v1652_v16 = vadd.f32 %v1651_v15, %v6298_v10  ;;  %v1653_v18 = vpop.f32.mrb[62].mxu0  ;;  %v4880_v23 = vpop.f32.mrb[94].mxu1  ;;  %v5208_v15 = vld [vmem:[#allocation22 + $0x64] ss:$24 sps:$4 sm:$0xff]  }
 0x5e0   :  { %1738 = vst [vmem:[#allocation25 + $0x140] sm:$0xff] %v1650_v13  ;;  %v1654_v24 = vadd.f32 %v1653_v18, %v6294_v21  ;;  %v1962_v26 = vpack.c.bf16 %v4880_v23, %v4879_v12  ;;  %v1655_v27 = vpop.f32.mrb[63].mxu0  ;;  %v1943_v28 = vpop.f32.mrb[95].mxu1  ;;  %4892 = vmatpush3.bf16.msra.mxu1 %v1960_v3  ;;  %v5199_v12 = vld [vmem:[#allocation22 + $0xc] ss:$24 sps:$4 sm:$0xff]  }
 0x5e1   :  { %1739 = vst [vmem:[#allocation25 + $0x148] sm:$0xff] %v1652_v16  ;;  %v1656_v29 = vadd.f32 %v1655_v27, %v6298_v10  ;;  %v1961_v11 = vpack.c.bf16 %v1943_v28, %v1940_v6  ;;  %v5202_v13 = vld [vmem:[#allocation22 + $0x34] ss:$24 sps:$4 sm:$0xff]   ;;  %2716 = vmatprep.subr.bf16.mxu0 %v5199_v12  ;;  %v5212_v16 = vld [vmem:[#allocation22 + $0x90] ss:$24 sps:$4 sm:$0xff]  }
 0x5e2   :  { %1744 = vst [vmem:[#allocation25 + $0x170] sm:$0xff] %v1654_v24  ;;  %v5214_v6 = vld [vmem:[#allocation22 + $0x94] ss:$24 sps:$4 sm:$0xff]   ;;  %v5220_v18 = vld [vmem:[#allocation22 + $0xc4] ss:$24 sps:$4 sm:$0xff]  }
 0x5e3   :  { %1745 = vst [vmem:[#allocation25 + $0x178] sm:$0xff] %v1656_v29  ;;  %4893 = vmatprep.subr.bf16.mxu1 %v1961_v11  ;;  %v5218_v23 = vld [vmem:[#allocation22 + $0xc0] ss:$24 sps:$4 sm:$0xff]   ;;  %v5226_v24 = vld [vmem:[#allocation22 + $0xf4] ss:$24 sps:$4 sm:$0xff]  }
 0x5e4   :  { %4894 = vmatpush3.bf16.msra.mxu1 %v1961_v11  ;;  %v6333_v27 = vld [vmem:[#allocation14] ss:$0 sm:$0xff] }
 0x5e5   :  { %v1659_v30 = vpop.f32.mrb[64].mxu0  ;;  %4895 = vmatprep.subr.bf16.mxu1 %v1962_v26 }
 0x5e6   :  { %v1660_v31 = vadd.f32 %v1659_v30, %v6294_v21  ;;  %v1661_v32 = vpop.f32.mrb[65].mxu0 }
 0x5e7   :  { %v1662_v40 = vadd.f32 %v1661_v32, %v6298_v10  ;;  %v1663_v41 = vpop.f32.mrb[66].mxu0 }
 0x5e8   :  { %1750 = vst [vmem:[#allocation25 + $0x1a0] sm:$0xff] %v1660_v31  ;;  %v1664_v33 = vadd.f32 %v1663_v41, %v6294_v21  ;;  %v1665_v34 = vpop.f32.mrb[67].mxu0  ;;  %4896 = vmatpush3.bf16.msra.mxu1 %v1962_v26  ;;  %v5224_v26 = vld [vmem:[#allocation22 + $0xf0] ss:$24 sps:$4 sm:$0xff]  }
 0x5e9   :  { %1751 = vst [vmem:[#allocation25 + $0x1a8] sm:$0xff] %v1662_v40  ;;  %v1666_v35 = vadd.f32 %v1665_v34, %v6298_v10  ;;  %2603 = vmatprep.subr.bf16.mxu1 %v5196_v9  ;;  %v5215_v9 = vld [vmem:[#allocation22 + $0x98] ss:$24 sps:$4 sm:$0xff]  }
 0x5ea   :  { %1756 = vst [vmem:[#allocation25 + $0x1d0] sm:$0xff] %v1664_v33 }
 0x5eb   :  { %1757 = vst [vmem:[#allocation25 + $0x1d8] sm:$0xff] %v1666_v35  ;;  %4898 = vmatmul.mubr.bf16.vlgmr.msra.gmra.mrb[96].mxu1 %v5354_v36 }
 0x5ec   :  { %4901 = vmatprep.mubr.bf16.mxu1 %v5355_v37  ;;  %2604 = vmatpush1.bf16.msra.mxu1 %v5194_v8 }
 0x5ed   :  { %v1669_v42 = vpop.f32.mrb[68].mxu0  ;;  %2605 = vmatprep.subr.bf16.mxu1 %v5202_v13  ;;  %v5223_v13 = vld [vmem:[#allocation22 + $0xcc] ss:$24 sps:$4 sm:$0xff]  }
 0x5ee   :  { %v1670_v39 = vadd.f32 %v1669_v42, %v6294_v21  ;;  %v1671_v43 = vpop.f32.mrb[69].mxu0 }
 0x5ef   :  { %v1672_v44 = vadd.f32 %v1671_v43, %v6298_v10  ;;  %v1673_v45 = vpop.f32.mrb[70].mxu0  ;;  %v5197_v43 = vld [vmem:[#allocation22 + $0x8] ss:$24 sps:$4 sm:$0xff]  }
 0x5f0   :  { %1762 = vst [vmem:[#allocation25 + $0x200] sm:$0xff] %v1670_v39  ;;  %v1674_v46 = vadd.f32 %v1673_v45, %v6294_v21  ;;  %v1675_v47 = vpop.f32.mrb[71].mxu0 }
 0x5f1   :  { %1763 = vst [vmem:[#allocation25 + $0x208] sm:$0xff] %v1672_v44  ;;  %v1676_v48 = vadd.f32 %v1675_v47, %v6298_v10 }
 0x5f2   :  { %1768 = vst [vmem:[#allocation25 + $0x230] sm:$0xff] %v1674_v46  ;;  %v5205_v46 = vld [vmem:[#allocation22 + $0x3c] ss:$24 sps:$4 sm:$0xff]  }
 0x5f3   :  { %1769 = vst [vmem:[#allocation25 + $0x238] sm:$0xff] %v1676_v48  ;;  %4902 = vmatmul.mubr.bf16.gmra.mrb[100].mxu1 %v5356_v49 }
 0x5f4   :  { %4905 = vmatprep.mubr.bf16.mxu1 %v5357_v50 }
 0x5f5   :  { %v1679_v51 = vpop.f32.mrb[72].mxu0 }
 0x5f6   :  { %v1680_v52 = vadd.f32 %v1679_v51, %v6294_v21  ;;  %v1681_v25 = vpop.f32.mrb[73].mxu0 }
 0x5f7   :  { %v1682_v53 = vadd.f32 %v1681_v25, %v6298_v10  ;;  %v1683_v20 = vpop.f32.mrb[74].mxu0 }
 0x5f8   :  { %1774 = vst [vmem:[#allocation25 + $0x260] sm:$0xff] %v1680_v52  ;;  %v1684_v54 = vadd.f32 %v1683_v20, %v6294_v21  ;;  %v1685_v55 = vpop.f32.mrb[75].mxu0 }
 0x5f9   :  { %1775 = vst [vmem:[#allocation25 + $0x268] sm:$0xff] %v1682_v53  ;;  %v1686_v58 = vadd.f32 %v1685_v55, %v6298_v10  ;;  %v5203_v53 = vld [vmem:[#allocation22 + $0x38] ss:$24 sps:$4 sm:$0xff]  }
 0x5fa   :  { %1780 = vst [vmem:[#allocation25 + $0x290] sm:$0xff] %v1684_v54  ;;  %v5211_v54 = vld [vmem:[#allocation22 + $0x6c] ss:$24 sps:$4 sm:$0xff]  }
 0x5fb   :  { %1781 = vst [vmem:[#allocation25 + $0x298] sm:$0xff] %v1686_v58  ;;  %4906 = vmatmul.mubr.bf16.gmra.mrb[104].mxu1 %v5358_v59 }
 0x5fc   :  { %4909 = vmatprep.mubr.bf16.mxu1 %v5359_v60 }
 0x5fd   :  { %v1689_v61 = vpop.f32.mrb[76].mxu0 }
 0x5fe   :  { %v1690_v62 = vadd.f32 %v1689_v61, %v6294_v21  ;;  %v1691_v63 = vpop.f32.mrb[77].mxu0  ;;  %v5209_v61 = vld [vmem:[#allocation22 + $0x68] ss:$24 sps:$4 sm:$0xff]  }
 0x5ff   :  { %v1692_v0 = vadd.f32 %v1691_v63, %v6298_v10  ;;  %v1693_v1 = vpop.f32.mrb[78].mxu0 }
 0x600   :  { %1786 = vst [vmem:[#allocation25 + $0x2c0] sm:$0xff] %v1690_v62  ;;  %v1694_v2 = vadd.f32 %v1693_v1, %v6294_v21  ;;  %v1695_v3 = vpop.f32.mrb[79].mxu0  ;;  %v5200_v21 = vld [vmem:[#allocation22 + $0x30] ss:$24 sps:$4 sm:$0xff]  }
 0x601   :  { %1787 = vst [vmem:[#allocation25 + $0x2c8] sm:$0xff] %v1692_v0  ;;  %v1696_v4 = vadd.f32 %v1695_v3, %v6298_v10  ;;  %2606 = vmatpush1.bf16.msra.mxu1 %v5200_v21  ;;  %v5206_v10 = vld [vmem:[#allocation22 + $0x60] ss:$24 sps:$4 sm:$0xff]   ;;  %v5217_v0 = vld [vmem:[#allocation22 + $0x9c] ss:$24 sps:$4 sm:$0xff]  }
 0x602   :  { %1792 = vst [vmem:[#allocation25 + $0x2f0] sm:$0xff] %v1694_v2  ;;  %2607 = vmatprep.subr.bf16.mxu1 %v5208_v15 }
 0x603   :  { %1793 = vst [vmem:[#allocation25 + $0x2f8] sm:$0xff] %v1696_v4  ;;  %4910 = vmatmul.mubr.bf16.gmra.mrb[108].mxu1 %v5360_v5 }
 0x604   :  { %2635 = vmatprep.mubr.bf16.mxu1 %v5759_v22 }
 0x605   :  { %2608 = vmatpush1.bf16.msra.mxu1 %v5206_v10 }
 0x606   :  { %2609 = vmatprep.subr.bf16.mxu1 %v5214_v6 }
 0x609   :  { %2610 = vmatpush1.bf16.msra.mxu1 %v5212_v16  ;;  %v5221_v16 = vld [vmem:[#allocation22 + $0xc8] ss:$24 sps:$4 sm:$0xff]  }
 0x60a   :  { %2611 = vmatprep.subr.bf16.mxu1 %v5220_v18 }
 0x60d   :  { %2612 = vmatpush1.bf16.msra.mxu1 %v5218_v23 }
 0x60e   :  { %2613 = vmatprep.subr.bf16.mxu1 %v5226_v24  ;;  %v5229_v24 = vld [vmem:[#allocation22 + $0xfc] ss:$24 sps:$4 sm:$0xff]  }
 0x611   :  { %2614 = vmatpush1.bf16.msra.mxu1 %v5224_v26 }
 0x6be   :  { %v4899_v28 = vpop.f32.mrb[96].mxu1 }
 0x6bf   :  { %v2013_v29 = vadd.f32 %v4899_v28, %v6333_v27  ;;  %v2004_v11 = vpop.f32.mrb[97].mxu1 }
 0x6c0   :  { %v2005_v30 = vadd.f32 %v6333_v27, %v2004_v11  ;;  %v4900_v31 = vpop.f32.mrb[98].mxu1 }
 0x6c1   :  { %v2016_v32 = vadd.f32 %v4900_v31, %v6333_v27  ;;  %v2007_v40 = vpop.f32.mrb[99].mxu1  ;;  %v2069_v33 = vmax.f32 %v2013_v29, 0.0 }
 0x6c2   :  { %v2008_v41 = vadd.f32 %v6333_v27, %v2007_v40  ;;  %v2067_v35 = vmax.f32 %v2005_v30, 0.0  ;;  %v5227_v40 = vld [vmem:[#allocation22 + $0xf8] ss:$24 sps:$4 sm:$0xff]  }
 0x6c3   :  { %v2070_v34 = vmax.f32 %v2016_v32, 0.0 }
 0x6c4   :  { %v2068_v36 = vmax.f32 %v2008_v41, 0.0 }
 0x6c5   :  { %v6339_v37 = vpack.c.bf16 %v2070_v34, %v2069_v33 }
 0x6c6   :  { %v6341_v42 = vpack.c.bf16 %v2068_v36, %v2067_v35  ;;  %v4903_v39 = vpop.f32.mrb[100].mxu1  ;;  %v5232_v36 = vld [vmem:[#allocation22 + $0x124] ss:$24 sps:$4 sm:$0xff]  }
 0x6c7   :  { %v2029_v44 = vadd.f32 %v4903_v39, %v6333_v27  ;;  %v2020_v45 = vpop.f32.mrb[101].mxu1  ;;  %v5235_v39 = vld [vmem:[#allocation22 + $0x12c] ss:$24 sps:$4 sm:$0xff]   ;;  %2615 = vmatprep.subr.bf16.mxu1 %v5232_v36  ;;  %v5253_v36 = vld [vmem:[#allocation22 + $0x70] ss:$24 sps:$4 sm:$0xff]  }
 0x6c8   :  { %v2021_v47 = vadd.f32 %v6333_v27, %v2020_v45  ;;  %4929 = vmatprep.mubr.bf16.mxu0 %v6341_v42  ;;  %v4904_v48 = vpop.f32.mrb[102].mxu1  ;;  %v5241_v45 = vld [vmem:[#allocation22 + $0x15c] ss:$24 sps:$4 sm:$0xff]  }
 0x6c9   :  { %v2073_v49 = vmax.f32 %v2029_v44, 0.0  ;;  %v2032_v50 = vadd.f32 %v4904_v48, %v6333_v27  ;;  %4930 = vmatmul.mubr.bf16.vlgmr.msra.gmra.mrb[80].mxu0 %v6339_v37  ;;  %v2023_v51 = vpop.f32.mrb[103].mxu1  ;;  %v5238_v44 = vld [vmem:[#allocation22 + $0x154] ss:$24 sps:$4 sm:$0xff]   ;;  %v5242_v48 = vld [vmem:[#allocation16] sm:$0xff]  }
 0x6ca   :  { %v2071_v52 = vmax.f32 %v2021_v47, 0.0  ;;  %v2024_v25 = vadd.f32 %v6333_v27, %v2023_v51  ;;  %2717 = vmatpush1.bf16.msra.mxu0 %v5197_v43  ;;  %v5230_v43 = vld [vmem:[#allocation22 + $0x120] ss:$24 sps:$4 sm:$0xff]  }
 0x6cb   :  { %v2074_v20 = vmax.f32 %v2032_v50, 0.0  ;;  %2718 = vmatprep.subr.bf16.mxu0 %v5205_v46  ;;  %2616 = vmatpush1.bf16.msra.mxu1 %v5230_v43  ;;  %v5236_v46 = vld [vmem:[#allocation22 + $0x150] ss:$24 sps:$4 sm:$0xff]   ;;  %v6376_v50 = vld [vmem:[#allocation20] ss:$0 sm:$0xff] }
 0x6cc   :  { %v2072_v55 = vmax.f32 %v2024_v25, 0.0  ;;  %v5239_v47 = vld [vmem:[#allocation22 + $0x158] ss:$24 sps:$4 sm:$0xff]   ;;  %2617 = vmatprep.subr.bf16.mxu1 %v5238_v44 }
 0x6cd   :  { %v6349_v58 = vpack.c.bf16 %v2074_v20, %v2073_v49  ;;  %v5248_v49 = vld [vmem:[#allocation22 + $0x14] ss:$24 sps:$4 sm:$0xff]  }
 0x6ce   :  { %v6351_v59 = vpack.c.bf16 %v2072_v55, %v2071_v52  ;;  %v4907_v60 = vpop.f32.mrb[104].mxu1  ;;  %2719 = vmatpush1.bf16.msra.mxu0 %v5203_v53 }
 0x6cf   :  { %v2045_v62 = vadd.f32 %v4907_v60, %v6333_v27  ;;  %v2036_v63 = vpop.f32.mrb[105].mxu1  ;;  %2720 = vmatprep.subr.bf16.mxu0 %v5211_v54  ;;  %2618 = vmatpush1.bf16.msra.mxu1 %v5236_v46 }
 0x6d0   :  { %4933 = vmatprep.mubr.bf16.mxu0 %v6351_v59  ;;  %v2037_v1 = vadd.f32 %v6333_v27, %v2036_v63  ;;  %v4908_v2 = vpop.f32.mrb[106].mxu1  ;;  %2829 = vmatprep.subr.bf16.mxu1 %v5248_v49 }
 0x6d1   :  { %4934 = vmatmul.mubr.bf16.gmra.mrb[84].mxu0 %v6349_v58  ;;  %v2077_v3 = vmax.f32 %v2045_v62, 0.0  ;;  %v2048_v4 = vadd.f32 %v4908_v2, %v6333_v27  ;;  %v2039_v5 = vpop.f32.mrb[107].mxu1 }
 0x6d2   :  { %v2075_v7 = vmax.f32 %v2037_v1, 0.0  ;;  %v2040_v8 = vadd.f32 %v6333_v27, %v2039_v5  ;;  %2721 = vmatpush1.bf16.msra.mxu0 %v5209_v61 }
 0x6d3   :  { %v2078_v12 = vmax.f32 %v2048_v4, 0.0  ;;  %2722 = vmatprep.subr.bf16.mxu0 %v5217_v0  ;;  %v5243_v4 = vld [vmem:[#allocation16 + $0x8] sm:$0xff]  }
 0x6d4   :  { %v2076_v21 = vmax.f32 %v2040_v8, 0.0  ;;  %v5246_v8 = vld [vmem:[#allocation22 + $0x10] ss:$24 sps:$4 sm:$0xff]  }
 0x6d5   :  { %v6359_v15 = vpack.c.bf16 %v2078_v12, %v2077_v3 }
 0x6d6   :  { %v6361_v10 = vpack.c.bf16 %v2076_v21, %v2075_v7  ;;  %v4911_v6 = vpop.f32.mrb[108].mxu1  ;;  %2723 = vmatpush1.bf16.msra.mxu0 %v5215_v9 }
 0x6d7   :  { %v2061_v18 = vadd.f32 %v4911_v6, %v6333_v27  ;;  %v2052_v23 = vpop.f32.mrb[109].mxu1  ;;  %2724 = vmatprep.subr.bf16.mxu0 %v5223_v13  ;;  %v5252_v13 = vld [vmem:[#allocation22 + $0x44] ss:$24 sps:$4 sm:$0xff]  }
 0x6d8   :  { %4937 = vmatprep.mubr.bf16.mxu0 %v6361_v10  ;;  %v2053_v26 = vadd.f32 %v6333_v27, %v2052_v23  ;;  %v4912_v28 = vpop.f32.mrb[110].mxu1 }
 0x6d9   :  { %4938 = vmatmul.mubr.bf16.gmra.mrb[88].mxu0 %v6359_v15  ;;  %v2081_v29 = vmax.f32 %v2061_v18, 0.0  ;;  %v2064_v11 = vadd.f32 %v4912_v28, %v6333_v27  ;;  %v2055_v30 = vpop.f32.mrb[111].mxu1  ;;  %v5250_v28 = vld [vmem:[#allocation22 + $0x40] ss:$24 sps:$4 sm:$0xff]  }
 0x6da   :  { %v2079_v31 = vmax.f32 %v2053_v26, 0.0  ;;  %v2056_v32 = vadd.f32 %v6333_v27, %v2055_v30  ;;  %2725 = vmatpush1.bf16.msra.mxu0 %v5221_v16  ;;  %v5233_v27 = vld [vmem:[#allocation22 + $0x128] ss:$24 sps:$4 sm:$0xff]  }
 0x6db   :  { %v2082_v41 = vmax.f32 %v2064_v11, 0.0  ;;  %2726 = vmatprep.subr.bf16.mxu0 %v5229_v24  ;;  %v5244_v24 = vld [vmem:[#allocation16 + $0x10] sm:$0xff]  }
 0x6dc   :  { %v2080_v33 = vmax.f32 %v2056_v32, 0.0  ;;  %v5255_v32 = vld [vmem:[#allocation22 + $0x74] ss:$24 sps:$4 sm:$0xff]  }
 0x6dd   :  { %v6369_v34 = vpack.c.bf16 %v2082_v41, %v2081_v29 }
 0x6de   :  { %v6371_v35 = vpack.c.bf16 %v2080_v33, %v2079_v31  ;;  %2727 = vmatpush1.bf16.msra.mxu0 %v5227_v40  ;;  %v5245_v33 = vld [vmem:[#allocation16 + $0x18] sm:$0xff]  }
 0x6df   :  { %2728 = vmatprep.subr.bf16.mxu0 %v5235_v39 }
 0x6e0   :  { %4941 = vmatprep.mubr.bf16.mxu0 %v6371_v35 }
 0x6e1   :  { %4942 = vmatmul.mubr.bf16.gmra.mrb[92].mxu0 %v6369_v34 }
 0x6e2   :  { %2748 = vmatprep.mubr.bf16.mxu0 %v5759_v22  ;;  %2729 = vmatpush1.bf16.msra.mxu0 %v5233_v27  ;;  %v5259_v27 = vld [vmem:[#allocation22 + $0xa4] ss:$24 sps:$4 sm:$0xff]  }
 0x6e3   :  { %2730 = vmatprep.subr.bf16.mxu0 %v5241_v45 }
 0x6e6   :  { %2731 = vmatpush1.bf16.msra.mxu0 %v5239_v47 }
 0x6e7   :  { %4945 = vmatprep.subr.bf16.mxu0 %v5242_v48 }
 0x79c   :  { %v4931_v51 = vpop.f32.mrb[80].mxu0 }
 0x79d   :  { %v2205_v52 = vadd.f32 %v4931_v51, %v6376_v50  ;;  %v2196_v25 = vpop.f32.mrb[81].mxu0  ;;  %v5249_v51 = vld [vmem:[#allocation16 + $0x20] sm:$0xff]  }
 0x79e   :  { %v2197_v53 = vadd.f32 %v6376_v50, %v2196_v25  ;;  %v4932_v20 = vpop.f32.mrb[82].mxu0 }
 0x79f   :  { %v2208_v54 = vadd.f32 %v4932_v20, %v6376_v50  ;;  %v2199_v55 = vpop.f32.mrb[83].mxu0  ;;  %v2261_v61 = vmax.f32 %v2205_v52, 0.0  ;;  %v5257_v52 = vld [vmem:[#allocation22 + $0xa0] ss:$24 sps:$4 sm:$0xff]  }
 0x7a0   :  { %v2200_v60 = vadd.f32 %v6376_v50, %v2199_v55  ;;  %v2259_v63 = vmax.f32 %v2197_v53, 0.0  ;;  %v5262_v55 = vld [vmem:[#allocation22 + $0xd4] ss:$24 sps:$4 sm:$0xff]  }
 0x7a1   :  { %v2262_v62 = vmax.f32 %v2208_v54, 0.0 }
 0x7a2   :  { %v2260_v0 = vmax.f32 %v2200_v60, 0.0 }
 0x7a3   :  { %v6382_v1 = vpack.c.bf16 %v2262_v62, %v2261_v61  ;;  %v5256_v62 = vld [vmem:[#allocation16 + $0x28] sm:$0xff]  }
 0x7a4   :  { %v6384_v2 = vpack.c.bf16 %v2260_v0, %v2259_v63  ;;  %v4935_v3 = vpop.f32.mrb[84].mxu0  ;;  %v5260_v63 = vld [vmem:[#allocation22 + $0xd0] ss:$24 sps:$4 sm:$0xff]  }
 0x7a5   :  { %v2221_v5 = vadd.f32 %v4935_v3, %v6376_v50  ;;  %v2212_v7 = vpop.f32.mrb[85].mxu0 }
 0x7a6   :  { %v2213_v9 = vadd.f32 %v6376_v50, %v2212_v7  ;;  %2636 = vmatmul.mubr.bf16.vlgmr.msra.gmra.mrb[112].mxu1 %v6384_v2  ;;  %2749 = vmatmul.mubr.bf16.vlgmr.msra.gmra.mrb[96].mxu0 %v6384_v2  ;;  %v4936_v12 = vpop.f32.mrb[86].mxu0 }
 0x7a7   :  { %v2265_v21 = vmax.f32 %v2221_v5, 0.0  ;;  %v2224_v6 = vadd.f32 %v4936_v12, %v6376_v50  ;;  %4946 = vmatpush3.bf16.msra.mxu0 %v5242_v48  ;;  %v2215_v16 = vpop.f32.mrb[87].mxu0  ;;  %2645 = vmatprep.mubr.bf16.mxu1 %v5759_v22 }
 0x7a8   :  { %v2263_v18 = vmax.f32 %v2213_v9, 0.0  ;;  %v2216_v23 = vadd.f32 %v6376_v50, %v2215_v16  ;;  %2758 = vmatprep.mubr.bf16.mxu0 %v5759_v22  ;;  %4947 = vmatprep.subr.bf16.mxu0 %v5243_v4 }
 0x7a9   :  { %v2266_v26 = vmax.f32 %v2224_v6, 0.0  ;;  %2830 = vmatpush1.bf16.msra.mxu1 %v5246_v8  ;;  %v5264_v6 = vld [vmem:[#allocation22 + $0x100] ss:$24 sps:$4 sm:$0xff]  }
 0x7aa   :  { %v2264_v29 = vmax.f32 %v2216_v23, 0.0  ;;  %2831 = vmatprep.subr.bf16.mxu1 %v5252_v13 }
 0x7ab   :  { %v6394_v11 = vpack.c.bf16 %v2266_v26, %v2265_v21  ;;  %4948 = vmatpush3.bf16.msra.mxu0 %v5243_v4  ;;  %v5266_v4 = vld [vmem:[#allocation22 + $0x104] ss:$24 sps:$4 sm:$0xff]   ;;  %v5263_v21 = vld [vmem:[#allocation16 + $0x30] sm:$0xff]  }
 0x7ac   :  { %v6396_v30 = vpack.c.bf16 %v2264_v29, %v2263_v18  ;;  %v4939_v31 = vpop.f32.mrb[88].mxu0  ;;  %4949 = vmatprep.subr.bf16.mxu0 %v5244_v24  ;;  %v5267_v26 = vld [vmem:[#allocation22 + $0x130] ss:$24 sps:$4 sm:$0xff]   ;;  %v5271_v29 = vld [vmem:[#allocation22 + $0x160] ss:$24 sps:$4 sm:$0xff]  }
 0x7ad   :  { %v2237_v40 = vadd.f32 %v4939_v31, %v6376_v50  ;;  %v2228_v41 = vpop.f32.mrb[89].mxu0  ;;  %2832 = vmatpush1.bf16.msra.mxu1 %v5250_v28  ;;  %v5270_v28 = vld [vmem:[#allocation16 + $0x38] sm:$0xff]  }
 0x7ae   :  { %2646 = vmatmul.mubr.bf16.gmra.mrb[116].mxu1 %v6382_v1  ;;  %2759 = vmatmul.mubr.bf16.gmra.mrb[100].mxu0 %v6382_v1  ;;  %v2229_v39 = vadd.f32 %v6376_v50, %v2228_v41  ;;  %v4940_v43 = vpop.f32.mrb[90].mxu0 }
 0x7af   :  { %v2269_v44 = vmax.f32 %v2237_v40, 0.0  ;;  %2655 = vmatprep.mubr.bf16.mxu1 %v5759_v22  ;;  %2768 = vmatprep.mubr.bf16.mxu0 %v5759_v22  ;;  %v2240_v45 = vadd.f32 %v4940_v43, %v6376_v50  ;;  %v2231_v46 = vpop.f32.mrb[91].mxu0 }
 0x7b0   :  { %v2267_v47 = vmax.f32 %v2229_v39, 0.0  ;;  %4950 = vmatpush3.bf16.msra.mxu0 %v5244_v24  ;;  %v2232_v48 = vadd.f32 %v6376_v50, %v2231_v46  ;;  %2833 = vmatprep.subr.bf16.mxu1 %v5255_v32  ;;  %v5269_v24 = vld [vmem:[#allocation22 + $0x134] ss:$24 sps:$4 sm:$0xff]  }
 0x7b1   :  { %v2270_v49 = vmax.f32 %v2240_v45, 0.0  ;;  %4951 = vmatprep.subr.bf16.mxu0 %v5245_v33  ;;  %2834 = vmatpush1.bf16.msra.mxu1 %v5253_v36  ;;  %v5276_v39 = vld [vmem:[#allocation19 + $0x10] sm:$0xff]  }
 0x7b2   :  { %v2268_v25 = vmax.f32 %v2232_v48, 0.0  ;;  %2835 = vmatprep.subr.bf16.mxu1 %v5259_v27  ;;  %v5277_v48 = vld [vmem:[#allocation19 + $0x18] sm:$0xff]  }
 0x7b3   :  { %v6406_v53 = vpack.c.bf16 %v2270_v49, %v2269_v44 }
 0x7b4   :  { %v6408_v20 = vpack.c.bf16 %v2268_v25, %v2267_v47  ;;  %4952 = vmatpush3.bf16.msra.mxu0 %v5245_v33  ;;  %v4943_v54 = vpop.f32.mrb[92].mxu0 }
 0x7b5   :  { %v2253_v60 = vadd.f32 %v4943_v54, %v6376_v50  ;;  %v2244_v61 = vpop.f32.mrb[93].mxu0  ;;  %4953 = vmatprep.subr.bf16.mxu0 %v5249_v51  ;;  %2836 = vmatpush1.bf16.msra.mxu1 %v5257_v52 }
 0x7b6   :  { %2656 = vmatmul.mubr.bf16.gmra.mrb[120].mxu1 %v6396_v30  ;;  %2769 = vmatmul.mubr.bf16.gmra.mrb[104].mxu0 %v6396_v30  ;;  %v2245_v0 = vadd.f32 %v6376_v50, %v2244_v61  ;;  %v4944_v3 = vpop.f32.mrb[94].mxu0 }
 0x7b7   :  { %2665 = vmatprep.mubr.bf16.mxu1 %v5759_v22  ;;  %2778 = vmatprep.mubr.bf16.mxu0 %v5759_v22  ;;  %v2273_v5 = vmax.f32 %v2253_v60, 0.0  ;;  %v2256_v7 = vadd.f32 %v4944_v3, %v6376_v50  ;;  %v2247_v8 = vpop.f32.mrb[95].mxu0 }
 0x7b8   :  { %v2271_v9 = vmax.f32 %v2245_v0, 0.0  ;;  %4954 = vmatpush3.bf16.msra.mxu0 %v5249_v51  ;;  %v2248_v12 = vadd.f32 %v6376_v50, %v2247_v8  ;;  %2837 = vmatprep.subr.bf16.mxu1 %v5262_v55  ;;  %v5273_v50 = vld [vmem:[#allocation22 + $0x164] ss:$24 sps:$4 sm:$0xff]  }
 0x7b9   :  { %v2274_v13 = vmax.f32 %v2256_v7, 0.0  ;;  %4955 = vmatprep.subr.bf16.mxu0 %v5256_v62  ;;  %2838 = vmatpush1.bf16.msra.mxu1 %v5260_v63  ;;  %v5279_v8 = vld [vmem:[#allocation19 + $0x28] sm:$0xff]  }
 0x7ba   :  { %v2272_v16 = vmax.f32 %v2248_v12, 0.0  ;;  %2839 = vmatprep.subr.bf16.mxu1 %v5266_v4 }
 0x7bb   :  { %v2282_v18 = vpack.c.bf16 %v2274_v13, %v2273_v5 }
 0x7bc   :  { %v2281_v23 = vpack.c.bf16 %v2272_v16, %v2271_v9  ;;  %4956 = vmatpush3.bf16.msra.mxu0 %v5256_v62  ;;  %v5278_v62 = vld [vmem:[#allocation19 + $0x20] sm:$0xff]  }
 0x7bd   :  { %4957 = vmatprep.subr.bf16.mxu0 %v5263_v21  ;;  %2840 = vmatpush1.bf16.msra.mxu1 %v5264_v6 }
 0x7be   :  { %2666 = vmatmul.mubr.bf16.gmra.mrb[124].mxu1 %v6394_v11  ;;  %2779 = vmatmul.mubr.bf16.gmra.mrb[108].mxu0 %v6394_v11 }
 0x7bf   :  { %2675 = vmatprep.mubr.bf16.mxu1 %v5759_v22  ;;  %2788 = vmatprep.mubr.bf16.mxu0 %v5759_v22 }
 0x7c0   :  { %4958 = vmatpush3.bf16.msra.mxu0 %v5263_v21  ;;  %2841 = vmatprep.subr.bf16.mxu1 %v5269_v24 }
 0x7c1   :  { %4959 = vmatprep.subr.bf16.mxu0 %v5270_v28  ;;  %2842 = vmatpush1.bf16.msra.mxu1 %v5267_v26 }
 0x7c2   :  { %2843 = vmatprep.subr.bf16.mxu1 %v5273_v50 }
 0x7c4   :  { %4960 = vmatpush3.bf16.msra.mxu0 %v5270_v28  ;;  %v5280_v28 = vld [vmem:[#allocation19 + $0x30] sm:$0xff]  }
 0x7c5   :  { %2844 = vmatpush1.bf16.msra.mxu1 %v5271_v29 }
 0x7c6   :  { %2676 = vmatmul.mubr.bf16.gmra.mrb[128].mxu1 %v6408_v20  ;;  %2789 = vmatmul.mubr.bf16.gmra.mrb[112].mxu0 %v6408_v20 }
 0x7c7   :  { %2685 = vmatprep.mubr.bf16.mxu1 %v5759_v22  ;;  %2798 = vmatprep.mubr.bf16.mxu0 %v5759_v22 }
 0x7ce   :  { %2686 = vmatmul.mubr.bf16.gmra.mrb[132].mxu1 %v6406_v53  ;;  %2799 = vmatmul.mubr.bf16.gmra.mrb[116].mxu0 %v6406_v53 }
 0x7cf   :  { %2695 = vmatprep.mubr.bf16.mxu1 %v5759_v22  ;;  %2808 = vmatprep.mubr.bf16.mxu0 %v5759_v22 }
 0x7d6   :  { %2696 = vmatmul.mubr.bf16.gmra.mrb[136].mxu1 %v2281_v23  ;;  %2809 = vmatmul.mubr.bf16.gmra.mrb[120].mxu0 %v2281_v23 }
 0x7d7   :  { %2705 = vmatprep.mubr.bf16.mxu1 %v5759_v22  ;;  %2818 = vmatprep.mubr.bf16.mxu0 %v5759_v22 }
 0x7de   :  { %2706 = vmatmul.mubr.bf16.gmra.mrb[140].mxu1 %v2282_v18  ;;  %2819 = vmatmul.mubr.bf16.gmra.mrb[124].mxu0 %v2282_v18 }
 0x7df   :  { %4961 = vmatprep.mubr.bf16.mxu0 %v6341_v42  ;;  %2861 = vmatprep.mubr.bf16.mxu1 %v5759_v22  ;;  %v6454_v42 = vld [vmem:[#allocation23] sm:$0x3f] }
 0x7e6   :  { %2862 = vmatmul.mubr.bf16.vlgmr.msra.gmra.mrb[144].mxu1 %v6384_v2  ;;  %4962 = vmatmul.mubr.bf16.vlgmr.msra.gmra.mrb[128].mxu0 %v6339_v37  ;;  %v5361_v37 = vld [vmem:[#allocation5] sm:$0xff]  }
 0x7e7   :  { %4965 = vmatprep.mubr.bf16.mxu0 %v6351_v59  ;;  %2871 = vmatprep.mubr.bf16.mxu1 %v5759_v22  ;;  %v6462_v59 = vrot.slane %v6454_v42, %v6196_v17 }
 0x7ee   :  { %2872 = vmatmul.mubr.bf16.gmra.mrb[148].mxu1 %v6382_v1  ;;  %4966 = vmatmul.mubr.bf16.gmra.mrb[132].mxu0 %v6349_v58  ;;  %v6458_v58 = vrot.slane %v6454_v42, %v6193_v38 }
 0x7ef   :  { %4969 = vmatprep.mubr.bf16.mxu0 %v6361_v10  ;;  %2881 = vmatprep.mubr.bf16.mxu1 %v5759_v22  ;;  %v6470_v10 = vrot.slane %v6454_v42, %v6204_v57 }
 0x7f6   :  { %2882 = vmatmul.mubr.bf16.gmra.mrb[152].mxu1 %v6396_v30  ;;  %4970 = vmatmul.mubr.bf16.gmra.mrb[136].mxu0 %v6359_v15  ;;  %v6466_v15 = vrot.slane %v6454_v42, %v6201_v56 }
 0x7f7   :  { %4973 = vmatprep.mubr.bf16.mxu0 %v6371_v35  ;;  %2891 = vmatprep.mubr.bf16.mxu1 %v5759_v22  ;;  %v5275_v35 = vld [vmem:[#allocation19 + $0x8] sm:$0xff]  }
 0x7fe   :  { %2892 = vmatmul.mubr.bf16.gmra.mrb[156].mxu1 %v6394_v11  ;;  %4974 = vmatmul.mubr.bf16.gmra.mrb[140].mxu0 %v6369_v34  ;;  %v5274_v34 = vld [vmem:[#allocation19] sm:$0xff]  }
 0x7ff   :  { %2901 = vmatprep.mubr.bf16.mxu1 %v5759_v22  ;;  %4993 = vmatprep.mubr.bf16.mxu0 %v5361_v37 }
 0x800   :  { %5009 = vmatprep.subr.bf16.mxu1 %v5274_v34 }
 0x801   :  { %5010 = vmatpush3.bf16.msra.mxu1 %v5274_v34 }
 0x802   :  { %5011 = vmatprep.subr.bf16.mxu1 %v5275_v35 }
 0x805   :  { %5012 = vmatpush3.bf16.msra.mxu1 %v5275_v35 }
 0x806   :  { %2902 = vmatmul.mubr.bf16.gmra.mrb[160].mxu1 %v6408_v20  ;;  %5013 = vmatprep.subr.bf16.mxu1 %v5276_v39 }
 0x807   :  { %2911 = vmatprep.mubr.bf16.mxu1 %v5759_v22 }
 0x809   :  { %5014 = vmatpush3.bf16.msra.mxu1 %v5276_v39 }
 0x80a   :  { %5015 = vmatprep.subr.bf16.mxu1 %v5277_v48 }
 0x80d   :  { %5016 = vmatpush3.bf16.msra.mxu1 %v5277_v48 }
 0x80e   :  { %2912 = vmatmul.mubr.bf16.gmra.mrb[164].mxu1 %v6406_v53  ;;  %5017 = vmatprep.subr.bf16.mxu1 %v5278_v62 }
 0x80f   :  { %2921 = vmatprep.mubr.bf16.mxu1 %v5759_v22 }
 0x811   :  { %5018 = vmatpush3.bf16.msra.mxu1 %v5278_v62 }
 0x812   :  { %5019 = vmatprep.subr.bf16.mxu1 %v5279_v8 }
 0x815   :  { %5020 = vmatpush3.bf16.msra.mxu1 %v5279_v8 }
 0x816   :  { %2922 = vmatmul.mubr.bf16.gmra.mrb[168].mxu1 %v2281_v23  ;;  %5021 = vmatprep.subr.bf16.mxu1 %v5280_v28 }
 0x817   :  { %2931 = vmatprep.mubr.bf16.mxu1 %v5759_v22 }
 0x819   :  { %5022 = vmatpush3.bf16.msra.mxu1 %v5280_v28 }
 0x81e   :  { %2932 = vmatmul.mubr.bf16.gmra.mrb[172].mxu1 %v2282_v18 }
 0x879   :  { %v2637_v1 = vpop.f32.mrb[112].mxu1  ;;  %v2750_v2 = vpop.f32.mrb[96].mxu0 }
 0x87a   :  { %v2638_v11 = vadd.f32 %v2637_v1, %v6458_v58  ;;  %v2751_v30 = vadd.f32 %v2750_v2, %v6462_v59  ;;  %v2639_v31 = vpop.f32.mrb[113].mxu1  ;;  %v2752_v32 = vpop.f32.mrb[97].mxu0 }
 0x87b   :  { %v2640_v40 = vadd.f32 %v2639_v31, %v6466_v15  ;;  %v2753_v41 = vadd.f32 %v2752_v32, %v6470_v10  ;;  %v2641_v33 = vpop.f32.mrb[114].mxu1  ;;  %v2754_v36 = vpop.f32.mrb[98].mxu0 }
 0x87c   :  { %2942 = vst [vmem:[#allocation25 + $0x300] sm:$0xff] %v2638_v11  ;;  %2944 = vst [vmem:[#allocation25 + $0x310] sm:$0xff] %v2751_v30  ;;  %v2642_v43 = vadd.f32 %v2641_v33, %v6458_v58  ;;  %v2755_v27 = vadd.f32 %v2754_v36, %v6462_v59  ;;  %v2643_v44 = vpop.f32.mrb[115].mxu1  ;;  %v2756_v45 = vpop.f32.mrb[99].mxu0 }
 0x87d   :  { %2943 = vst [vmem:[#allocation25 + $0x308] sm:$0xff] %v2640_v40  ;;  %2945 = vst [vmem:[#allocation25 + $0x318] sm:$0xff] %v2753_v41  ;;  %v2644_v46 = vadd.f32 %v2643_v44, %v6466_v15  ;;  %v2757_v47 = vadd.f32 %v2756_v45, %v6470_v10 }
 0x87e   :  { %2948 = vst [vmem:[#allocation25 + $0x330] sm:$0xff] %v2642_v43  ;;  %2950 = vst [vmem:[#allocation25 + $0x340] sm:$0xff] %v2755_v27 }
 0x87f   :  { %2949 = vst [vmem:[#allocation25 + $0x338] sm:$0xff] %v2644_v46  ;;  %2951 = vst [vmem:[#allocation25 + $0x348] sm:$0xff] %v2757_v47 }
 0x881   :  { %v2647_v49 = vpop.f32.mrb[116].mxu1  ;;  %v2760_v51 = vpop.f32.mrb[100].mxu0 }
 0x882   :  { %v2648_v52 = vadd.f32 %v2647_v49, %v6458_v58  ;;  %v2761_v25 = vadd.f32 %v2760_v51, %v6462_v59  ;;  %v2649_v53 = vpop.f32.mrb[117].mxu1  ;;  %v2762_v20 = vpop.f32.mrb[101].mxu0 }
 0x883   :  { %v2650_v54 = vadd.f32 %v2649_v53, %v6466_v15  ;;  %v2763_v55 = vadd.f32 %v2762_v20, %v6470_v10  ;;  %v2651_v60 = vpop.f32.mrb[118].mxu1  ;;  %v2764_v61 = vpop.f32.mrb[102].mxu0 }
 0x884   :  { %2954 = vst [vmem:[#allocation25 + $0x360] sm:$0xff] %v2648_v52  ;;  %2956 = vst [vmem:[#allocation25 + $0x370] sm:$0xff] %v2761_v25  ;;  %v2652_v63 = vadd.f32 %v2651_v60, %v6458_v58  ;;  %v2765_v0 = vadd.f32 %v2764_v61, %v6462_v59  ;;  %v2653_v3 = vpop.f32.mrb[119].mxu1  ;;  %v2766_v4 = vpop.f32.mrb[103].mxu0 }
 0x885   :  { %2955 = vst [vmem:[#allocation25 + $0x368] sm:$0xff] %v2650_v54  ;;  %2957 = vst [vmem:[#allocation25 + $0x378] sm:$0xff] %v2763_v55  ;;  %v2654_v5 = vadd.f32 %v2653_v3, %v6466_v15  ;;  %v2767_v7 = vadd.f32 %v2766_v4, %v6470_v10 }
 0x886   :  { %2960 = vst [vmem:[#allocation25 + $0x390] sm:$0xff] %v2652_v63  ;;  %2962 = vst [vmem:[#allocation25 + $0x3a0] sm:$0xff] %v2765_v0 }
 0x887   :  { %2961 = vst [vmem:[#allocation25 + $0x398] sm:$0xff] %v2654_v5  ;;  %2963 = vst [vmem:[#allocation25 + $0x3a8] sm:$0xff] %v2767_v7 }
 0x889   :  { %v2657_v9 = vpop.f32.mrb[120].mxu1  ;;  %v2770_v12 = vpop.f32.mrb[104].mxu0 }
 0x88a   :  { %v2658_v13 = vadd.f32 %v2657_v9, %v6458_v58  ;;  %v2771_v21 = vadd.f32 %v2770_v12, %v6462_v59  ;;  %v2659_v6 = vpop.f32.mrb[121].mxu1  ;;  %v2772_v16 = vpop.f32.mrb[105].mxu0 }
 0x88b   :  { %v2660_v18 = vadd.f32 %v2659_v6, %v6466_v15  ;;  %v2773_v23 = vadd.f32 %v2772_v16, %v6470_v10  ;;  %v2661_v24 = vpop.f32.mrb[122].mxu1  ;;  %v2774_v26 = vpop.f32.mrb[106].mxu0 }
 0x88c   :  { %2966 = vst [vmem:[#allocation25 + $0x3c0] sm:$0xff] %v2658_v13  ;;  %2968 = vst [vmem:[#allocation25 + $0x3d0] sm:$0xff] %v2771_v21  ;;  %v2662_v50 = vadd.f32 %v2661_v24, %v6458_v58  ;;  %v2775_v29 = vadd.f32 %v2774_v26, %v6462_v59  ;;  %v2663_v37 = vpop.f32.mrb[123].mxu1  ;;  %v2776_v34 = vpop.f32.mrb[107].mxu0 }
 0x88d   :  { %2967 = vst [vmem:[#allocation25 + $0x3c8] sm:$0xff] %v2660_v18  ;;  %2969 = vst [vmem:[#allocation25 + $0x3d8] sm:$0xff] %v2773_v23  ;;  %v2664_v35 = vadd.f32 %v2663_v37, %v6466_v15  ;;  %v2777_v1 = vadd.f32 %v2776_v34, %v6470_v10 }
 0x88e   :  { %2972 = vst [vmem:[#allocation25 + $0x3f0] sm:$0xff] %v2662_v50  ;;  %2974 = vst [vmem:[#allocation25 + $0x400] sm:$0xff] %v2775_v29 }
 0x88f   :  { %2973 = vst [vmem:[#allocation25 + $0x3f8] sm:$0xff] %v2664_v35  ;;  %2975 = vst [vmem:[#allocation25 + $0x408] sm:$0xff] %v2777_v1 }
 0x891   :  { %v2667_v2 = vpop.f32.mrb[124].mxu1  ;;  %v2780_v11 = vpop.f32.mrb[108].mxu0 }
 0x892   :  { %v2668_v30 = vadd.f32 %v2667_v2, %v6458_v58  ;;  %v2781_v31 = vadd.f32 %v2780_v11, %v6462_v59  ;;  %v2669_v32 = vpop.f32.mrb[125].mxu1  ;;  %v2782_v40 = vpop.f32.mrb[109].mxu0 }
 0x893   :  { %v2670_v41 = vadd.f32 %v2669_v32, %v6466_v15  ;;  %v2783_v33 = vadd.f32 %v2782_v40, %v6470_v10  ;;  %v2671_v36 = vpop.f32.mrb[126].mxu1  ;;  %v2784_v39 = vpop.f32.mrb[110].mxu0 }
 0x894   :  { %2978 = vst [vmem:[#allocation25 + $0x420] sm:$0xff] %v2668_v30  ;;  %2980 = vst [vmem:[#allocation25 + $0x430] sm:$0xff] %v2781_v31  ;;  %v2672_v43 = vadd.f32 %v2671_v36, %v6458_v58  ;;  %v2785_v27 = vadd.f32 %v2784_v39, %v6462_v59  ;;  %v2673_v44 = vpop.f32.mrb[127].mxu1  ;;  %v2786_v45 = vpop.f32.mrb[111].mxu0 }
 0x895   :  { %2979 = vst [vmem:[#allocation25 + $0x428] sm:$0xff] %v2670_v41  ;;  %2981 = vst [vmem:[#allocation25 + $0x438] sm:$0xff] %v2783_v33  ;;  %v2674_v46 = vadd.f32 %v2673_v44, %v6466_v15  ;;  %v2787_v47 = vadd.f32 %v2786_v45, %v6470_v10 }
 0x896   :  { %2984 = vst [vmem:[#allocation25 + $0x450] sm:$0xff] %v2672_v43  ;;  %2986 = vst [vmem:[#allocation25 + $0x460] sm:$0xff] %v2785_v27 }
 0x897   :  { %2985 = vst [vmem:[#allocation25 + $0x458] sm:$0xff] %v2674_v46  ;;  %2987 = vst [vmem:[#allocation25 + $0x468] sm:$0xff] %v2787_v47 }
 0x899   :  { %v2677_v48 = vpop.f32.mrb[128].mxu1  ;;  %v2790_v49 = vpop.f32.mrb[112].mxu0 }
 0x89a   :  { %v2678_v51 = vadd.f32 %v2677_v48, %v6458_v58  ;;  %v2791_v52 = vadd.f32 %v2790_v49, %v6462_v59  ;;  %v2679_v25 = vpop.f32.mrb[129].mxu1  ;;  %v2792_v53 = vpop.f32.mrb[113].mxu0 }
 0x89b   :  { %v2680_v20 = vadd.f32 %v2679_v25, %v6466_v15  ;;  %v2793_v54 = vadd.f32 %v2792_v53, %v6470_v10  ;;  %v2681_v55 = vpop.f32.mrb[130].mxu1  ;;  %v2794_v60 = vpop.f32.mrb[114].mxu0 }
 0x89c   :  { %2990 = vst [vmem:[#allocation25 + $0x480] sm:$0xff] %v2678_v51  ;;  %2992 = vst [vmem:[#allocation25 + $0x490] sm:$0xff] %v2791_v52  ;;  %v2682_v61 = vadd.f32 %v2681_v55, %v6458_v58  ;;  %v2795_v62 = vadd.f32 %v2794_v60, %v6462_v59  ;;  %v2683_v63 = vpop.f32.mrb[131].mxu1  ;;  %v2796_v0 = vpop.f32.mrb[115].mxu0 }
 0x89d   :  { %2991 = vst [vmem:[#allocation25 + $0x488] sm:$0xff] %v2680_v20  ;;  %2993 = vst [vmem:[#allocation25 + $0x498] sm:$0xff] %v2793_v54  ;;  %v2684_v3 = vadd.f32 %v2683_v63, %v6466_v15  ;;  %v2797_v4 = vadd.f32 %v2796_v0, %v6470_v10  ;;  %v6538_v63 = vrot.slane %v6454_v42, %v6281_v14 }
 0x89e   :  { %2996 = vst [vmem:[#allocation25 + $0x4b0] sm:$0xff] %v2682_v61  ;;  %2998 = vst [vmem:[#allocation25 + $0x4c0] sm:$0xff] %v2795_v62 }
 0x89f   :  { %2997 = vst [vmem:[#allocation25 + $0x4b8] sm:$0xff] %v2684_v3  ;;  %2999 = vst [vmem:[#allocation25 + $0x4c8] sm:$0xff] %v2797_v4 }
 0x8a1   :  { %v2687_v5 = vpop.f32.mrb[132].mxu1  ;;  %v2800_v7 = vpop.f32.mrb[116].mxu0 }
 0x8a2   :  { %v2688_v8 = vadd.f32 %v2687_v5, %v6458_v58  ;;  %v2801_v9 = vadd.f32 %v2800_v7, %v6462_v59  ;;  %v2689_v12 = vpop.f32.mrb[133].mxu1  ;;  %v2802_v13 = vpop.f32.mrb[117].mxu0 }
 0x8a3   :  { %v2690_v21 = vadd.f32 %v2689_v12, %v6466_v15  ;;  %v2803_v6 = vadd.f32 %v2802_v13, %v6470_v10  ;;  %v2691_v16 = vpop.f32.mrb[134].mxu1  ;;  %v2804_v18 = vpop.f32.mrb[118].mxu0 }
 0x8a4   :  { %3002 = vst [vmem:[#allocation25 + $0x4e0] sm:$0xff] %v2688_v8  ;;  %3004 = vst [vmem:[#allocation25 + $0x4f0] sm:$0xff] %v2801_v9  ;;  %v2692_v23 = vadd.f32 %v2691_v16, %v6458_v58  ;;  %v2805_v24 = vadd.f32 %v2804_v18, %v6462_v59  ;;  %v2693_v26 = vpop.f32.mrb[135].mxu1  ;;  %v2806_v28 = vpop.f32.mrb[119].mxu0 }
 0x8a5   :  { %3003 = vst [vmem:[#allocation25 + $0x4e8] sm:$0xff] %v2690_v21  ;;  %3005 = vst [vmem:[#allocation25 + $0x4f8] sm:$0xff] %v2803_v6  ;;  %v2694_v50 = vadd.f32 %v2693_v26, %v6466_v15  ;;  %v2807_v29 = vadd.f32 %v2806_v28, %v6470_v10 }
 0x8a6   :  { %3008 = vst [vmem:[#allocation25 + $0x510] sm:$0xff] %v2692_v23  ;;  %3010 = vst [vmem:[#allocation25 + $0x520] sm:$0xff] %v2805_v24 }
 0x8a7   :  { %3009 = vst [vmem:[#allocation25 + $0x518] sm:$0xff] %v2694_v50  ;;  %3011 = vst [vmem:[#allocation25 + $0x528] sm:$0xff] %v2807_v29 }
 0x8a9   :  { %v2697_v37 = vpop.f32.mrb[136].mxu1  ;;  %v2810_v34 = vpop.f32.mrb[120].mxu0 }
 0x8aa   :  { %v2698_v35 = vadd.f32 %v2697_v37, %v6458_v58  ;;  %v2811_v1 = vadd.f32 %v2810_v34, %v6462_v59  ;;  %v2699_v2 = vpop.f32.mrb[137].mxu1  ;;  %v2812_v11 = vpop.f32.mrb[121].mxu0 }
 0x8ab   :  { %v2700_v30 = vadd.f32 %v2699_v2, %v6466_v15  ;;  %v2813_v31 = vadd.f32 %v2812_v11, %v6470_v10  ;;  %v2701_v32 = vpop.f32.mrb[138].mxu1  ;;  %v2814_v40 = vpop.f32.mrb[122].mxu0 }
 0x8ac   :  { %3014 = vst [vmem:[#allocation25 + $0x540] sm:$0xff] %v2698_v35  ;;  %3016 = vst [vmem:[#allocation25 + $0x550] sm:$0xff] %v2811_v1  ;;  %v2702_v41 = vadd.f32 %v2701_v32, %v6458_v58  ;;  %v2815_v33 = vadd.f32 %v2814_v40, %v6462_v59  ;;  %v2703_v36 = vpop.f32.mrb[139].mxu1  ;;  %v2816_v39 = vpop.f32.mrb[123].mxu0 }
 0x8ad   :  { %3015 = vst [vmem:[#allocation25 + $0x548] sm:$0xff] %v2700_v30  ;;  %3017 = vst [vmem:[#allocation25 + $0x558] sm:$0xff] %v2813_v31  ;;  %v2704_v43 = vadd.f32 %v2703_v36, %v6466_v15  ;;  %v2817_v27 = vadd.f32 %v2816_v39, %v6470_v10 }
 0x8ae   :  { %3020 = vst [vmem:[#allocation25 + $0x570] sm:$0xff] %v2702_v41  ;;  %3022 = vst [vmem:[#allocation25 + $0x580] sm:$0xff] %v2815_v33 }
 0x8af   :  { %3021 = vst [vmem:[#allocation25 + $0x578] sm:$0xff] %v2704_v43  ;;  %3023 = vst [vmem:[#allocation25 + $0x588] sm:$0xff] %v2817_v27 }
 0x8b1   :  { %v2707_v44 = vpop.f32.mrb[140].mxu1  ;;  %v2820_v45 = vpop.f32.mrb[124].mxu0 }
 0x8b2   :  { %v2708_v46 = vadd.f32 %v2707_v44, %v6458_v58  ;;  %v2821_v47 = vadd.f32 %v2820_v45, %v6462_v59  ;;  %v2709_v48 = vpop.f32.mrb[141].mxu1  ;;  %v2822_v49 = vpop.f32.mrb[125].mxu0 }
 0x8b3   :  { %v2710_v51 = vadd.f32 %v2709_v48, %v6466_v15  ;;  %v2823_v52 = vadd.f32 %v2822_v49, %v6470_v10  ;;  %v2711_v25 = vpop.f32.mrb[142].mxu1  ;;  %v2824_v53 = vpop.f32.mrb[126].mxu0 }
 0x8b4   :  { %3026 = vst [vmem:[#allocation25 + $0x5a0] sm:$0xff] %v2708_v46  ;;  %3028 = vst [vmem:[#allocation25 + $0x5b0] sm:$0xff] %v2821_v47  ;;  %v2712_v20 = vadd.f32 %v2711_v25, %v6458_v58  ;;  %v2825_v54 = vadd.f32 %v2824_v53, %v6462_v59  ;;  %v2713_v55 = vpop.f32.mrb[143].mxu1  ;;  %v2826_v60 = vpop.f32.mrb[127].mxu0  ;;  %v6542_v58 = vrot.slane %v6454_v42, %v6286_v19 }
 0x8b5   :  { %3027 = vst [vmem:[#allocation25 + $0x5a8] sm:$0xff] %v2710_v51  ;;  %3029 = vst [vmem:[#allocation25 + $0x5b8] sm:$0xff] %v2823_v52  ;;  %v2714_v61 = vadd.f32 %v2713_v55, %v6466_v15  ;;  %v2827_v62 = vadd.f32 %v2826_v60, %v6470_v10 }
 0x8b6   :  { %3032 = vst [vmem:[#allocation25 + $0x5d0] sm:$0xff] %v2712_v20  ;;  %3034 = vst [vmem:[#allocation25 + $0x5e0] sm:$0xff] %v2825_v54 }
 0x8b7   :  { %3033 = vst [vmem:[#allocation25 + $0x5d8] sm:$0xff] %v2714_v61  ;;  %3035 = vst [vmem:[#allocation25 + $0x5e8] sm:$0xff] %v2827_v62 }
 0x8b9   :  { %v2863_v59 = vpop.f32.mrb[144].mxu1  ;;  %v4963_v0 = vpop.f32.mrb[128].mxu0 }
 0x8ba   :  { %v2864_v3 = vadd.f32 %v2863_v59, %v6538_v63  ;;  %v2865_v4 = vpop.f32.mrb[145].mxu1  ;;  %v3136_v15 = vpop.f32.mrb[129].mxu0 }
 0x8bb   :  { %v2866_v10 = vadd.f32 %v2865_v4, %v6542_v58  ;;  %v2867_v5 = vpop.f32.mrb[146].mxu1  ;;  %v4964_v7 = vpop.f32.mrb[130].mxu0 }
 0x8bc   :  { %2946 = vst [vmem:[#allocation25 + $0x320] sm:$0xff] %v2864_v3  ;;  %v2868_v8 = vadd.f32 %v2867_v5, %v6538_v63  ;;  %v3200_v9 = vpack.c.bf16 %v4964_v7, %v4963_v0  ;;  %v2869_v12 = vpop.f32.mrb[147].mxu1  ;;  %v3139_v13 = vpop.f32.mrb[131].mxu0 }
 0x8bd   :  { %2947 = vst [vmem:[#allocation25 + $0x328] sm:$0xff] %v2866_v10  ;;  %v2870_v42 = vadd.f32 %v2869_v12, %v6542_v58  ;;  %v3199_v21 = vpack.c.bf16 %v3139_v13, %v3136_v15  ;;  %v5363_v12 = vld [vmem:[#allocation5 + $0x10] sm:$0xff]  }
 0x8be   :  { %2952 = vst [vmem:[#allocation25 + $0x350] sm:$0xff] %v2868_v8 }
 0x8bf   :  { %2953 = vst [vmem:[#allocation25 + $0x358] sm:$0xff] %v2870_v42  ;;  %4977 = vmatprep.subr.bf16.mxu0 %v3199_v21 }
 0x8c0   :  { %4978 = vmatpush3.bf16.msra.mxu0 %v3199_v21 }
 0x8c1   :  { %v2873_v6 = vpop.f32.mrb[148].mxu1  ;;  %v4967_v16 = vpop.f32.mrb[132].mxu0  ;;  %4979 = vmatprep.subr.bf16.mxu0 %v3200_v9 }
 0x8c2   :  { %v2874_v18 = vadd.f32 %v2873_v6, %v6538_v63  ;;  %v2875_v23 = vpop.f32.mrb[149].mxu1  ;;  %v3152_v24 = vpop.f32.mrb[133].mxu0 }
 0x8c3   :  { %v2876_v26 = vadd.f32 %v2875_v23, %v6542_v58  ;;  %v2877_v28 = vpop.f32.mrb[150].mxu1  ;;  %v4968_v50 = vpop.f32.mrb[134].mxu0 }
 0x8c4   :  { %2958 = vst [vmem:[#allocation25 + $0x380] sm:$0xff] %v2874_v18  ;;  %v2878_v29 = vadd.f32 %v2877_v28, %v6538_v63  ;;  %v3202_v37 = vpack.c.bf16 %v4968_v50, %v4967_v16  ;;  %v2879_v34 = vpop.f32.mrb[151].mxu1  ;;  %v3155_v35 = vpop.f32.mrb[135].mxu0  ;;  %4980 = vmatpush3.bf16.msra.mxu0 %v3200_v9  ;;  %v5362_v9 = vld [vmem:[#allocation5 + $0x8] sm:$0xff]   ;;  %v5365_v28 = vld [vmem:[#allocation5 + $0x20] sm:$0xff]  }
 0x8c5   :  { %2959 = vst [vmem:[#allocation25 + $0x388] sm:$0xff] %v2876_v26  ;;  %v2880_v1 = vadd.f32 %v2879_v34, %v6542_v58  ;;  %v3201_v2 = vpack.c.bf16 %v3155_v35, %v3152_v24  ;;  %v5364_v26 = vld [vmem:[#allocation5 + $0x18] sm:$0xff]  }
 0x8c6   :  { %2964 = vst [vmem:[#allocation25 + $0x3b0] sm:$0xff] %v2878_v29 }
 0x8c7   :  { %2965 = vst [vmem:[#allocation25 + $0x3b8] sm:$0xff] %v2880_v1  ;;  %4981 = vmatprep.subr.bf16.mxu0 %v3201_v2 }
 0x8c8   :  { %4982 = vmatpush3.bf16.msra.mxu0 %v3201_v2 }
 0x8c9   :  { %v2883_v11 = vpop.f32.mrb[152].mxu1  ;;  %v4971_v30 = vpop.f32.mrb[136].mxu0  ;;  %4983 = vmatprep.subr.bf16.mxu0 %v3202_v37 }
 0x8ca   :  { %v2884_v31 = vadd.f32 %v2883_v11, %v6538_v63  ;;  %v2885_v32 = vpop.f32.mrb[153].mxu1  ;;  %v3168_v40 = vpop.f32.mrb[137].mxu0 }
 0x8cb   :  { %v2886_v41 = vadd.f32 %v2885_v32, %v6542_v58  ;;  %v2887_v33 = vpop.f32.mrb[154].mxu1  ;;  %v4972_v36 = vpop.f32.mrb[138].mxu0 }
 0x8cc   :  { %2970 = vst [vmem:[#allocation25 + $0x3e0] sm:$0xff] %v2884_v31  ;;  %v2888_v39 = vadd.f32 %v2887_v33, %v6538_v63  ;;  %v3204_v43 = vpack.c.bf16 %v4972_v36, %v4971_v30  ;;  %v2889_v27 = vpop.f32.mrb[155].mxu1  ;;  %v3171_v44 = vpop.f32.mrb[139].mxu0  ;;  %4984 = vmatpush3.bf16.msra.mxu0 %v3202_v37  ;;  %v5366_v30 = vld [vmem:[#allocation5 + $0x28] sm:$0xff]   ;;  %v5367_v31 = vld [vmem:[#allocation5 + $0x30] sm:$0xff]  }
 0x8cd   :  { %2971 = vst [vmem:[#allocation25 + $0x3e8] sm:$0xff] %v2886_v41  ;;  %v2890_v45 = vadd.f32 %v2889_v27, %v6542_v58  ;;  %v3203_v46 = vpack.c.bf16 %v3171_v44, %v3168_v40  ;;  %v5368_v44 = vld [vmem:[#allocation5 + $0x38] sm:$0xff]  }
 0x8ce   :  { %2976 = vst [vmem:[#allocation25 + $0x410] sm:$0xff] %v2888_v39 }
 0x8cf   :  { %2977 = vst [vmem:[#allocation25 + $0x418] sm:$0xff] %v2890_v45  ;;  %4985 = vmatprep.subr.bf16.mxu0 %v3203_v46  ;;  %v5281_v45 = vld [vmem:[#allocation19 + $0x38] sm:$0xff]  }
 0x8d0   :  { %4986 = vmatpush3.bf16.msra.mxu0 %v3203_v46  ;;  %5023 = vmatprep.subr.bf16.mxu1 %v5281_v45  ;;  %v5282_v46 = vld [vmem:[#allocation22] ss:$24 sps:$4 sm:$0xff]  }
 0x8d1   :  { %v2893_v47 = vpop.f32.mrb[156].mxu1  ;;  %v4975_v48 = vpop.f32.mrb[140].mxu0  ;;  %4987 = vmatprep.subr.bf16.mxu0 %v3204_v43  ;;  %5024 = vmatpush3.bf16.msra.mxu1 %v5281_v45 }
 0x8d2   :  { %v2894_v49 = vadd.f32 %v2893_v47, %v6538_v63  ;;  %v2895_v51 = vpop.f32.mrb[157].mxu1  ;;  %v3184_v52 = vpop.f32.mrb[141].mxu0  ;;  %v5284_v47 = vld [vmem:[#allocation22 + $0x4] ss:$24 sps:$4 sm:$0xff]  }
 0x8d3   :  { %v2896_v25 = vadd.f32 %v2895_v51, %v6542_v58  ;;  %v2897_v53 = vpop.f32.mrb[158].mxu1  ;;  %v4976_v20 = vpop.f32.mrb[142].mxu0  ;;  %v5296_v51 = vld [vmem:[#allocation22 + $0x64] ss:$24 sps:$4 sm:$0xff]  }
 0x8d4   :  { %2982 = vst [vmem:[#allocation25 + $0x440] sm:$0xff] %v2894_v49  ;;  %v2898_v54 = vadd.f32 %v2897_v53, %v6538_v63  ;;  %v3206_v55 = vpack.c.bf16 %v4976_v20, %v4975_v48  ;;  %v2899_v60 = vpop.f32.mrb[159].mxu1  ;;  %v3187_v61 = vpop.f32.mrb[143].mxu0  ;;  %4988 = vmatpush3.bf16.msra.mxu0 %v3204_v43  ;;  %v5287_v48 = vld [vmem:[#allocation22 + $0xc] ss:$24 sps:$4 sm:$0xff]  }
 0x8d5   :  { %2983 = vst [vmem:[#allocation25 + $0x448] sm:$0xff] %v2896_v25  ;;  %v2900_v62 = vadd.f32 %v2899_v60, %v6542_v58  ;;  %v3205_v59 = vpack.c.bf16 %v3187_v61, %v3184_v52  ;;  %v5290_v49 = vld [vmem:[#allocation22 + $0x34] ss:$24 sps:$4 sm:$0xff]   ;;  %3960 = vmatprep.subr.bf16.mxu1 %v5287_v48  ;;  %v5300_v25 = vld [vmem:[#allocation22 + $0x90] ss:$24 sps:$4 sm:$0xff]  }
 0x8d6   :  { %2988 = vst [vmem:[#allocation25 + $0x470] sm:$0xff] %v2898_v54  ;;  %v5302_v52 = vld [vmem:[#allocation22 + $0x94] ss:$24 sps:$4 sm:$0xff]   ;;  %v5308_v53 = vld [vmem:[#allocation22 + $0xc4] ss:$24 sps:$4 sm:$0xff]  }
 0x8d7   :  { %2989 = vst [vmem:[#allocation25 + $0x478] sm:$0xff] %v2900_v62  ;;  %4989 = vmatprep.subr.bf16.mxu0 %v3205_v59  ;;  %v5306_v20 = vld [vmem:[#allocation22 + $0xc0] ss:$24 sps:$4 sm:$0xff]   ;;  %v5314_v54 = vld [vmem:[#allocation22 + $0xf4] ss:$24 sps:$4 sm:$0xff]  }
 0x8d8   :  { %4990 = vmatpush3.bf16.msra.mxu0 %v3205_v59  ;;  %v6577_v60 = vld [vmem:[#allocation17] ss:$0 sm:$0xff] }
 0x8d9   :  { %v2903_v0 = vpop.f32.mrb[160].mxu1  ;;  %4991 = vmatprep.subr.bf16.mxu0 %v3206_v55 }
 0x8da   :  { %v2904_v3 = vadd.f32 %v2903_v0, %v6538_v63  ;;  %v2905_v4 = vpop.f32.mrb[161].mxu1 }
 0x8db   :  { %v2906_v15 = vadd.f32 %v2905_v4, %v6542_v58  ;;  %v2907_v10 = vpop.f32.mrb[162].mxu1 }
 0x8dc   :  { %2994 = vst [vmem:[#allocation25 + $0x4a0] sm:$0xff] %v2904_v3  ;;  %v2908_v5 = vadd.f32 %v2907_v10, %v6538_v63  ;;  %v2909_v7 = vpop.f32.mrb[163].mxu1  ;;  %4992 = vmatpush3.bf16.msra.mxu0 %v3206_v55  ;;  %v5312_v55 = vld [vmem:[#allocation22 + $0xf0] ss:$24 sps:$4 sm:$0xff]  }
 0x8dd   :  { %2995 = vst [vmem:[#allocation25 + $0x4a8] sm:$0xff] %v2906_v15  ;;  %v2910_v8 = vadd.f32 %v2909_v7, %v6542_v58  ;;  %3847 = vmatprep.subr.bf16.mxu0 %v5284_v47  ;;  %v5303_v47 = vld [vmem:[#allocation22 + $0x98] ss:$24 sps:$4 sm:$0xff]  }
 0x8de   :  { %3000 = vst [vmem:[#allocation25 + $0x4d0] sm:$0xff] %v2908_v5 }
 0x8df   :  { %3001 = vst [vmem:[#allocation25 + $0x4d8] sm:$0xff] %v2910_v8  ;;  %4994 = vmatmul.mubr.bf16.vlgmr.msra.gmra.mrb[144].mxu0 %v5362_v9 }
 0x8e0   :  { %4997 = vmatprep.mubr.bf16.mxu0 %v5363_v12  ;;  %3848 = vmatpush1.bf16.msra.mxu0 %v5282_v46 }
 0x8e1   :  { %v2913_v13 = vpop.f32.mrb[164].mxu1  ;;  %3849 = vmatprep.subr.bf16.mxu0 %v5290_v49  ;;  %v5311_v49 = vld [vmem:[#allocation22 + $0xcc] ss:$24 sps:$4 sm:$0xff]  }
 0x8e2   :  { %v2914_v42 = vadd.f32 %v2913_v13, %v6538_v63  ;;  %v2915_v21 = vpop.f32.mrb[165].mxu1 }
 0x8e3   :  { %v2916_v6 = vadd.f32 %v2915_v21, %v6542_v58  ;;  %v2917_v16 = vpop.f32.mrb[166].mxu1  ;;  %v5285_v21 = vld [vmem:[#allocation22 + $0x8] ss:$24 sps:$4 sm:$0xff]  }
 0x8e4   :  { %3006 = vst [vmem:[#allocation25 + $0x500] sm:$0xff] %v2914_v42  ;;  %v2918_v18 = vadd.f32 %v2917_v16, %v6538_v63  ;;  %v2919_v23 = vpop.f32.mrb[167].mxu1 }
 0x8e5   :  { %3007 = vst [vmem:[#allocation25 + $0x508] sm:$0xff] %v2916_v6  ;;  %v2920_v24 = vadd.f32 %v2919_v23, %v6542_v58 }
 0x8e6   :  { %3012 = vst [vmem:[#allocation25 + $0x530] sm:$0xff] %v2918_v18  ;;  %v5293_v18 = vld [vmem:[#allocation22 + $0x3c] ss:$24 sps:$4 sm:$0xff]  }
 0x8e7   :  { %3013 = vst [vmem:[#allocation25 + $0x538] sm:$0xff] %v2920_v24  ;;  %4998 = vmatmul.mubr.bf16.gmra.mrb[148].mxu0 %v5364_v26 }
 0x8e8   :  { %5001 = vmatprep.mubr.bf16.mxu0 %v5365_v28 }
 0x8e9   :  { %v2923_v50 = vpop.f32.mrb[168].mxu1 }
 0x8ea   :  { %v2924_v29 = vadd.f32 %v2923_v50, %v6538_v63  ;;  %v2925_v37 = vpop.f32.mrb[169].mxu1 }
 0x8eb   :  { %v2926_v34 = vadd.f32 %v2925_v37, %v6542_v58  ;;  %v2927_v35 = vpop.f32.mrb[170].mxu1 }
 0x8ec   :  { %3018 = vst [vmem:[#allocation25 + $0x560] sm:$0xff] %v2924_v29  ;;  %v2928_v1 = vadd.f32 %v2927_v35, %v6538_v63  ;;  %v2929_v2 = vpop.f32.mrb[171].mxu1 }
 0x8ed   :  { %3019 = vst [vmem:[#allocation25 + $0x568] sm:$0xff] %v2926_v34  ;;  %v2930_v11 = vadd.f32 %v2929_v2, %v6542_v58  ;;  %v5291_v34 = vld [vmem:[#allocation22 + $0x38] ss:$24 sps:$4 sm:$0xff]  }
 0x8ee   :  { %3024 = vst [vmem:[#allocation25 + $0x590] sm:$0xff] %v2928_v1  ;;  %v5299_v1 = vld [vmem:[#allocation22 + $0x6c] ss:$24 sps:$4 sm:$0xff]  }
 0x8ef   :  { %3025 = vst [vmem:[#allocation25 + $0x598] sm:$0xff] %v2930_v11  ;;  %5002 = vmatmul.mubr.bf16.gmra.mrb[152].mxu0 %v5366_v30 }
 0x8f0   :  { %5005 = vmatprep.mubr.bf16.mxu0 %v5367_v31 }
 0x8f1   :  { %v2933_v32 = vpop.f32.mrb[172].mxu1 }
 0x8f2   :  { %v2934_v40 = vadd.f32 %v2933_v32, %v6538_v63  ;;  %v2935_v41 = vpop.f32.mrb[173].mxu1  ;;  %v5297_v32 = vld [vmem:[#allocation22 + $0x68] ss:$24 sps:$4 sm:$0xff]  }
 0x8f3   :  { %v2936_v33 = vadd.f32 %v2935_v41, %v6542_v58  ;;  %v2937_v36 = vpop.f32.mrb[174].mxu1 }
 0x8f4   :  { %3030 = vst [vmem:[#allocation25 + $0x5c0] sm:$0xff] %v2934_v40  ;;  %v2938_v39 = vadd.f32 %v2937_v36, %v6538_v63  ;;  %v2939_v43 = vpop.f32.mrb[175].mxu1  ;;  %v5288_v63 = vld [vmem:[#allocation22 + $0x30] ss:$24 sps:$4 sm:$0xff]  }
 0x8f5   :  { %3031 = vst [vmem:[#allocation25 + $0x5c8] sm:$0xff] %v2936_v33  ;;  %v2940_v27 = vadd.f32 %v2939_v43, %v6542_v58  ;;  %3850 = vmatpush1.bf16.msra.mxu0 %v5288_v63  ;;  %v5294_v58 = vld [vmem:[#allocation22 + $0x60] ss:$24 sps:$4 sm:$0xff]   ;;  %v5305_v33 = vld [vmem:[#allocation22 + $0x9c] ss:$24 sps:$4 sm:$0xff]  }
 0x8f6   :  { %3036 = vst [vmem:[#allocation25 + $0x5f0] sm:$0xff] %v2938_v39  ;;  %3851 = vmatprep.subr.bf16.mxu0 %v5296_v51 }
 0x8f7   :  { %3037 = vst [vmem:[#allocation25 + $0x5f8] sm:$0xff] %v2940_v27  ;;  %5006 = vmatmul.mubr.bf16.gmra.mrb[156].mxu0 %v5368_v44 }
 0x8f8   :  { %3879 = vmatprep.mubr.bf16.mxu0 %v5759_v22 }
 0x8f9   :  { %3852 = vmatpush1.bf16.msra.mxu0 %v5294_v58 }
 0x8fa   :  { %3853 = vmatprep.subr.bf16.mxu0 %v5302_v52 }
 0x8fd   :  { %3854 = vmatpush1.bf16.msra.mxu0 %v5300_v25  ;;  %v5309_v25 = vld [vmem:[#allocation22 + $0xc8] ss:$24 sps:$4 sm:$0xff]  }
 0x8fe   :  { %3855 = vmatprep.subr.bf16.mxu0 %v5308_v53 }
 0x901   :  { %3856 = vmatpush1.bf16.msra.mxu0 %v5306_v20 }
 0x902   :  { %3857 = vmatprep.subr.bf16.mxu0 %v5314_v54  ;;  %v5317_v54 = vld [vmem:[#allocation22 + $0xfc] ss:$24 sps:$4 sm:$0xff]  }
 0x905   :  { %3858 = vmatpush1.bf16.msra.mxu0 %v5312_v55 }
 0x9b2   :  { %v4995_v61 = vpop.f32.mrb[144].mxu0 }
 0x9b3   :  { %v3257_v62 = vadd.f32 %v4995_v61, %v6577_v60  ;;  %v3248_v59 = vpop.f32.mrb[145].mxu0 }
 0x9b4   :  { %v3249_v0 = vadd.f32 %v6577_v60, %v3248_v59  ;;  %v4996_v3 = vpop.f32.mrb[146].mxu0 }
 0x9b5   :  { %v3313_v4 = vmax.f32 %v3257_v62, 0.0  ;;  %v3260_v15 = vadd.f32 %v4996_v3, %v6577_v60  ;;  %v3251_v10 = vpop.f32.mrb[147].mxu0 }
 0x9b6   :  { %v3311_v5 = vmax.f32 %v3249_v0, 0.0  ;;  %v3252_v7 = vadd.f32 %v6577_v60, %v3251_v10 }
 0x9b7   :  { %4284 = vst [vmem:[#allocation26 + $0x10] sm:$0xff] %v3313_v4  ;;  %v3314_v8 = vmax.f32 %v3260_v15, 0.0  ;;  %v5315_v15 = vld [vmem:[#allocation22 + $0xf8] ss:$24 sps:$4 sm:$0xff]  }
 0x9b8   :  { %4282 = vst [vmem:[#allocation26] sm:$0xff] %v3311_v5  ;;  %v3312_v9 = vmax.f32 %v3252_v7, 0.0 }
 0x9b9   :  { %v3328_v12 = vpack.c.bf16 %v3314_v8, %v3313_v4  ;;  %4285 = vst [vmem:[#allocation26 + $0x18] sm:$0xff] %v3314_v8 }
 0x9ba   :  { %v3327_v13 = vpack.c.bf16 %v3312_v9, %v3311_v5  ;;  %4283 = vst [vmem:[#allocation26 + $0x8] sm:$0xff] %v3312_v9  ;;  %v4999_v42 = vpop.f32.mrb[148].mxu0  ;;  %v5320_v9 = vld [vmem:[#allocation22 + $0x124] ss:$24 sps:$4 sm:$0xff]  }
 0x9bb   :  { %v3273_v6 = vadd.f32 %v4999_v42, %v6577_v60  ;;  %v3264_v16 = vpop.f32.mrb[149].mxu0  ;;  %3859 = vmatprep.subr.bf16.mxu0 %v5320_v9  ;;  %v5326_v42 = vld [vmem:[#allocation22 + $0x154] ss:$24 sps:$4 sm:$0xff]  }
 0x9bc   :  { %5025 = vmatprep.mubr.bf16.mxu1 %v3327_v13  ;;  %v3265_v23 = vadd.f32 %v6577_v60, %v3264_v16  ;;  %v5000_v24 = vpop.f32.mrb[150].mxu0  ;;  %v5318_v13 = vld [vmem:[#allocation22 + $0x120] ss:$24 sps:$4 sm:$0xff]  }
 0x9bd   :  { %v3317_v26 = vmax.f32 %v3273_v6, 0.0  ;;  %5026 = vmatmul.mubr.bf16.vlgmr.msra.gmra.mrb[176].mxu1 %v3328_v12  ;;  %v3276_v28 = vadd.f32 %v5000_v24, %v6577_v60  ;;  %v3267_v50 = vpop.f32.mrb[151].mxu0  ;;  %v5323_v12 = vld [vmem:[#allocation22 + $0x12c] ss:$24 sps:$4 sm:$0xff]   ;;  %3860 = vmatpush1.bf16.msra.mxu0 %v5318_v13  ;;  %v5324_v6 = vld [vmem:[#allocation22 + $0x150] ss:$24 sps:$4 sm:$0xff]  }
 0x9be   :  { %v3315_v29 = vmax.f32 %v3265_v23, 0.0  ;;  %v3268_v37 = vadd.f32 %v6577_v60, %v3267_v50  ;;  %3961 = vmatpush1.bf16.msra.mxu1 %v5285_v21  ;;  %v5329_v21 = vld [vmem:[#allocation22 + $0x15c] ss:$24 sps:$4 sm:$0xff]   ;;  %v5327_v16 = vld [vmem:[#allocation22 + $0x158] ss:$24 sps:$4 sm:$0xff]   ;;  %3861 = vmatprep.subr.bf16.mxu0 %v5326_v42 }
 0x9bf   :  { %4288 = vst [vmem:[#allocation26 + $0x30] sm:$0xff] %v3317_v26  ;;  %v3318_v35 = vmax.f32 %v3276_v28, 0.0  ;;  %3962 = vmatprep.subr.bf16.mxu1 %v5293_v18  ;;  %v5332_v18 = vld [vmem:[#allocation22 + $0x14] ss:$24 sps:$4 sm:$0xff]   ;;  %v6596_v23 = vld [vmem:[#allocation20] ss:$0 sm:$0xff] }
 0x9c0   :  { %4286 = vst [vmem:[#allocation26 + $0x20] sm:$0xff] %v3315_v29  ;;  %v3316_v2 = vmax.f32 %v3268_v37, 0.0  ;;  %v5342_v42 = vld [vmem:[#allocation22 + $0xd0] ss:$24 sps:$4 sm:$0xff]  }
 0x9c1   :  { %v3330_v11 = vpack.c.bf16 %v3318_v35, %v3317_v26  ;;  %4289 = vst [vmem:[#allocation26 + $0x38] sm:$0xff] %v3318_v35  ;;  %3862 = vmatpush1.bf16.msra.mxu0 %v5324_v6 }
 0x9c2   :  { %v3329_v30 = vpack.c.bf16 %v3316_v2, %v3315_v29  ;;  %4287 = vst [vmem:[#allocation26 + $0x28] sm:$0xff] %v3316_v2  ;;  %v5003_v31 = vpop.f32.mrb[152].mxu0  ;;  %3963 = vmatpush1.bf16.msra.mxu1 %v5291_v34  ;;  %4073 = vmatprep.subr.bf16.mxu0 %v5332_v18 }
 0x9c3   :  { %v3289_v40 = vadd.f32 %v5003_v31, %v6577_v60  ;;  %v3280_v41 = vpop.f32.mrb[153].mxu0  ;;  %3964 = vmatprep.subr.bf16.mxu1 %v5299_v1 }
 0x9c4   :  { %5029 = vmatprep.mubr.bf16.mxu1 %v3329_v30  ;;  %v3281_v36 = vadd.f32 %v6577_v60, %v3280_v41  ;;  %v5004_v39 = vpop.f32.mrb[154].mxu0 }
 0x9c5   :  { %5030 = vmatmul.mubr.bf16.gmra.mrb[180].mxu1 %v3330_v11  ;;  %v3321_v43 = vmax.f32 %v3289_v40, 0.0  ;;  %v3292_v27 = vadd.f32 %v5004_v39, %v6577_v60  ;;  %v3283_v44 = vpop.f32.mrb[155].mxu0 }
 0x9c6   :  { %v3319_v45 = vmax.f32 %v3281_v36, 0.0  ;;  %v3284_v46 = vadd.f32 %v6577_v60, %v3283_v44  ;;  %3965 = vmatpush1.bf16.msra.mxu1 %v5297_v32  ;;  %v5330_v32 = vld [vmem:[#allocation22 + $0x10] ss:$24 sps:$4 sm:$0xff]  }
 0x9c7   :  { %4292 = vst [vmem:[#allocation26 + $0x50] sm:$0xff] %v3321_v43  ;;  %v3322_v48 = vmax.f32 %v3292_v27, 0.0  ;;  %3966 = vmatprep.subr.bf16.mxu1 %v5305_v33  ;;  %v5335_v33 = vld [vmem:[#allocation22 + $0x44] ss:$24 sps:$4 sm:$0xff]  }
 0x9c8   :  { %4290 = vst [vmem:[#allocation26 + $0x40] sm:$0xff] %v3319_v45  ;;  %v3320_v63 = vmax.f32 %v3284_v46, 0.0 }
 0x9c9   :  { %v3332_v51 = vpack.c.bf16 %v3322_v48, %v3321_v43  ;;  %4293 = vst [vmem:[#allocation26 + $0x58] sm:$0xff] %v3322_v48 }
 0x9ca   :  { %v3331_v58 = vpack.c.bf16 %v3320_v63, %v3319_v45  ;;  %4291 = vst [vmem:[#allocation26 + $0x48] sm:$0xff] %v3320_v63  ;;  %v5007_v52 = vpop.f32.mrb[156].mxu0  ;;  %3967 = vmatpush1.bf16.msra.mxu1 %v5303_v47  ;;  %v5333_v47 = vld [vmem:[#allocation22 + $0x40] ss:$24 sps:$4 sm:$0xff]   ;;  %v5338_v63 = vld [vmem:[#allocation22 + $0x74] ss:$24 sps:$4 sm:$0xff]  }
 0x9cb   :  { %v3305_v53 = vadd.f32 %v5007_v52, %v6577_v60  ;;  %v3296_v20 = vpop.f32.mrb[157].mxu0  ;;  %3968 = vmatprep.subr.bf16.mxu1 %v5311_v49 }
 0x9cc   :  { %5033 = vmatprep.mubr.bf16.mxu1 %v3331_v58  ;;  %v3297_v55 = vadd.f32 %v6577_v60, %v3296_v20  ;;  %v5008_v61 = vpop.f32.mrb[158].mxu0  ;;  %v5336_v20 = vld [vmem:[#allocation22 + $0x70] ss:$24 sps:$4 sm:$0xff]  }
 0x9cd   :  { %5034 = vmatmul.mubr.bf16.gmra.mrb[184].mxu1 %v3332_v51  ;;  %v3325_v62 = vmax.f32 %v3305_v53, 0.0  ;;  %v3308_v59 = vadd.f32 %v5008_v61, %v6577_v60  ;;  %v3299_v0 = vpop.f32.mrb[159].mxu0  ;;  %v5341_v61 = vld [vmem:[#allocation22 + $0xa4] ss:$24 sps:$4 sm:$0xff]  }
 0x9ce   :  { %v3323_v3 = vmax.f32 %v3297_v55, 0.0  ;;  %v3300_v4 = vadd.f32 %v6577_v60, %v3299_v0  ;;  %3969 = vmatpush1.bf16.msra.mxu1 %v5309_v25  ;;  %v5321_v60 = vld [vmem:[#allocation22 + $0x128] ss:$24 sps:$4 sm:$0xff]  }
 0x9cf   :  { %4296 = vst [vmem:[#allocation26 + $0x70] sm:$0xff] %v3325_v62  ;;  %v3326_v10 = vmax.f32 %v3308_v59, 0.0  ;;  %3970 = vmatprep.subr.bf16.mxu1 %v5317_v54 }
 0x9d0   :  { %4294 = vst [vmem:[#allocation26 + $0x60] sm:$0xff] %v3323_v3  ;;  %v3324_v5 = vmax.f32 %v3300_v4, 0.0 }
 0x9d1   :  { %v3334_v7 = vpack.c.bf16 %v3326_v10, %v3325_v62  ;;  %4297 = vst [vmem:[#allocation26 + $0x78] sm:$0xff] %v3326_v10 }
 0x9d2   :  { %v3333_v8 = vpack.c.bf16 %v3324_v5, %v3323_v3  ;;  %4295 = vst [vmem:[#allocation26 + $0x68] sm:$0xff] %v3324_v5  ;;  %3971 = vmatpush1.bf16.msra.mxu1 %v5315_v15  ;;  %v5339_v5 = vld [vmem:[#allocation22 + $0xa0] ss:$24 sps:$4 sm:$0xff]  }
 0x9d3   :  { %3972 = vmatprep.subr.bf16.mxu1 %v5323_v12 }
 0x9d4   :  { %5037 = vmatprep.mubr.bf16.mxu1 %v3333_v8  ;;  %v5344_v8 = vld [vmem:[#allocation22 + $0xd4] ss:$24 sps:$4 sm:$0xff]  }
 0x9d5   :  { %5038 = vmatmul.mubr.bf16.gmra.mrb[188].mxu1 %v3334_v7 }
 0x9d6   :  { %3992 = vmatprep.mubr.bf16.mxu1 %v5759_v22  ;;  %3973 = vmatpush1.bf16.msra.mxu1 %v5321_v60 }
 0x9d7   :  { %3974 = vmatprep.subr.bf16.mxu1 %v5329_v21 }
 0x9da   :  { %3975 = vmatpush1.bf16.msra.mxu1 %v5327_v16  ;;  %v5347_v16 = vld [vmem:[#allocation22 + $0x104] ss:$24 sps:$4 sm:$0xff]  }
 0xa90   :  { %v5027_v24 = vpop.f32.mrb[176].mxu1 }
 0xa91   :  { %v3449_v26 = vadd.f32 %v5027_v24, %v6596_v23  ;;  %v3440_v28 = vpop.f32.mrb[177].mxu1 }
 0xa92   :  { %v3441_v50 = vadd.f32 %v6596_v23, %v3440_v28  ;;  %v5028_v29 = vpop.f32.mrb[178].mxu1 }
 0xa93   :  { %v3452_v37 = vadd.f32 %v5028_v29, %v6596_v23  ;;  %v3443_v34 = vpop.f32.mrb[179].mxu1  ;;  %v3505_v1 = vmax.f32 %v3449_v26, 0.0 }
 0xa94   :  { %v3444_v35 = vadd.f32 %v6596_v23, %v3443_v34  ;;  %v3503_v11 = vmax.f32 %v3441_v50, 0.0  ;;  %v5345_v34 = vld [vmem:[#allocation22 + $0x100] ss:$24 sps:$4 sm:$0xff]  }
 0xa95   :  { %v3506_v2 = vmax.f32 %v3452_v37, 0.0 }
 0xa96   :  { %v3504_v30 = vmax.f32 %v3444_v35, 0.0 }
 0xa97   :  { %v6602_v31 = vpack.c.bf16 %v3506_v2, %v3505_v1  ;;  %v5350_v1 = vld [vmem:[#allocation22 + $0x134] ss:$24 sps:$4 sm:$0xff]  }
 0xa98   :  { %v6604_v40 = vpack.c.bf16 %v3504_v30, %v3503_v11  ;;  %v5031_v41 = vpop.f32.mrb[180].mxu1 }
 0xa99   :  { %v3465_v36 = vadd.f32 %v5031_v41, %v6596_v23  ;;  %v3456_v39 = vpop.f32.mrb[181].mxu1  ;;  %v5353_v41 = vld [vmem:[#allocation22 + $0x164] ss:$24 sps:$4 sm:$0xff]  }
 0xa9a   :  { %3880 = vmatmul.mubr.bf16.vlgmr.msra.gmra.mrb[160].mxu0 %v6604_v40  ;;  %3993 = vmatmul.mubr.bf16.vlgmr.msra.gmra.mrb[192].mxu1 %v6604_v40  ;;  %v3457_v43 = vadd.f32 %v6596_v23, %v3456_v39  ;;  %v5032_v27 = vpop.f32.mrb[182].mxu1 }
 0xa9b   :  { %v3509_v44 = vmax.f32 %v3465_v36, 0.0  ;;  %4074 = vmatpush1.bf16.msra.mxu0 %v5330_v32  ;;  %v3468_v45 = vadd.f32 %v5032_v27, %v6596_v23  ;;  %v3459_v46 = vpop.f32.mrb[183].mxu1  ;;  %3889 = vmatprep.mubr.bf16.mxu0 %v5759_v22  ;;  %v5348_v32 = vld [vmem:[#allocation22 + $0x130] ss:$24 sps:$4 sm:$0xff]  }
 0xa9c   :  { %v3507_v48 = vmax.f32 %v3457_v43, 0.0  ;;  %v3460_v49 = vadd.f32 %v6596_v23, %v3459_v46  ;;  %4002 = vmatprep.mubr.bf16.mxu1 %v5759_v22  ;;  %4075 = vmatprep.subr.bf16.mxu0 %v5335_v33 }
 0xa9d   :  { %v3510_v51 = vmax.f32 %v3468_v45, 0.0 }
 0xa9e   :  { %v3508_v58 = vmax.f32 %v3460_v49, 0.0 }
 0xa9f   :  { %v6614_v52 = vpack.c.bf16 %v3510_v51, %v3509_v44  ;;  %4076 = vmatpush1.bf16.msra.mxu0 %v5333_v47 }
 0xaa0   :  { %v6616_v25 = vpack.c.bf16 %v3508_v58, %v3507_v48  ;;  %v5035_v53 = vpop.f32.mrb[184].mxu1  ;;  %4077 = vmatprep.subr.bf16.mxu0 %v5338_v63 }
 0xaa1   :  { %v3481_v54 = vadd.f32 %v5035_v53, %v6596_v23  ;;  %v3472_v55 = vpop.f32.mrb[185].mxu1 }
 0xaa2   :  { %3890 = vmatmul.mubr.bf16.gmra.mrb[164].mxu0 %v6602_v31  ;;  %4003 = vmatmul.mubr.bf16.gmra.mrb[196].mxu1 %v6602_v31  ;;  %v3473_v62 = vadd.f32 %v6596_v23, %v3472_v55  ;;  %v5036_v59 = vpop.f32.mrb[186].mxu1 }
 0xaa3   :  { %3899 = vmatprep.mubr.bf16.mxu0 %v5759_v22  ;;  %4012 = vmatprep.mubr.bf16.mxu1 %v5759_v22  ;;  %v3513_v0 = vmax.f32 %v3481_v54, 0.0  ;;  %v3484_v3 = vadd.f32 %v5036_v59, %v6596_v23  ;;  %v3475_v4 = vpop.f32.mrb[187].mxu1 }
 0xaa4   :  { %v3511_v15 = vmax.f32 %v3473_v62, 0.0  ;;  %4078 = vmatpush1.bf16.msra.mxu0 %v5336_v20  ;;  %v3476_v10 = vadd.f32 %v6596_v23, %v3475_v4 }
 0xaa5   :  { %v3514_v7 = vmax.f32 %v3484_v3, 0.0  ;;  %4079 = vmatprep.subr.bf16.mxu0 %v5341_v61 }
 0xaa6   :  { %v3512_v9 = vmax.f32 %v3476_v10, 0.0 }
 0xaa7   :  { %v6626_v12 = vpack.c.bf16 %v3514_v7, %v3513_v0 }
 0xaa8   :  { %v3523_v13 = vpack.c.bf16 %v3512_v9, %v3511_v15  ;;  %4080 = vmatpush1.bf16.msra.mxu0 %v5339_v5  ;;  %v5039_v60 = vpop.f32.mrb[188].mxu1 }
 0xaa9   :  { %v3497_v21 = vadd.f32 %v5039_v60, %v6596_v23  ;;  %4081 = vmatprep.subr.bf16.mxu0 %v5344_v8  ;;  %v3488_v6 = vpop.f32.mrb[189].mxu1 }
 0xaaa   :  { %3900 = vmatmul.mubr.bf16.gmra.mrb[168].mxu0 %v6616_v25  ;;  %4013 = vmatmul.mubr.bf16.gmra.mrb[200].mxu1 %v6616_v25  ;;  %v3489_v18 = vadd.f32 %v6596_v23, %v3488_v6  ;;  %v5040_v24 = vpop.f32.mrb[190].mxu1 }
 0xaab   :  { %3909 = vmatprep.mubr.bf16.mxu0 %v5759_v22  ;;  %4022 = vmatprep.mubr.bf16.mxu1 %v5759_v22  ;;  %v3517_v26 = vmax.f32 %v3497_v21, 0.0  ;;  %v3500_v28 = vadd.f32 %v5040_v24, %v6596_v23  ;;  %v3491_v50 = vpop.f32.mrb[191].mxu1 }
 0xaac   :  { %v3515_v29 = vmax.f32 %v3489_v18, 0.0  ;;  %4082 = vmatpush1.bf16.msra.mxu0 %v5342_v42  ;;  %v3492_v37 = vadd.f32 %v6596_v23, %v3491_v50  ;;  %v5351_v23 = vld [vmem:[#allocation22 + $0x160] ss:$24 sps:$4 sm:$0xff]  }
 0xaad   :  { %v3518_v35 = vmax.f32 %v3500_v28, 0.0  ;;  %4083 = vmatprep.subr.bf16.mxu0 %v5347_v16 }
 0xaae   :  { %v3516_v2 = vmax.f32 %v3492_v37, 0.0 }
 0xaaf   :  { %v3526_v11 = vpack.c.bf16 %v3518_v35, %v3517_v26 }
 0xab0   :  { %v3525_v30 = vpack.c.bf16 %v3516_v2, %v3515_v29  ;;  %4084 = vmatpush1.bf16.msra.mxu0 %v5345_v34 }
 0xab1   :  { %4085 = vmatprep.subr.bf16.mxu0 %v5350_v1 }
 0xab2   :  { %3910 = vmatmul.mubr.bf16.gmra.mrb[172].mxu0 %v6614_v52  ;;  %4023 = vmatmul.mubr.bf16.gmra.mrb[204].mxu1 %v6614_v52 }
 0xab3   :  { %3919 = vmatprep.mubr.bf16.mxu0 %v5759_v22  ;;  %4032 = vmatprep.mubr.bf16.mxu1 %v5759_v22 }
 0xab4   :  { %4086 = vmatpush1.bf16.msra.mxu0 %v5348_v32 }
 0xab5   :  { %4087 = vmatprep.subr.bf16.mxu0 %v5353_v41 }
 0xab8   :  { %4088 = vmatpush1.bf16.msra.mxu0 %v5351_v23 }
 0xaba   :  { %3920 = vmatmul.mubr.bf16.gmra.mrb[176].mxu0 %v3523_v13  ;;  %4033 = vmatmul.mubr.bf16.gmra.mrb[208].mxu1 %v3523_v13 }
 0xabb   :  { %3929 = vmatprep.mubr.bf16.mxu0 %v5759_v22  ;;  %4042 = vmatprep.mubr.bf16.mxu1 %v5759_v22 }
 0xac2   :  { %3930 = vmatmul.mubr.bf16.gmra.mrb[180].mxu0 %v6626_v12  ;;  %4043 = vmatmul.mubr.bf16.gmra.mrb[212].mxu1 %v6626_v12 }
 0xac3   :  { %3939 = vmatprep.mubr.bf16.mxu0 %v5759_v22  ;;  %4052 = vmatprep.mubr.bf16.mxu1 %v5759_v22 }
 0xaca   :  { %3940 = vmatmul.mubr.bf16.gmra.mrb[184].mxu0 %v3525_v30  ;;  %4053 = vmatmul.mubr.bf16.gmra.mrb[216].mxu1 %v3525_v30 }
 0xacb   :  { %3949 = vmatprep.mubr.bf16.mxu0 %v5759_v22  ;;  %4062 = vmatprep.mubr.bf16.mxu1 %v5759_v22 }
 0xad2   :  { %3950 = vmatmul.mubr.bf16.gmra.mrb[188].mxu0 %v3526_v11  ;;  %4063 = vmatmul.mubr.bf16.gmra.mrb[220].mxu1 %v3526_v11 }
 0xad3   :  { %4105 = vmatprep.mubr.bf16.mxu0 %v5759_v22 }
 0xada   :  { %4106 = vmatmul.mubr.bf16.vlgmr.msra.gmra.mrb[192].mxu0 %v6604_v40 }
 0xadb   :  { %4115 = vmatprep.mubr.bf16.mxu0 %v5759_v22 }
 0xae2   :  { %4116 = vmatmul.mubr.bf16.gmra.mrb[196].mxu0 %v6602_v31  ;;  %v6661_v31 = vld [vmem:[#allocation23] sm:$0x3f] }
 0xae3   :  { %4125 = vmatprep.mubr.bf16.mxu0 %v5759_v22  ;;  %v6665_v40 = vrot.slane %v6661_v31, %v6193_v38  ;;  %v6669_v33 = vrot.slane %v6661_v31, %v6196_v17  ;;  %v6673_v36 = vrot.slane %v6661_v31, %v6201_v56 }
 0xaea   :  { %4126 = vmatmul.mubr.bf16.gmra.mrb[200].mxu0 %v6616_v25 }
 0xaeb   :  { %4135 = vmatprep.mubr.bf16.mxu0 %v5759_v22 }
 0xaf2   :  { %4136 = vmatmul.mubr.bf16.gmra.mrb[204].mxu0 %v6614_v52 }
 0xaf3   :  { %4145 = vmatprep.mubr.bf16.mxu0 %v5759_v22 }
 0xafa   :  { %4146 = vmatmul.mubr.bf16.gmra.mrb[208].mxu0 %v3523_v13 }
 0xafb   :  { %4155 = vmatprep.mubr.bf16.mxu0 %v5759_v22 }
 0xb02   :  { %4156 = vmatmul.mubr.bf16.gmra.mrb[212].mxu0 %v6626_v12 }
 0xb03   :  { %4165 = vmatprep.mubr.bf16.mxu0 %v5759_v22 }
 0xb0a   :  { %4166 = vmatmul.mubr.bf16.gmra.mrb[216].mxu0 %v3525_v30 }
 0xb0b   :  { %4175 = vmatprep.mubr.bf16.mxu0 %v5759_v22  ;;  %v6677_v22 = vrot.slane %v6661_v31, %v6204_v57 }
 0xb12   :  { %4176 = vmatmul.mubr.bf16.gmra.mrb[220].mxu0 %v3526_v11 }
 0xb6d   :  { %v3881_v39 = vpop.f32.mrb[160].mxu0  ;;  %v3994_v43 = vpop.f32.mrb[192].mxu1 }
 0xb6e   :  { %v3882_v38 = vadd.f32 %v3881_v39, %v6665_v40  ;;  %v3995_v27 = vadd.f32 %v3994_v43, %v6669_v33  ;;  %v3883_v44 = vpop.f32.mrb[161].mxu0  ;;  %v3996_v17 = vpop.f32.mrb[193].mxu1 }
 0xb6f   :  { %5688 = shalt.err (!%p5685_p4)
}
 0xb70   :  { %s5689_s17 = scalar_lea.hbm %s6822_s15, 2048 }
 0xb71   :  { %p5690_p5 = scmp.ne.s32.totalorder %s6822_s15, %s5689_s17  ;;  %p5693_p6 = scmp.lt.u32.totalorder %s5689_s17, %s6822_s15 }
 0xb73   :  { %p5695_p7 = pnand %p5693_p6, %p5690_p5 }
 0xb75   :  { %5698 = shalt.err (!%p5695_p7)
}
 0xb76   :  { %s5761_s2 = smov 128   ;;  %s5762_s22 = smov 8   ;;  %v3884_v56 = vadd.f32 %v3883_v44, %v6673_v36  ;;  %v3997_v57 = vadd.f32 %v3996_v17, %v6677_v22  ;;  %v3885_v45 = vpop.f32.mrb[162].mxu0  ;;  %v3998_v46 = vpop.f32.mrb[194].mxu1  ;;  %4186 = vst [vmem:[#allocation25 + $0x600] sm:$0xff] %v3882_v38  ;;  %4188 = vst [vmem:[#allocation25 + $0x610] sm:$0xff] %v3995_v27 }
 0xb77   :  { %4321 = dma.vmem_to_hbm [thread:$0]  %s4316_s8, 2048, %s6822_s15, [#allocation27], %s5761_s2, %s5761_s2, %s5762_s22   ;;  %v3886_v47 = vadd.f32 %v3885_v45, %v6665_v40  ;;  %v3999_v48 = vadd.f32 %v3998_v46, %v6669_v33  ;;  %v3887_v49 = vpop.f32.mrb[163].mxu0  ;;  %v4000_v63 = vpop.f32.mrb[195].mxu1 }
 0xb78   :  { %4187 = vst [vmem:[#allocation25 + $0x608] sm:$0xff] %v3884_v56  ;;  %4189 = vst [vmem:[#allocation25 + $0x618] sm:$0xff] %v3997_v57  ;;  %v3888_v51 = vadd.f32 %v3887_v49, %v6673_v36  ;;  %v4001_v58 = vadd.f32 %v4000_v63, %v6677_v22  ;;  %v3891_v52 = vpop.f32.mrb[164].mxu0  ;;  %v4004_v25 = vpop.f32.mrb[196].mxu1  ;;  %s5763_s15 = smov [#allocation25]  }
 0xb79   :  { %4192 = vst [vmem:[#allocation25 + $0x630] sm:$0xff] %v3886_v47  ;;  %4194 = vst [vmem:[#allocation25 + $0x640] sm:$0xff] %v3999_v48  ;;  %v3892_v53 = vadd.f32 %v3891_v52, %v6665_v40  ;;  %v4005_v20 = vadd.f32 %v4004_v25, %v6669_v33  ;;  %v3893_v54 = vpop.f32.mrb[165].mxu0  ;;  %v4006_v55 = vpop.f32.mrb[197].mxu1  ;;  %s4303_s30 = sshll.u32 %s5763_s15, 4  ;;  %s4304_s30 = int_to_ptr.vmem [resolvable:$true] %s4303_s30 }
 0xb7a   :  { %4193 = vst [vmem:[#allocation25 + $0x638] sm:$0xff] %v3888_v51  ;;  %4195 = vst [vmem:[#allocation25 + $0x648] sm:$0xff] %v4001_v58  ;;  %v3894_v61 = vadd.f32 %v3893_v54, %v6673_v36  ;;  %v4007_v62 = vadd.f32 %v4006_v55, %v6677_v22  ;;  %v3895_v59 = vpop.f32.mrb[166].mxu0  ;;  %v4008_v0 = vpop.f32.mrb[198].mxu1  ;;  %s5699_s16 = scalar_lea.vmem %s4304_s30, 36864  ;;  %p5704_p9 = scmp.lt.s32.totalorder %s4304_s30, %s4304_s30 }
 0xb7b   :  { %4198 = vst [vmem:[#allocation25 + $0x660] sm:$0xff] %v3892_v53  ;;  %4200 = vst [vmem:[#allocation25 + $0x670] sm:$0xff] %v4005_v20  ;;  %v3896_v3 = vadd.f32 %v3895_v59, %v6665_v40  ;;  %v4009_v4 = vadd.f32 %v4008_v0, %v6669_v33  ;;  %v3897_v15 = vpop.f32.mrb[167].mxu0  ;;  %v4010_v10 = vpop.f32.mrb[199].mxu1  ;;  %p5700_p8 = scmp.ne.s32.totalorder %s4304_s30, %s5699_s16  ;;  %p5705_p10 = scmp.lt.s32.totalorder %s5699_s16, %s5699_s16 }
 0xb7c   :  { %4199 = vst [vmem:[#allocation25 + $0x668] sm:$0xff] %v3894_v61  ;;  %4201 = vst [vmem:[#allocation25 + $0x678] sm:$0xff] %v4007_v62  ;;  %v3898_v5 = vadd.f32 %v3897_v15, %v6673_v36  ;;  %v4011_v7 = vadd.f32 %v4010_v10, %v6677_v22 }
 0xb7d   :  { %4204 = vst [vmem:[#allocation25 + $0x690] sm:$0xff] %v3896_v3  ;;  %4206 = vst [vmem:[#allocation25 + $0x6a0] sm:$0xff] %v4009_v4  ;;  %v3901_v8 = vpop.f32.mrb[168].mxu0  ;;  %v4014_v9 = vpop.f32.mrb[200].mxu1  ;;  %p5706_p11 = por %p5705_p10, %p5704_p9 }
 0xb7e   :  { %4205 = vst [vmem:[#allocation25 + $0x698] sm:$0xff] %v3898_v5  ;;  %4207 = vst [vmem:[#allocation25 + $0x6a8] sm:$0xff] %v4011_v7  ;;  %v3902_v12 = vadd.f32 %v3901_v8, %v6665_v40  ;;  %v4015_v13 = vadd.f32 %v4014_v9, %v6669_v33  ;;  %v3903_v60 = vpop.f32.mrb[169].mxu0  ;;  %v4016_v42 = vpop.f32.mrb[201].mxu1 }
 0xb7f   :  { %v3904_v21 = vadd.f32 %v3903_v60, %v6673_v36  ;;  %v4017_v6 = vadd.f32 %v4016_v42, %v6677_v22  ;;  %v3905_v16 = vpop.f32.mrb[170].mxu0  ;;  %v4018_v18 = vpop.f32.mrb[202].mxu1  ;;  %p5707_p12 = pnand %p5706_p11, %p5700_p8 }
 0xb80   :  { %4210 = vst [vmem:[#allocation25 + $0x6c0] sm:$0xff] %v3902_v12  ;;  %4212 = vst [vmem:[#allocation25 + $0x6d0] sm:$0xff] %v4015_v13  ;;  %v3906_v24 = vadd.f32 %v3905_v16, %v6665_v40  ;;  %v4019_v26 = vadd.f32 %v4018_v18, %v6669_v33  ;;  %v3907_v28 = vpop.f32.mrb[171].mxu0  ;;  %v4020_v50 = vpop.f32.mrb[203].mxu1 }
 0xb81   :  { %4211 = vst [vmem:[#allocation25 + $0x6c8] sm:$0xff] %v3904_v21  ;;  %4213 = vst [vmem:[#allocation25 + $0x6d8] sm:$0xff] %v4017_v6  ;;  %v3908_v29 = vadd.f32 %v3907_v28, %v6673_v36  ;;  %v4021_v37 = vadd.f32 %v4020_v50, %v6677_v22 }
 0xb82   :  { %4216 = vst [vmem:[#allocation25 + $0x6f0] sm:$0xff] %v3906_v24  ;;  %4218 = vst [vmem:[#allocation25 + $0x700] sm:$0xff] %v4019_v26 }
 0xb83   :  { %4217 = vst [vmem:[#allocation25 + $0x6f8] sm:$0xff] %v3908_v29  ;;  %4219 = vst [vmem:[#allocation25 + $0x708] sm:$0xff] %v4021_v37 }
 0xb85   :  { %v3911_v34 = vpop.f32.mrb[172].mxu0  ;;  %v4024_v35 = vpop.f32.mrb[204].mxu1 }
 0xb86   :  { %v3912_v1 = vadd.f32 %v3911_v34, %v6665_v40  ;;  %v4025_v2 = vadd.f32 %v4024_v35, %v6669_v33  ;;  %v3913_v11 = vpop.f32.mrb[173].mxu0  ;;  %v4026_v30 = vpop.f32.mrb[205].mxu1 }
 0xb87   :  { %v3914_v32 = vadd.f32 %v3913_v11, %v6673_v36  ;;  %v4027_v41 = vadd.f32 %v4026_v30, %v6677_v22  ;;  %v3915_v23 = vpop.f32.mrb[174].mxu0  ;;  %v4028_v39 = vpop.f32.mrb[206].mxu1 }
 0xb88   :  { %4222 = vst [vmem:[#allocation25 + $0x720] sm:$0xff] %v3912_v1  ;;  %4224 = vst [vmem:[#allocation25 + $0x730] sm:$0xff] %v4025_v2  ;;  %v3916_v43 = vadd.f32 %v3915_v23, %v6665_v40  ;;  %v4029_v38 = vadd.f32 %v4028_v39, %v6669_v33  ;;  %v3917_v27 = vpop.f32.mrb[175].mxu0  ;;  %v4030_v44 = vpop.f32.mrb[207].mxu1 }
 0xb89   :  { %4223 = vst [vmem:[#allocation25 + $0x728] sm:$0xff] %v3914_v32  ;;  %4225 = vst [vmem:[#allocation25 + $0x738] sm:$0xff] %v4027_v41  ;;  %v3918_v17 = vadd.f32 %v3917_v27, %v6673_v36  ;;  %v4031_v56 = vadd.f32 %v4030_v44, %v6677_v22 }
 0xb8a   :  { %4228 = vst [vmem:[#allocation25 + $0x750] sm:$0xff] %v3916_v43  ;;  %4230 = vst [vmem:[#allocation25 + $0x760] sm:$0xff] %v4029_v38 }
 0xb8b   :  { %4229 = vst [vmem:[#allocation25 + $0x758] sm:$0xff] %v3918_v17  ;;  %4231 = vst [vmem:[#allocation25 + $0x768] sm:$0xff] %v4031_v56 }
 0xb8d   :  { %v3921_v57 = vpop.f32.mrb[176].mxu0  ;;  %v4034_v45 = vpop.f32.mrb[208].mxu1 }
 0xb8e   :  { %v3922_v46 = vadd.f32 %v3921_v57, %v6665_v40  ;;  %v4035_v47 = vadd.f32 %v4034_v45, %v6669_v33  ;;  %v3923_v48 = vpop.f32.mrb[177].mxu0  ;;  %v4036_v49 = vpop.f32.mrb[209].mxu1 }
 0xb8f   :  { %v3924_v63 = vadd.f32 %v3923_v48, %v6673_v36  ;;  %v4037_v51 = vadd.f32 %v4036_v49, %v6677_v22  ;;  %v3925_v58 = vpop.f32.mrb[178].mxu0  ;;  %v4038_v52 = vpop.f32.mrb[210].mxu1 }
 0xb90   :  { %4234 = vst [vmem:[#allocation25 + $0x780] sm:$0xff] %v3922_v46  ;;  %4236 = vst [vmem:[#allocation25 + $0x790] sm:$0xff] %v4035_v47  ;;  %v3926_v25 = vadd.f32 %v3925_v58, %v6665_v40  ;;  %v4039_v53 = vadd.f32 %v4038_v52, %v6669_v33  ;;  %v3927_v20 = vpop.f32.mrb[179].mxu0  ;;  %v4040_v54 = vpop.f32.mrb[211].mxu1 }
 0xb91   :  { %4235 = vst [vmem:[#allocation25 + $0x788] sm:$0xff] %v3924_v63  ;;  %4237 = vst [vmem:[#allocation25 + $0x798] sm:$0xff] %v4037_v51  ;;  %v3928_v55 = vadd.f32 %v3927_v20, %v6673_v36  ;;  %v4041_v61 = vadd.f32 %v4040_v54, %v6677_v22  ;;  %v6757_v51 = vrot.slane %v6661_v31, %v6281_v14 }
 0xb92   :  { %4240 = vst [vmem:[#allocation25 + $0x7b0] sm:$0xff] %v3926_v25  ;;  %4242 = vst [vmem:[#allocation25 + $0x7c0] sm:$0xff] %v4039_v53 }
 0xb93   :  { %4241 = vst [vmem:[#allocation25 + $0x7b8] sm:$0xff] %v3928_v55  ;;  %4243 = vst [vmem:[#allocation25 + $0x7c8] sm:$0xff] %v4041_v61 }
 0xb95   :  { %v3931_v62 = vpop.f32.mrb[180].mxu0  ;;  %v4044_v59 = vpop.f32.mrb[212].mxu1 }
 0xb96   :  { %v3932_v0 = vadd.f32 %v3931_v62, %v6665_v40  ;;  %v4045_v3 = vadd.f32 %v4044_v59, %v6669_v33  ;;  %v3933_v4 = vpop.f32.mrb[181].mxu0  ;;  %v4046_v15 = vpop.f32.mrb[213].mxu1 }
 0xb97   :  { %v3934_v10 = vadd.f32 %v3933_v4, %v6673_v36  ;;  %v4047_v5 = vadd.f32 %v4046_v15, %v6677_v22  ;;  %v3935_v7 = vpop.f32.mrb[182].mxu0  ;;  %v4048_v8 = vpop.f32.mrb[214].mxu1 }
 0xb98   :  { %4246 = vst [vmem:[#allocation25 + $0x7e0] sm:$0xff] %v3932_v0  ;;  %4248 = vst [vmem:[#allocation25 + $0x7f0] sm:$0xff] %v4045_v3  ;;  %v3936_v9 = vadd.f32 %v3935_v7, %v6665_v40  ;;  %v4049_v12 = vadd.f32 %v4048_v8, %v6669_v33  ;;  %v3937_v13 = vpop.f32.mrb[183].mxu0  ;;  %v4050_v60 = vpop.f32.mrb[215].mxu1 }
 0xb99   :  { %4247 = vst [vmem:[#allocation25 + $0x7e8] sm:$0xff] %v3934_v10  ;;  %4249 = vst [vmem:[#allocation25 + $0x7f8] sm:$0xff] %v4047_v5  ;;  %v3938_v42 = vadd.f32 %v3937_v13, %v6673_v36  ;;  %v4051_v21 = vadd.f32 %v4050_v60, %v6677_v22 }
 0xb9a   :  { %4252 = vst [vmem:[#allocation25 + $0x810] sm:$0xff] %v3936_v9  ;;  %4254 = vst [vmem:[#allocation25 + $0x820] sm:$0xff] %v4049_v12 }
 0xb9b   :  { %4253 = vst [vmem:[#allocation25 + $0x818] sm:$0xff] %v3938_v42  ;;  %4255 = vst [vmem:[#allocation25 + $0x828] sm:$0xff] %v4051_v21 }
 0xb9d   :  { %v3941_v6 = vpop.f32.mrb[184].mxu0  ;;  %v4054_v16 = vpop.f32.mrb[216].mxu1 }
 0xb9e   :  { %v3942_v18 = vadd.f32 %v3941_v6, %v6665_v40  ;;  %v4055_v24 = vadd.f32 %v4054_v16, %v6669_v33  ;;  %v3943_v26 = vpop.f32.mrb[185].mxu0  ;;  %v4056_v28 = vpop.f32.mrb[217].mxu1 }
 0xb9f   :  { %v3944_v50 = vadd.f32 %v3943_v26, %v6673_v36  ;;  %v4057_v29 = vadd.f32 %v4056_v28, %v6677_v22  ;;  %v3945_v37 = vpop.f32.mrb[186].mxu0  ;;  %v4058_v34 = vpop.f32.mrb[218].mxu1 }
 0xba0   :  { %4258 = vst [vmem:[#allocation25 + $0x840] sm:$0xff] %v3942_v18  ;;  %4260 = vst [vmem:[#allocation25 + $0x850] sm:$0xff] %v4055_v24  ;;  %v3946_v35 = vadd.f32 %v3945_v37, %v6665_v40  ;;  %v4059_v1 = vadd.f32 %v4058_v34, %v6669_v33  ;;  %v3947_v2 = vpop.f32.mrb[187].mxu0  ;;  %v4060_v11 = vpop.f32.mrb[219].mxu1 }
 0xba1   :  { %4259 = vst [vmem:[#allocation25 + $0x848] sm:$0xff] %v3944_v50  ;;  %4261 = vst [vmem:[#allocation25 + $0x858] sm:$0xff] %v4057_v29  ;;  %v3948_v30 = vadd.f32 %v3947_v2, %v6673_v36  ;;  %v4061_v32 = vadd.f32 %v4060_v11, %v6677_v22 }
 0xba2   :  { %4264 = vst [vmem:[#allocation25 + $0x870] sm:$0xff] %v3946_v35  ;;  %4266 = vst [vmem:[#allocation25 + $0x880] sm:$0xff] %v4059_v1 }
 0xba3   :  { %4265 = vst [vmem:[#allocation25 + $0x878] sm:$0xff] %v3948_v30  ;;  %4267 = vst [vmem:[#allocation25 + $0x888] sm:$0xff] %v4061_v32 }
 0xba5   :  { %v3951_v41 = vpop.f32.mrb[188].mxu0  ;;  %v4064_v23 = vpop.f32.mrb[220].mxu1 }
 0xba6   :  { %v3952_v39 = vadd.f32 %v3951_v41, %v6665_v40  ;;  %v4065_v43 = vadd.f32 %v4064_v23, %v6669_v33  ;;  %v3953_v38 = vpop.f32.mrb[189].mxu0  ;;  %v4066_v27 = vpop.f32.mrb[221].mxu1 }
 0xba7   :  { %v3954_v44 = vadd.f32 %v3953_v38, %v6673_v36  ;;  %v4067_v17 = vadd.f32 %v4066_v27, %v6677_v22  ;;  %v3955_v56 = vpop.f32.mrb[190].mxu0  ;;  %v4068_v57 = vpop.f32.mrb[222].mxu1 }
 0xba8   :  { %4270 = vst [vmem:[#allocation25 + $0x8a0] sm:$0xff] %v3952_v39  ;;  %4272 = vst [vmem:[#allocation25 + $0x8b0] sm:$0xff] %v4065_v43  ;;  %v3956_v45 = vadd.f32 %v3955_v56, %v6665_v40  ;;  %v4069_v46 = vadd.f32 %v4068_v57, %v6669_v33  ;;  %v3957_v47 = vpop.f32.mrb[191].mxu0  ;;  %v4070_v48 = vpop.f32.mrb[223].mxu1  ;;  %v6761_v40 = vrot.slane %v6661_v31, %v6286_v19 }
 0xba9   :  { %4271 = vst [vmem:[#allocation25 + $0x8a8] sm:$0xff] %v3954_v44  ;;  %4273 = vst [vmem:[#allocation25 + $0x8b8] sm:$0xff] %v4067_v17  ;;  %v3958_v49 = vadd.f32 %v3957_v47, %v6673_v36  ;;  %v4071_v63 = vadd.f32 %v4070_v48, %v6677_v22 }
 0xbaa   :  { %4276 = vst [vmem:[#allocation25 + $0x8d0] sm:$0xff] %v3956_v45  ;;  %4278 = vst [vmem:[#allocation25 + $0x8e0] sm:$0xff] %v4069_v46 }
 0xbab   :  { %4277 = vst [vmem:[#allocation25 + $0x8d8] sm:$0xff] %v3958_v49  ;;  %4279 = vst [vmem:[#allocation25 + $0x8e8] sm:$0xff] %v4071_v63 }
 0xbad   :  { %v4107_v33 = vpop.f32.mrb[192].mxu0 }
 0xbae   :  { %v4108_v58 = vadd.f32 %v4107_v33, %v6757_v51  ;;  %v4109_v52 = vpop.f32.mrb[193].mxu0 }
 0xbaf   :  { %v4110_v36 = vadd.f32 %v4109_v52, %v6761_v40  ;;  %v4111_v25 = vpop.f32.mrb[194].mxu0 }
 0xbb0   :  { %4190 = vst [vmem:[#allocation25 + $0x620] sm:$0xff] %v4108_v58  ;;  %v4112_v22 = vadd.f32 %v4111_v25, %v6757_v51  ;;  %v4113_v53 = vpop.f32.mrb[195].mxu0 }
 0xbb1   :  { %4191 = vst [vmem:[#allocation25 + $0x628] sm:$0xff] %v4110_v36  ;;  %v4114_v14 = vadd.f32 %v4113_v53, %v6761_v40 }
 0xbb2   :  { %4196 = vst [vmem:[#allocation25 + $0x650] sm:$0xff] %v4112_v22 }
 0xbb3   :  { %4197 = vst [vmem:[#allocation25 + $0x658] sm:$0xff] %v4114_v14 }
 0xbb5   :  { %v4117_v20 = vpop.f32.mrb[196].mxu0 }
 0xbb6   :  { %v4118_v19 = vadd.f32 %v4117_v20, %v6757_v51  ;;  %v4119_v31 = vpop.f32.mrb[197].mxu0 }
 0xbb7   :  { %v4120_v54 = vadd.f32 %v4119_v31, %v6761_v40  ;;  %v4121_v55 = vpop.f32.mrb[198].mxu0 }
 0xbb8   :  { %4202 = vst [vmem:[#allocation25 + $0x680] sm:$0xff] %v4118_v19  ;;  %v4122_v61 = vadd.f32 %v4121_v55, %v6757_v51  ;;  %v4123_v62 = vpop.f32.mrb[199].mxu0 }
 0xbb9   :  { %4203 = vst [vmem:[#allocation25 + $0x688] sm:$0xff] %v4120_v54  ;;  %v4124_v59 = vadd.f32 %v4123_v62, %v6761_v40 }
 0xbba   :  { %4208 = vst [vmem:[#allocation25 + $0x6b0] sm:$0xff] %v4122_v61 }
 0xbbb   :  { %4209 = vst [vmem:[#allocation25 + $0x6b8] sm:$0xff] %v4124_v59 }
 0xbbd   :  { %v4127_v0 = vpop.f32.mrb[200].mxu0 }
 0xbbe   :  { %v4128_v3 = vadd.f32 %v4127_v0, %v6757_v51  ;;  %v4129_v4 = vpop.f32.mrb[201].mxu0 }
 0xbbf   :  { %v4130_v15 = vadd.f32 %v4129_v4, %v6761_v40  ;;  %v4131_v10 = vpop.f32.mrb[202].mxu0 }
 0xbc0   :  { %4214 = vst [vmem:[#allocation25 + $0x6e0] sm:$0xff] %v4128_v3  ;;  %v4132_v5 = vadd.f32 %v4131_v10, %v6757_v51  ;;  %v4133_v7 = vpop.f32.mrb[203].mxu0 }
 0xbc1   :  { %4215 = vst [vmem:[#allocation25 + $0x6e8] sm:$0xff] %v4130_v15  ;;  %v4134_v8 = vadd.f32 %v4133_v7, %v6761_v40 }
 0xbc2   :  { %4220 = vst [vmem:[#allocation25 + $0x710] sm:$0xff] %v4132_v5 }
 0xbc3   :  { %4221 = vst [vmem:[#allocation25 + $0x718] sm:$0xff] %v4134_v8 }
 0xbc5   :  { %v4137_v9 = vpop.f32.mrb[204].mxu0 }
 0xbc6   :  { %v4138_v12 = vadd.f32 %v4137_v9, %v6757_v51  ;;  %v4139_v13 = vpop.f32.mrb[205].mxu0 }
 0xbc7   :  { %v4140_v60 = vadd.f32 %v4139_v13, %v6761_v40  ;;  %v4141_v42 = vpop.f32.mrb[206].mxu0 }
 0xbc8   :  { %4226 = vst [vmem:[#allocation25 + $0x740] sm:$0xff] %v4138_v12  ;;  %v4142_v21 = vadd.f32 %v4141_v42, %v6757_v51  ;;  %v4143_v6 = vpop.f32.mrb[207].mxu0 }
 0xbc9   :  { %4227 = vst [vmem:[#allocation25 + $0x748] sm:$0xff] %v4140_v60  ;;  %v4144_v16 = vadd.f32 %v4143_v6, %v6761_v40 }
 0xbca   :  { %4232 = vst [vmem:[#allocation25 + $0x770] sm:$0xff] %v4142_v21 }
 0xbcb   :  { %4233 = vst [vmem:[#allocation25 + $0x778] sm:$0xff] %v4144_v16 }
 0xbcd   :  { %v4147_v18 = vpop.f32.mrb[208].mxu0 }
 0xbce   :  { %v4148_v24 = vadd.f32 %v4147_v18, %v6757_v51  ;;  %v4149_v26 = vpop.f32.mrb[209].mxu0 }
 0xbcf   :  { %v4150_v28 = vadd.f32 %v4149_v26, %v6761_v40  ;;  %v4151_v50 = vpop.f32.mrb[210].mxu0 }
 0xbd0   :  { %4238 = vst [vmem:[#allocation25 + $0x7a0] sm:$0xff] %v4148_v24  ;;  %v4152_v29 = vadd.f32 %v4151_v50, %v6757_v51  ;;  %v4153_v37 = vpop.f32.mrb[211].mxu0 }
 0xbd1   :  { %4239 = vst [vmem:[#allocation25 + $0x7a8] sm:$0xff] %v4150_v28  ;;  %v4154_v34 = vadd.f32 %v4153_v37, %v6761_v40 }
 0xbd2   :  { %4244 = vst [vmem:[#allocation25 + $0x7d0] sm:$0xff] %v4152_v29 }
 0xbd3   :  { %4245 = vst [vmem:[#allocation25 + $0x7d8] sm:$0xff] %v4154_v34 }
 0xbd5   :  { %v4157_v35 = vpop.f32.mrb[212].mxu0 }
 0xbd6   :  { %v4158_v1 = vadd.f32 %v4157_v35, %v6757_v51  ;;  %v4159_v2 = vpop.f32.mrb[213].mxu0 }
 0xbd7   :  { %v4160_v11 = vadd.f32 %v4159_v2, %v6761_v40  ;;  %v4161_v30 = vpop.f32.mrb[214].mxu0 }
 0xbd8   :  { %4250 = vst [vmem:[#allocation25 + $0x800] sm:$0xff] %v4158_v1  ;;  %v4162_v32 = vadd.f32 %v4161_v30, %v6757_v51  ;;  %v4163_v41 = vpop.f32.mrb[215].mxu0 }
 0xbd9   :  { %4251 = vst [vmem:[#allocation25 + $0x808] sm:$0xff] %v4160_v11  ;;  %v4164_v23 = vadd.f32 %v4163_v41, %v6761_v40 }
 0xbda   :  { %4256 = vst [vmem:[#allocation25 + $0x830] sm:$0xff] %v4162_v32 }
 0xbdb   :  { %4257 = vst [vmem:[#allocation25 + $0x838] sm:$0xff] %v4164_v23 }
 0xbdd   :  { %v4167_v39 = vpop.f32.mrb[216].mxu0 }
 0xbde   :  { %v4168_v43 = vadd.f32 %v4167_v39, %v6757_v51  ;;  %v4169_v38 = vpop.f32.mrb[217].mxu0 }
 0xbdf   :  { %v4170_v27 = vadd.f32 %v4169_v38, %v6761_v40  ;;  %v4171_v44 = vpop.f32.mrb[218].mxu0 }
 0xbe0   :  { %4262 = vst [vmem:[#allocation25 + $0x860] sm:$0xff] %v4168_v43  ;;  %v4172_v17 = vadd.f32 %v4171_v44, %v6757_v51  ;;  %v4173_v56 = vpop.f32.mrb[219].mxu0 }
 0xbe1   :  { %4263 = vst [vmem:[#allocation25 + $0x868] sm:$0xff] %v4170_v27  ;;  %v4174_v57 = vadd.f32 %v4173_v56, %v6761_v40 }
 0xbe2   :  { %4268 = vst [vmem:[#allocation25 + $0x890] sm:$0xff] %v4172_v17 }
 0xbe3   :  { %4269 = vst [vmem:[#allocation25 + $0x898] sm:$0xff] %v4174_v57 }
 0xbe5   :  { %v4177_v45 = vpop.f32.mrb[220].mxu0 }
 0xbe6   :  { %v4178_v46 = vadd.f32 %v4177_v45, %v6757_v51  ;;  %v4179_v47 = vpop.f32.mrb[221].mxu0 }
 0xbe7   :  { %v4180_v48 = vadd.f32 %v4179_v47, %v6761_v40  ;;  %v4181_v49 = vpop.f32.mrb[222].mxu0 }
 0xbe8   :  { %4274 = vst [vmem:[#allocation25 + $0x8c0] sm:$0xff] %v4178_v46  ;;  %v4182_v63 = vadd.f32 %v4181_v49, %v6757_v51  ;;  %v4183_v33 = vpop.f32.mrb[223].mxu0 }
 0xbe9   :  { %4275 = vst [vmem:[#allocation25 + $0x8c8] sm:$0xff] %v4180_v48  ;;  %v4184_v58 = vadd.f32 %v4183_v33, %v6761_v40 }
 0xbea   :  { %4280 = vst [vmem:[#allocation25 + $0x8f0] sm:$0xff] %v4182_v63 }
 0xbeb   :  { %4281 = vst [vmem:[#allocation25 + $0x8f8] sm:$0xff] %v4184_v58 }
 0xbec   :  { %5710 = shalt.err (!%p5707_p12)
}
 0xbed   :  { %s5711_s3 = scalar_lea.hbm %s6821_s14, 36864 }
 0xbee   :  { %p5712_p13 = scmp.ne.s32.totalorder %s6821_s14, %s5711_s3  ;;  %p5715_p0 = scmp.lt.u32.totalorder %s5711_s3, %s6821_s14 }
 0xbf0   :  { %p5717_p1 = pnand %p5715_p0, %p5712_p13 }
 0xbf2   :  { %5720 = shalt.err (!%p5717_p1)
}
 0xbf3   :  { %s5764_s28 = smov 768   ;;  %s5765_s0 = smov 48  }
 0xbf4   :  { %4309 = dma.vmem_to_hbm [thread:$0]  %s4304_s30, 36864, %s6821_s14, [#allocation4], %s5764_s28, %s5764_s28, %s5765_s0  }
 0xbf5   :  { %5737 = dma.done.wait [#allocation4], 36864  }
 0xbf6   :  { %5738 = vsyncadd [#allocation4], 4294930432 }
 0xbf7   :  { %5739 = dma.done.wait [#allocation27], 2048  }
 0xbf8   :  { %5740 = vsyncadd [#allocation27], 4294965248 }
 0xbf9   :  { %4328 = vsyncpa [#allocation3], 1 }
 0xbfa   :  { %4329 = vsyncpa [#allocation6], 1 }
 0xbfb   :  { %4330 = vsyncpa [#allocation9], 1 }
 0xbfc   :  { %4331 = vsyncpa [#allocation12], 1 }
 0xbfd   :  { %4332 = vsyncpa [#allocation15], 1 }
 0xbfe   :  { %4333 = vsyncpa [#allocation18], 1 }
 0xbff   :  { %4334 = vsyncpa [#allocation21], 1 }
 0xc00   :  { %4335 = vsyncpa [#allocation24], 1 }
 0xc01   :  { %4336 = vsyncpa [#allocation4], 1 }
 0xc02   :  { %4337 = vsyncpa [#allocation27], 1 }

</bundles_post_ra>
